<compile_context>
chip_gen: v7x
topology: tpu7x:2x2x1
jax: 0.10.0
libtpu: 0.0.40
codegen_flags: <defaults>
</compile_context>

<pallas_src>
import functools

import jax
import jax.numpy as jnp
from jax.experimental import pallas as pl
from jax.experimental.pallas import tpu as pltpu


# ----------------------------- Pallas kernel -------------------------------

def _conv_lrelu_kernel(x_ref, w_ref, o_ref, xp_ref, *, kh, kw, stride, dilation,
                       padding, toh, ow, negative_slope):
    """One (batch, output-row-block) grid step.

    x_ref : (H, W, C)      bf16  unpadded NHWC image for this batch (VMEM-resident)
    w_ref : (KH*KW*C, Np)  bf16  conv weight packed for a single big-K matmul
    o_ref : (toh*ow, Np)   f32   lane-dense output tile
    xp_ref: (Hp, Wp, C)    bf16  VMEM scratch: zero-padded image (pad fused in-kernel)
    """
    h, w, c = x_ref.shape
    rb = pl.program_id(1)

    # Build the zero-padded image once per batch; it stays resident across all
    # row blocks of this batch (fuses the jnp.pad HBM pass into the kernel).
    @pl.when(rb == 0)
    def _():
        if padding > 0:
            xp_ref[...] = jnp.zeros_like(xp_ref)
            xp_ref[pl.ds(padding, h), pl.ds(padding, w), :] = x_ref[...]
        else:
            xp_ref[...] = x_ref[...]

    # First padded-input row of this output-row block (aligned-slice hint).
    row0 = pl.multiple_of(rb * (toh * stride), toh * stride)

    # Fused im2col: gather the KH*KW shifted windows on-chip, pack them into ONE
    # (toh*ow, KH*KW*C) patch tile -> a single big-K MXU matmul (instead of KH*KW
    # rank-C dots with an f32 accumulator RMW per tap).
    taps = []
    for i in range(kh):
        for j in range(kw):
            r0 = row0 + i * dilation
            c0 = j * dilation
            if stride == 1:
                win = xp_ref[pl.ds(r0, toh), pl.ds(c0, ow), :]
            else:
                # TODO(synk): for stride>1, decimate the row strip once into a
                # scratch and reuse it across taps instead of KH*KW strided loads.
                win = xp_ref[pl.ds(r0, toh, stride), pl.ds(c0, ow, stride), :]
            taps.append(win.reshape(toh * ow, c))
    patch = jnp.concatenate(taps, axis=-1)                      # (M_tile, KH*KW*C)

    acc = jnp.dot(patch, w_ref[...], preferred_element_type=jnp.float32)
    # Fused LeakyReLU(negative_slope).
    acc = jnp.where(acc >= 0, acc, negative_slope * acc)
    o_ref[...] = acc.astype(o_ref.dtype)


# ------------------------------ wrapper --------------------------------------

def _pick_row_block(oh, ow, target_rows=256):
    """Largest divisor of oh with toh*ow a multiple of 8 and near target_rows."""
    cap = max(1, target_rows // max(ow, 1))
    best = None
    for d in range(1, oh + 1):
        if oh % d == 0 and d <= cap and (d * ow) % 8 == 0:
            best = d
    if best is None:
        # No 8-aligned divisor: fall back to one full-height block (block equals
        # the full OH*OW dim, which always satisfies the layout rule).
        best = oh
    return best


def conv2d_lrelu_pallas(x, weight, *, stride=1, padding=0, dilation=1,
                        negative_slope=0.1):
    """x: (N, C, H, W) f32, weight: (n_out, C, KH, KW) f32 -> (N, n_out, OH, OW) f32."""
    n, c, h, w = x.shape
    n_out, c2, kh, kw = weight.shape
    assert c == c2
    oh = (h + 2 * padding - dilation * (kh - 1) - 1) // stride + 1
    ow = (w + 2 * padding - dilation * (kw - 1) - 1) // stride + 1
    hp, wp = h + 2 * padding, w + 2 * padding

    # NCHW -> NHWC (lane-friendly channel-last), bf16. Spatial padding is fused
    # into the kernel (VMEM halo scratch), so no padded HBM copy is made here.
    xh = jnp.transpose(x, (0, 2, 3, 1)).astype(jnp.bfloat16)

    # Output channels padded lane-dense: 128 for small layers (v5e 128x128 MXU),
    # 256-aligned when n_out > 128 (v6e/v7x 256x256 MXU).
    if n_out <= 128:
        np_ = 128
    else:
        np_ = ((n_out + 255) // 256) * 256

    # Weight (n_out, C, KH, KW) -> (KH*KW*C, Np): one big-K matmul per tile.
    wmat = jnp.transpose(weight, (2, 3, 1, 0)).astype(jnp.bfloat16)  # (KH,KW,C,n_out)
    wmat = wmat.reshape(kh * kw * c, n_out)
    if np_ != n_out:
        wmat = jnp.pad(wmat, ((0, 0), (0, np_ - n_out)))

    toh = _pick_row_block(oh, ow)
    n_rb = oh // toh

    kernel = functools.partial(
        _conv_lrelu_kernel, kh=kh, kw=kw, stride=stride, dilation=dilation,
        padding=padding, toh=toh, ow=ow, negative_slope=negative_slope)

    # VMEM budget (bytes): double-buffered x / out blocks, weight, halo scratch.
    bytes_x = h * w * c * 2
    bytes_w = kh * kw * c * np_ * 2
    bytes_o = toh * ow * np_ * 4
    bytes_pad = hp * wp * c * 2
    vmem_need = 2 * (bytes_x + bytes_o + bytes_w) + bytes_pad + (2 << 20)
    vmem_limit = int(min(max(vmem_need, 32 << 20), 96 << 20))

    cost = pl.CostEstimate(
        flops=2 * n * oh * ow * kh * kw * c * n_out,
        transcendentals=0,
        bytes_accessed=n * bytes_x + bytes_w + n * n_rb * bytes_o)

    out = pl.pallas_call(
        kernel,
        out_shape=jax.ShapeDtypeStruct((n, oh * ow, np_), jnp.float32),
        grid=(n, n_rb),
        in_specs=[
            # Full (unpadded) NHWC image per batch; block index is constant over
            # the rb axis so it is DMA'd from HBM exactly once per batch.
            # TODO(synk): for large H*W*C switch to overlapping row-halo blocks
            # (pl.Element on H, or manual make_async_copy double-buffering) so
            # VMEM stays bounded on v7x (64 MiB) / under v5e's 16 MiB scoped default.
            pl.BlockSpec((None, h, w, c), lambda b, rb: (b, 0, 0, 0)),
            # Packed weight, resident across the whole grid.
            pl.BlockSpec((kh * kw * c, np_), lambda b, rb: (0, 0)),
        ],
        out_specs=pl.BlockSpec((None, toh * ow, np_), lambda b, rb: (b, rb, 0)),
        scratch_shapes=[pltpu.VMEM((hp, wp, c), jnp.bfloat16)],
        compiler_params=pltpu.CompilerParams(
            dimension_semantics=("parallel", "arbitrary"),
            vmem_limit_bytes=vmem_limit),
        cost_estimate=cost,
    )(xh, wmat)

    # Lane-dense slab -> NHWC -> drop pad channels -> NCHW (API boundary only).
    # TODO(synk): keep NHWC (and optionally bf16) through the model to avoid this
    # extra HBM pass; NCHW f32 is kept here only to match the PyTorch module API.
    out = out.reshape(n, oh, ow, np_)[..., :n_out]
    return jnp.transpose(out, (0, 3, 1, 2))


class Conv2dPallas:
    """Mirrors the PyTorch `Conv2d` module: Conv2d(bias=False) + LeakyReLU(0.1)."""

    def __init__(self, n_in, n_out, kernel_size, stride=1, padding=0,
                 dilation=1, negative_slope=0.1, key=None, dtype=jnp.float32):
        if isinstance(kernel_size, int):
            kernel_size = (kernel_size, kernel_size)
        self.n_in, self.n_out = n_in, n_out
        self.kh, self.kw = kernel_size
        self.stride, self.padding, self.dilation = stride, padding, dilation
        self.negative_slope = negative_slope
        if key is None:
            key = jax.random.PRNGKey(42)
        fan_in = n_in * self.kh * self.kw
        bound = 1.0 / float(fan_in) ** 0.5
        # PyTorch weight layout: (n_out, n_in, KH, KW), kaiming-uniform-style bound.
        self.weight = jax.random.uniform(
            key, (n_out, n_in, self.kh, self.kw), dtype=dtype,
            minval=-bound, maxval=bound)
        # TODO(synk): optional norm layer branch (norm != None) not implemented;
        # the module's default norm=None has no norm op.

    def __call__(self, x):
        return conv2d_lrelu_pallas(
            x, self.weight, stride=self.stride, padding=self.padding,
            dilation=self.dilation, negative_slope=self.negative_slope)


# ------------------------------ main / check ---------------------------------

if __name__ == "__main__":
    key = jax.random.PRNGKey(0)
    kx, kw_key = jax.random.split(key)

    N, C, H, W = 2, 4, 16, 16
    n_out, ksize, stride, padding = 8, 3, 1, 1

    x = jax.random.normal(kx, (N, C, H, W), dtype=jnp.float32)
    conv = Conv2dPallas(C, n_out, ksize, stride=stride, padding=padding,
                        dilation=1, key=kw_key)

    y = jax.block_until_ready(conv(x))

    # Reference with the same bf16 inputs / f32 accumulation as the kernel.
    y_ref = jax.lax.conv_general_dilated(
        x.astype(jnp.bfloat16), conv.weight.astype(jnp.bfloat16),
        window_strides=(stride, stride),
        padding=((padding, padding), (padding, padding)),
        rhs_dilation=(1, 1),
        dimension_numbers=("NCHW", "OIHW", "NCHW"),
        preferred_element_type=jnp.float32)
    y_ref = jnp.where(y_ref >= 0, y_ref, 0.1 * y_ref)

    assert y.shape == (N, n_out, H, W), y.shape
    max_err = float(jnp.max(jnp.abs(y - y_ref)))
    assert jnp.allclose(y, y_ref, atol=5e-3, rtol=5e-3), max_err

    print("KERNEL_OK")
</pallas_src>

<mosaic_0001>
module attributes {stable_mosaic.version = 11 : i64} {
  func.func @_conv_lrelu_kernel(%arg0: i32, %arg1: i32, %arg2: memref<1x16x16x4xbf16, #tpu.memory_space<vmem>>, %arg3: memref<36x128xbf16, #tpu.memory_space<vmem>>, %arg4: memref<1x256x128xf32, #tpu.memory_space<vmem>>, %arg5: memref<18x18x4xbf16, #tpu.memory_space<vmem>>) attributes {dimension_semantics = [#tpu.dimension_semantics<parallel>, #tpu.dimension_semantics<arbitrary>], iteration_bounds = array<i64: 2, 1>, scalar_prefetch = 0 : i64, scratch_operands = 1 : i64, tpu.core_type = #tpu.core_type<tc>, window_params = [{transform_indices = @transform_0, window_bounds = array<i64: 1, 16, 16, 4>}, {pipeline_mode = #tpu.pipeline_mode<synchronous>, transform_indices = @transform_1, window_bounds = array<i64: 36, 128>}, {transform_indices = @transform_2, window_bounds = array<i64: 1, 256, 128>}]} {
    %c0_i32 = arith.constant 0 : i32
    %0 = arith.cmpi eq, %arg1, %c0_i32 : i32
    %1 = arith.extui %0 : i1 to i32
    %c0_i32_0 = arith.constant 0 : i32
    %2 = arith.cmpi ne, %1, %c0_i32_0 : i32
    scf.if %2 {
      %cst_30 = arith.constant 0.000000e+00 : bf16
      %52 = vector.broadcast %cst_30 : bf16 to vector<18x18x4xbf16>
      %c0_31 = arith.constant 0 : index
      %c0_32 = arith.constant 0 : index
      %c0_33 = arith.constant 0 : index
      %53 = vector.load %arg5[%c0_31, %c0_32, %c0_33] : memref<18x18x4xbf16, #tpu.memory_space<vmem>>, vector<18x18x4xbf16>
      tpu.vector_store %arg5[%c0_31, %c0_32, %c0_33], %52 {strides = array<i32>} : memref<18x18x4xbf16, #tpu.memory_space<vmem>>, vector<18x18x4xbf16>,
      %c0_34 = arith.constant 0 : index
      %c0_35 = arith.constant 0 : index
      %c0_36 = arith.constant 0 : index
      %c0_37 = arith.constant 0 : index
      %54 = vector.load %arg2[%c0_34, %c0_35, %c0_36, %c0_37] : memref<1x16x16x4xbf16, #tpu.memory_space<vmem>>, vector<1x16x16x4xbf16>
      %55 = vector.shape_cast %54 : vector<1x16x16x4xbf16> to vector<16x16x4xbf16>
      %c1_38 = arith.constant 1 : index
      %c1_39 = arith.constant 1 : index
      %c0_40 = arith.constant 0 : index
      %56 = vector.load %arg5[%c1_38, %c1_39, %c0_40] : memref<18x18x4xbf16, #tpu.memory_space<vmem>>, vector<16x16x4xbf16>
      tpu.vector_store %arg5[%c1_38, %c1_39, %c0_40], %55 {strides = array<i32>} : memref<18x18x4xbf16, #tpu.memory_space<vmem>>, vector<16x16x4xbf16>,
    } else {
    }
    %c16_i32 = arith.constant 16 : i32
    %3 = arith.muli %arg1, %c16_i32 : i32
    %4 = tpu.assume_multiple %3, 16 : i32
    %c0_i32_1 = arith.constant 0 : i32
    %5 = arith.addi %4, %c0_i32_1 : i32
    %6 = arith.index_cast %5 : i32 to index
    %c0 = arith.constant 0 : index
    %c0_2 = arith.constant 0 : index
    %7 = vector.load %arg5[%6, %c0, %c0_2] : memref<18x18x4xbf16, #tpu.memory_space<vmem>>, vector<16x16x4xbf16>
    %8 = vector.shape_cast %7 : vector<16x16x4xbf16> to vector<256x4xbf16>
    %c0_i32_3 = arith.constant 0 : i32
    %9 = arith.addi %4, %c0_i32_3 : i32
    %10 = arith.index_cast %9 : i32 to index
    %c1 = arith.constant 1 : index
    %c0_4 = arith.constant 0 : index
    %11 = vector.load %arg5[%10, %c1, %c0_4] : memref<18x18x4xbf16, #tpu.memory_space<vmem>>, vector<16x16x4xbf16>
    %12 = vector.shape_cast %11 : vector<16x16x4xbf16> to vector<256x4xbf16>
    %c0_i32_5 = arith.constant 0 : i32
    %13 = arith.addi %4, %c0_i32_5 : i32
    %14 = arith.index_cast %13 : i32 to index
    %c2 = arith.constant 2 : index
    %c0_6 = arith.constant 0 : index
    %15 = vector.load %arg5[%14, %c2, %c0_6] : memref<18x18x4xbf16, #tpu.memory_space<vmem>>, vector<16x16x4xbf16>
    %16 = vector.shape_cast %15 : vector<16x16x4xbf16> to vector<256x4xbf16>
    %c1_i32 = arith.constant 1 : i32
    %17 = arith.addi %4, %c1_i32 : i32
    %18 = arith.index_cast %17 : i32 to index
    %c0_7 = arith.constant 0 : index
    %c0_8 = arith.constant 0 : index
    %19 = vector.load %arg5[%18, %c0_7, %c0_8] : memref<18x18x4xbf16, #tpu.memory_space<vmem>>, vector<16x16x4xbf16>
    %20 = vector.shape_cast %19 : vector<16x16x4xbf16> to vector<256x4xbf16>
    %c1_i32_9 = arith.constant 1 : i32
    %21 = arith.addi %4, %c1_i32_9 : i32
    %22 = arith.index_cast %21 : i32 to index
    %c1_10 = arith.constant 1 : index
    %c0_11 = arith.constant 0 : index
    %23 = vector.load %arg5[%22, %c1_10, %c0_11] : memref<18x18x4xbf16, #tpu.memory_space<vmem>>, vector<16x16x4xbf16>
    %24 = vector.shape_cast %23 : vector<16x16x4xbf16> to vector<256x4xbf16>
    %c1_i32_12 = arith.constant 1 : i32
    %25 = arith.addi %4, %c1_i32_12 : i32
    %26 = arith.index_cast %25 : i32 to index
    %c2_13 = arith.constant 2 : index
    %c0_14 = arith.constant 0 : index
    %27 = vector.load %arg5[%26, %c2_13, %c0_14] : memref<18x18x4xbf16, #tpu.memory_space<vmem>>, vector<16x16x4xbf16>
    %28 = vector.shape_cast %27 : vector<16x16x4xbf16> to vector<256x4xbf16>
    %c2_i32 = arith.constant 2 : i32
    %29 = arith.addi %4, %c2_i32 : i32
    %30 = arith.index_cast %29 : i32 to index
    %c0_15 = arith.constant 0 : index
    %c0_16 = arith.constant 0 : index
    %31 = vector.load %arg5[%30, %c0_15, %c0_16] : memref<18x18x4xbf16, #tpu.memory_space<vmem>>, vector<16x16x4xbf16>
    %32 = vector.shape_cast %31 : vector<16x16x4xbf16> to vector<256x4xbf16>
    %c2_i32_17 = arith.constant 2 : i32
    %33 = arith.addi %4, %c2_i32_17 : i32
    %34 = arith.index_cast %33 : i32 to index
    %c1_18 = arith.constant 1 : index
    %c0_19 = arith.constant 0 : index
    %35 = vector.load %arg5[%34, %c1_18, %c0_19] : memref<18x18x4xbf16, #tpu.memory_space<vmem>>, vector<16x16x4xbf16>
    %36 = vector.shape_cast %35 : vector<16x16x4xbf16> to vector<256x4xbf16>
    %c2_i32_20 = arith.constant 2 : i32
    %37 = arith.addi %4, %c2_i32_20 : i32
    %38 = arith.index_cast %37 : i32 to index
    %c2_21 = arith.constant 2 : index
    %c0_22 = arith.constant 0 : index
    %39 = vector.load %arg5[%38, %c2_21, %c0_22] : memref<18x18x4xbf16, #tpu.memory_space<vmem>>, vector<16x16x4xbf16>
    %40 = vector.shape_cast %39 : vector<16x16x4xbf16> to vector<256x4xbf16>
    %41 = tpu.concatenate %8, %12, %16, %20, %24, %28, %32, %36, %40 in 1 : vector<256x4xbf16>, vector<256x4xbf16>, vector<256x4xbf16>, vector<256x4xbf16>, vector<256x4xbf16>, vector<256x4xbf16>, vector<256x4xbf16>, vector<256x4xbf16>, vector<256x4xbf16> -> vector<256x36xbf16>
    %c0_23 = arith.constant 0 : index
    %c0_24 = arith.constant 0 : index
    %42 = vector.load %arg3[%c0_23, %c0_24] : memref<36x128xbf16, #tpu.memory_space<vmem>>, vector<36x128xbf16>
    %cst = arith.constant dense<0.000000e+00> : vector<256x128xf32>
    %43 = tpu.matmul %41, %42, %cst {dimension_numbers = #tpu.dot_dimension_numbers<[1], [0], [0], [1], [0, 0, 1, 1], [], []>} : vector<256x36xbf16>, vector<36x128xbf16>, vector<256x128xf32> -> vector<256x128xf32>
    %cst_25 = arith.constant 0.000000e+00 : f32
    %44 = vector.broadcast %cst_25 : f32 to vector<256x128xf32>
    %45 = arith.cmpf oge, %43, %44 : vector<256x128xf32>
    %cst_26 = arith.constant 1.000000e-01 : f32
    %46 = vector.broadcast %cst_26 : f32 to vector<256x128xf32>
    %47 = arith.mulf %46, %43 : vector<256x128xf32>
    %48 = arith.select %45, %43, %47 : vector<256x128xi1>, vector<256x128xf32>
    %c0_27 = arith.constant 0 : index
    %c0_28 = arith.constant 0 : index
    %c0_29 = arith.constant 0 : index
    %49 = vector.load %arg4[%c0_27, %c0_28, %c0_29] : memref<1x256x128xf32, #tpu.memory_space<vmem>>, vector<1x256x128xf32>
    %50 = vector.shape_cast %49 : vector<1x256x128xf32> to vector<256x128xf32>
    %51 = vector.shape_cast %48 : vector<256x128xf32> to vector<1x256x128xf32>
    tpu.vector_store %arg4[%c0_27, %c0_28, %c0_29], %51 {strides = array<i32>} : memref<1x256x128xf32, #tpu.memory_space<vmem>>, vector<1x256x128xf32>,
    return
  }
  func.func @transform_0(%arg0: i32, %arg1: i32) -> (i32, i32, i32, i32) {
    %c0_i32 = arith.constant 0 : i32
    %c0_i32_0 = arith.constant 0 : i32
    %c0_i32_1 = arith.constant 0 : i32
    %c0_i32_2 = arith.constant 0 : i32
    return %arg0, %c0_i32, %c0_i32_0, %c0_i32_1 : i32, i32, i32, i32
  }
  func.func @transform_1(%arg0: i32, %arg1: i32) -> (i32, i32) {
    %c0_i32 = arith.constant 0 : i32
    %c0_i32_0 = arith.constant 0 : i32
    %c0_i32_1 = arith.constant 0 : i32
    return %c0_i32, %c0_i32_0 : i32, i32
  }
  func.func @transform_2(%arg0: i32, %arg1: i32) -> (i32, i32, i32) {
    %c0_i32 = arith.constant 0 : i32
    %c0_i32_0 = arith.constant 0 : i32
    return %arg0, %arg1, %c0_i32 : i32, i32, i32
  }
}

</mosaic_0001>

<bundles_post_ra>
// kernel: tpu_custom_call.1
= control target key start
LH: loop header
LB: loop body
LE: loop exit
PB: predicated region body
PF: predicated region fallthrough
CT: control target
= control target key end

     0   :  { %7 = vsyncpa [#allocation4], 0  ;;  %s6724_s0 = inlined_call_operand.vmem [shape: bf16[2,16,16,4], index: 0, kind: input, shape index: {}]   ;;  %s6725_s1 = inlined_call_operand.vmem [shape: bf16[36,128], index: 1, kind: input, shape index: {}]   ;;  %s6726_s2 = inlined_call_operand.hbm [shape: f32[2,256,128], index: 2, kind: output, shape index: {}]  }
   0x1   :  { %9 = vsyncpa [#allocation4 + $0x1], 0  ;;  %s4650_s9 = smov 0   ;;  %s4652_s10 = smov 0  }
   0x2   :  { %s4654_s11 = smov 0   ;;  %s4656_s12 = smov 0  }
   0x3   :  { %s4658_s13 = smov 0   ;;  %s4660_s14 = smov 0  }
   0x4 LB: > { %s3994_s15 = sadd.s32 4294967295, %s4622_s14   ;;  %s3995_s16 = sadd.s32 4294967294, %s4622_s14   ;;  %s4622_s14 = sphi %s4660_s14, %s15_s14   ;;  %s4618_s13 = sphi %s4658_s13, %s6748_s13   ;;  %s4614_s12 = sphi %s4656_s12, %s6747_s12   ;;  %s4610_s11 = sphi %s4654_s11, %s6746_s11   ;;  %s4606_s10 = sphi %s4652_s10, %s6745_s10   ;;  %s4602_s9 = sphi %s4650_s9, %s6744_s9  }
   0x5   : > { %s27_s17 = sadd.s32 1, %s4618_s13  ;;  %s83_s18 = sadd.s32 1, %s4610_s11 }
   0x6   : > { %p29_p0 = scmp.ge.s32.totalorder %s27_s17, 2  ;;  %p93_p1 = scmp.ne.s32.totalorder %s4610_s11, %s4606_s10 }
   0x7   : > { %p94_p2 = scmp.eq.s32.totalorder %s3994_s15, 1  ;;  %p99_p3 = scmp.ne.s32.totalorder %s4606_s10, %s4602_s9 }
   0x8   : > { %s6750_s17 = smov (%p29_p0, %s27_s17), 0  ;;  %p100_p5 = scmp.eq.s32.totalorder %s3995_s16, 1 }
   0x9   : > { %p4690_p4 = por %p94_p2, %p93_p1  ;;  %s78_s20 = ssub.s32 %s4618_s13, %s6750_s17 }
   0xa   : > { %p3998_p6 = scmp.ge.s32.totalorder %s4622_s14, 1  ;;  %p81_p7 = scmp.eq.s32.totalorder %s78_s20, 0 }
   0xb   : > { %p4697_p8 = por %p100_p5, %p99_p3  ;;  %p129_p9 = scmp.lt.s32.totalorder %s4622_s14, 3 }
   0xc   : > { %s4703_s22 = scalar_select %p81_p7, %s4610_s11, %s83_s18  }
   0xd   : > { %p130_p10 = pnand %p3998_p6, %p129_p9 }
   0xf   : > { %133 = sbr.rel (%p130_p10) target bundleno = 775 (0x307), region = 28 }
  0x16   : > { %vm162_vm0 = vcmask 27648   ;;  %vm165_vm1 = vcmask 24576   ;;  %v4624_v0 = vmov 0   ;;  %p151_p11 = scmp.lt.s32.totalorder %s4614_s12, 1  ;;  %vm1194_vm2 = vcmask 1042432   ;;  %s4625_s28 = smov 8  }
  0x17   : > { %163 = vst.msk [vmem:[#allocation2] sm:$0xf] %vm162_vm0, %v4624_v0  ;;  %164 = vst.msk [vmem:[#allocation2 + $0x4] sm:$0xf] %vm162_vm0, %v4624_v0  ;;  %vm1195_vm3 = vcmask 1046532   ;;  %s4626_s29 = smov 4  }
  0x18   : > { %166 = vst.msk [vmem:[#allocation2 + $0x8] sm:$0x1] %vm165_vm1, %v4624_v0  ;;  %169 = vst.msk [vmem:[#allocation2 + $0x14] sm:$0x1] %vm165_vm1, %v4624_v0  ;;  %s152_s23 = scalar_select %p151_p11, %s4614_s12, 1  ;;  %vm3269_vm14 = vcmask 31744  }
  0x19   : > { %167 = vst.msk [vmem:[#allocation2 + $0xc] sm:$0xf] %vm162_vm0, %v4624_v0  ;;  %168 = vst.msk [vmem:[#allocation2 + $0x10] sm:$0xf] %vm162_vm0, %v4624_v0  ;;  %vm743_vm4 = vsmask.f32 3328 }
  0x1a   : > { %170 = vst.msk [vmem:[#allocation2 + $0x18] sm:$0xf] %vm162_vm0, %v4624_v0  ;;  %171 = vst.msk [vmem:[#allocation2 + $0x1c] sm:$0xf] %vm162_vm0, %v4624_v0  ;;  %s4346_s24 = sshll.u32 %s152_s23, 7  ;;  %s4627_s30 = smov 12  }
  0x1b   : > { %172 = vst.msk [vmem:[#allocation2 + $0x20] sm:$0x1] %vm165_vm1, %v4624_v0  ;;  %175 = vst.msk [vmem:[#allocation2 + $0x2c] sm:$0x1] %vm165_vm1, %v4624_v0  ;;  %vm744_vm5 = vsmask.f32 7440  ;;  %s4764_s27 = scalar_lea.vmem %s6724_s0, %s4346_s24 }
  0x1c   : > { %173 = vst.msk [vmem:[#allocation2 + $0x24] sm:$0xf] %vm162_vm0, %v4624_v0  ;;  %174 = vst.msk [vmem:[#allocation2 + $0x28] sm:$0xf] %vm162_vm0, %v4624_v0  ;;  %vm250_vm6 = vsmask.f32 256 }
  0x1d   : > { %176 = vst.msk [vmem:[#allocation2 + $0x30] sm:$0xf] %vm162_vm0, %v4624_v0  ;;  %177 = vst.msk [vmem:[#allocation2 + $0x34] sm:$0xf] %vm162_vm0, %v4624_v0  ;;  %v234_v2 = vld [vmem:[%s4764_s27 + $0x40] sm:$0xf] }
  0x1e   : > { %178 = vst.msk [vmem:[#allocation2 + $0x38] sm:$0x1] %vm165_vm1, %v4624_v0  ;;  %181 = vst.msk [vmem:[#allocation2 + $0x44] sm:$0x1] %vm165_vm1, %v4624_v0  ;;  %vm251_vm8 = vsmask.f32 4368 }
  0x1f   : > { %179 = vst.msk [vmem:[#allocation2 + $0x3c] sm:$0xf] %vm162_vm0, %v4624_v0  ;;  %180 = vst.msk [vmem:[#allocation2 + $0x40] sm:$0xf] %vm162_vm0, %v4624_v0  ;;  %vm575_vm9 = vsmask.f32 7938 }
  0x20   : > { %182 = vst.msk [vmem:[#allocation2 + $0x48] sm:$0xf] %vm162_vm0, %v4624_v0  ;;  %183 = vst.msk [vmem:[#allocation2 + $0x4c] sm:$0xf] %vm162_vm0, %v4624_v0  ;;  %v696_v3 = vld [vmem:[#allocation2 + $0x4] sm:$0xf] }
  0x21   : > { %184 = vst.msk [vmem:[#allocation2 + $0x50] sm:$0x1] %vm165_vm1, %v4624_v0  ;;  %187 = vst.msk [vmem:[#allocation2 + $0x5c] sm:$0x1] %vm165_vm1, %v4624_v0  ;;  %v727_v4 = vld [vmem:[#allocation2 + $0x8] sm:$0x1] }
  0x22   : > { %185 = vst.msk [vmem:[#allocation2 + $0x54] sm:$0xf] %vm162_vm0, %v4624_v0  ;;  %186 = vst.msk [vmem:[#allocation2 + $0x58] sm:$0xf] %vm162_vm0, %v4624_v0  ;;  %v1130_v5 = vld [vmem:[#allocation2] sm:$0xe] }
  0x23   : > { %188 = vst.msk [vmem:[#allocation2 + $0x60] sm:$0xf] %vm162_vm0, %v4624_v0  ;;  %189 = vst.msk [vmem:[#allocation2 + $0x64] sm:$0xf] %vm162_vm0, %v4624_v0  ;;  %v766_v6 = vshll.u32 %v727_v4, 16  ;;  %v4002_v7 = vrot.slane %v1130_v5, 9 }
  0x24   : > { %190 = vst.msk [vmem:[#allocation2 + $0x68] sm:$0x1] %vm165_vm1, %v4624_v0  ;;  %193 = vst.msk [vmem:[#allocation2 + $0x74] sm:$0x1] %vm165_vm1, %v4624_v0  ;;  %v1199_v8 = vrot.slane %v696_v3, 5  ;;  %v1202_v9 = vrot.slane %v727_v4, 5 }
  0x25   : > { %191 = vst.msk [vmem:[#allocation2 + $0x6c] sm:$0xf] %vm162_vm0, %v4624_v0  ;;  %192 = vst.msk [vmem:[#allocation2 + $0x70] sm:$0xf] %vm162_vm0, %v4624_v0  ;;  %v695_v10 = vld [vmem:[#allocation2] sm:$0xf] }
  0x26   : > { %194 = vst.msk [vmem:[#allocation2 + $0x78] sm:$0xf] %vm162_vm0, %v4624_v0  ;;  %195 = vst.msk [vmem:[#allocation2 + $0x7c] sm:$0xf] %vm162_vm0, %v4624_v0  ;;  %v747_v11 = vshrl.u32 %v695_v10, 16  ;;  %v750_v12 = vshll.u32 %v695_v10, 16 }
  0x27   : > { %196 = vst.msk [vmem:[#allocation2 + $0x80] sm:$0x1] %vm165_vm1, %v4624_v0  ;;  %199 = vst.msk [vmem:[#allocation2 + $0x8c] sm:$0x1] %vm165_vm1, %v4624_v0  ;;  %v756_v13 = vshll.u32 %v696_v3, 16  ;;  %v760_v14 = vshrl.u32 %v696_v3, 16 }
  0x28   : > { %197 = vst.msk [vmem:[#allocation2 + $0x84] sm:$0xf] %vm162_vm0, %v4624_v0  ;;  %198 = vst.msk [vmem:[#allocation2 + $0x88] sm:$0xf] %vm162_vm0, %v4624_v0  ;;  %v235_v15 = vld [vmem:[%s4764_s27 + $0x44] sm:$0xf] }
  0x29   : > { %200 = vst.msk [vmem:[#allocation2 + $0x90] sm:$0xf] %vm162_vm0, %v4624_v0  ;;  %201 = vst.msk [vmem:[#allocation2 + $0x94] sm:$0xf] %vm162_vm0, %v4624_v0  ;;  %v1201_v17 = vrot.slane %v1199_v8, 4  ;;  %v768_v18 = vrot.slane %v766_v6, 5 }
  0x2a   : > { %202 = vst.msk [vmem:[#allocation2 + $0x98] sm:$0x1] %vm165_vm1, %v4624_v0  ;;  %205 = vst.msk [vmem:[#allocation2 + $0xa4] sm:$0x1] %vm165_vm1, %v4624_v0  ;;  %v390_v19 = vshrl.u32 %v234_v2, 16  ;;  %v749_v20 = vrot.slane %v747_v11, 4 }
  0x2b   : > { %203 = vst.msk [vmem:[#allocation2 + $0x9c] sm:$0xf] %vm162_vm0, %v4624_v0  ;;  %204 = vst.msk [vmem:[#allocation2 + $0xa0] sm:$0xf] %vm162_vm0, %v4624_v0  ;;  %v752_v21 = vrot.slane %v750_v12, 5  ;;  %v758_v22 = vrot.slane %v756_v13, 5 }
  0x2c   : > { %206 = vst.msk [vmem:[#allocation2 + $0xa8] sm:$0xf] %vm162_vm0, %v4624_v0  ;;  %207 = vst.msk [vmem:[#allocation2 + $0xac] sm:$0xf] %vm162_vm0, %v4624_v0  ;;  %v762_v23 = vrot.slane %v760_v14, 4  ;;  %v392_v26 = vrot.slane %v390_v19, 7 }
  0x2d   : > { %208 = vst.msk [vmem:[#allocation2 + $0xb0] sm:$0x1] %vm165_vm1, %v4624_v0  ;;  %211 = vst.msk [vmem:[#allocation2 + $0xbc] sm:$0x1] %vm165_vm1, %v4624_v0  ;;  %v218_v24 = vld [vmem:[%s4764_s27] sm:$0xf]  ;;  %v753_v31 = vor.u32 %v752_v21, %v749_v20 }
  0x2e   : > { %209 = vst.msk [vmem:[#allocation2 + $0xb4] sm:$0xf] %vm162_vm0, %v4624_v0  ;;  %210 = vst.msk [vmem:[#allocation2 + $0xb8] sm:$0xf] %vm162_vm0, %v4624_v0  ;;  %v393_v27 = vshll.u32 %v234_v2, 16  ;;  %v398_v28 = vshrl.u32 %v235_v15, 16  ;;  %v763_v32 = vor.u32 %v762_v23, %v758_v22 }
  0x2f   : > { %212 = vst.msk [vmem:[#allocation2 + $0xc0] sm:$0xf] %vm162_vm0, %v4624_v0  ;;  %213 = vst.msk [vmem:[#allocation2 + $0xc4] sm:$0xf] %vm162_vm0, %v4624_v0  ;;  %v219_v29 = vld [vmem:[%s4764_s27 + $0x4] sm:$0xf] }
  0x30   : > { %214 = vst.msk [vmem:[#allocation2 + $0xc8] sm:$0x1] %vm165_vm1, %v4624_v0  ;;  %217 = vst.msk [vmem:[#allocation2 + $0xd4] sm:$0x1] %vm165_vm1, %v4624_v0  ;;  %v401_v33 = vshll.u32 %v235_v15, 16  ;;  %v395_v37 = vor.u32 %v393_v27, %v392_v26  ;;  %v396_v38 = vrot.slane %v392_v26, 4 }
  0x31   : > { %215 = vst.msk [vmem:[#allocation2 + $0xcc] sm:$0xf] %vm162_vm0, %v4624_v0  ;;  %216 = vst.msk [vmem:[#allocation2 + $0xd0] sm:$0xf] %vm162_vm0, %v4624_v0  ;;  %v635_v35 = vld [vmem:[#allocation2 + $0x6c] sm:$0xf] }
  0x32   : > { %vm4766_vm7 = vmor %vm1194_vm2, %vm1195_vm3  ;;  %v4790_v39 = vrot.slane %v398_v28, 7  ;;  %v254_v40 = vshrl.u32 %v218_v24, 16  ;;  %v754_v41 = vrot.slane %v753_v31, 4  ;;  %v764_v42 = vrot.slane %v763_v32, 4  ;;  %v236_v50 = vld [vmem:[%s4764_s27 + $0x48] sm:$0xf] }
  0x33   : > { %v1200_v16 = vsel %vm4766_vm7, %v4002_v7, %v1199_v8  ;;  %v1203_v25 = vsel %vm4766_vm7, %v1201_v17, %v1202_v9  ;;  %vm4780_vm10 = vmand %vm162_vm0, %vm575_vm9  ;;  %v257_v44 = vshll.u32 %v218_v24, 16  ;;  %v262_v45 = vshrl.u32 %v219_v29, 16  ;;  %v237_v51 = vld [vmem:[%s4764_s27 + $0x4c] sm:$0xf]  ;;  %v220_v57 = vld [vmem:[%s4764_s27 + $0x8] sm:$0xf] }
  0x34   : > { %v4210_v30 = vcombine.low %v1200_v16, %v1203_v25  ;;  %vm4786_vm11 = vmor %vm743_vm4, %vm744_vm5  ;;  %v403_v46 = vor.u32 %v401_v33, %v4790_v39  ;;  %v405_v47 = vrot.slane %v4790_v39, 4  ;;  %v636_v48 = vsel %vm4780_vm10, %v395_v37, %v635_v35  ;;  %v577_v56 = vld [vmem:[#allocation2 + $0xc] sm:$0xf]  ;;  %v232_v4 = vld [vmem:[%s4764_s27 + $0x38] sm:$0xf]  ;;  %s4628_s3 = smov 20  }
  0x35   : > { %vm4795_vm12 = vmor %vm250_vm6, %vm251_vm8  ;;  %v256_v49 = vrot.slane %v254_v40, 7  ;;  %v759_v52 = vsel %vm4786_vm11, %v754_v41, %v758_v22  ;;  %v769_v53 = vsel %vm4786_vm11, %v764_v42, %v768_v18  ;;  %637 = vst [vmem:[#allocation2 + $0x6c] sm:$0xf] %v636_v48  ;;  %v4809_v54 = vrot.slane %v262_v45, 7  ;;  %v221_v62 = vld [vmem:[%s4764_s27 + $0xc] sm:$0xf] }
  0x36   : > { %2725 = vrot.lane.b32.xlu0 %v4210_v30, %s4625_s28  ;;  %v265_v55 = vshll.u32 %v219_v29, 16  ;;  %v4194_v58 = vcombine.low %v759_v52, %v769_v53  ;;  %v404_v59 = vsel %vm4795_vm12, %v396_v38, %v403_v46  ;;  %v407_v0 = vshrl.u32 %v236_v50, 16  ;;  %v233_v13 = vld [vmem:[%s4764_s27 + $0x3c] sm:$0xf]  ;;  %v642_v14 = vld [vmem:[#allocation2 + $0x78] sm:$0xf]  ;;  %vm4855_vm13 = vmand %vm165_vm1, %vm250_vm6 }
  0x37   : > { %v259_v60 = vor.u32 %v257_v44, %v256_v49  ;;  %v260_v61 = vrot.slane %v256_v49, 4  ;;  %638 = vst.msk [vmem:[#allocation2 + $0x70] sm:$0xf] %vm162_vm0, %v404_v59  ;;  %v410_v2 = vshll.u32 %v236_v50, 16  ;;  %v415_v3 = vshrl.u32 %v237_v51, 16  ;;  %s4629_s4 = smov 16  }
  0x38   : > { %v267_v63 = vor.u32 %v265_v55, %v4809_v54  ;;  %v418_v6 = vshll.u32 %v237_v51, 16  ;;  %v271_v7 = vshrl.u32 %v220_v57, 16  ;;  %v274_v8 = vshll.u32 %v220_v57, 16  ;;  %v586_v23 = vld [vmem:[#allocation2 + $0x18] sm:$0xf]  ;;  %s4630_s5 = smov 24  }
  0x39   : > { %v578_v5 = vsel %vm4780_vm10, %v259_v60, %v577_v56  ;;  %v409_v10 = vrot.slane %v407_v0, 7  ;;  %v4823_v11 = vrot.slane %v415_v3, 7  ;;  %v279_v12 = vshrl.u32 %v221_v62, 16  ;;  %v628_v41 = vld [vmem:[#allocation2 + $0x60] sm:$0xf]  ;;  %s4631_s6 = smov 28  }
  0x3a   : > { %2645 = vrot.lane.b32.xlu0 %v4194_v58, %s4626_s29  ;;  %v268_v9 = vsel %vm4795_vm12, %v260_v61, %v267_v63  ;;  %579 = vst [vmem:[#allocation2 + $0xc] sm:$0xf] %v578_v5  ;;  %v273_v15 = vrot.slane %v271_v7, 7  ;;  %v282_v16 = vshll.u32 %v221_v62, 16  ;;  %v373_v17 = vshrl.u32 %v232_v4, 16  ;;  %s4632_s7 = smov 32  }
  0x3b   : > { %580 = vst.msk [vmem:[#allocation2 + $0x10] sm:$0xf] %vm162_vm0, %v268_v9  ;;  %v376_v18 = vshll.u32 %v232_v4, 16  ;;  %v412_v19 = vor.u32 %v410_v2, %v409_v10  ;;  %v413_v20 = vrot.slane %v409_v10, 4  ;;  %v420_v21 = vor.u32 %v418_v6, %v4823_v11  ;;  %v632_v53 = vld [vmem:[#allocation2 + $0x68] sm:$0x1] }
  0x3c   : > { %v4828_v22 = vrot.slane %v279_v12, 7  ;;  %v4034_v24 = vld [vmem:[#allocation2 + $0x6c] sm:$0xf]  ;;  %v276_v25 = vor.u32 %v274_v8, %v273_v15  ;;  %v277_v26 = vrot.slane %v273_v15, 4  ;;  %v375_v27 = vrot.slane %v373_v17, 7  ;;  %s148_s24 = sand.u32 1, %s4606_s10  }
  0x3d   : > { %v381_v28 = vshrl.u32 %v233_v13, 16  ;;  %v1554_v29 = vshrl.u32 %v4034_v24, 16  ;;  %v1557_v30 = vshll.u32 %v4034_v24, 16  ;;  %v421_v31 = vsel %vm4795_vm12, %v413_v20, %v420_v21  ;;  %v583_v55 = vld [vmem:[#allocation2 + $0x14] sm:$0x1]  ;;  %s3999_s25 = sshll.u32 %s148_s24, 8 }
  0x3e   : > { %v643_v32 = vsel %vm4780_vm10, %v412_v19, %v642_v14  ;;  %v4834_v33 = vld [vmem:[#allocation2 + $0x70] sm:$0xf]  ;;  %645 = vst.msk [vmem:[#allocation2 + $0x7c] sm:$0xf] %vm162_vm0, %v421_v31  ;;  %v284_v35 = vor.u32 %v282_v16, %v4828_v22  ;;  %v587_v37 = vsel %vm4780_vm10, %v276_v25, %v586_v23  ;;  %v378_v38 = vor.u32 %v376_v18, %v375_v27  ;;  %v639_v56 = vld [vmem:[#allocation2 + $0x74] sm:$0x1] }
  0x3f   : > { %644 = vst [vmem:[#allocation2 + $0x78] sm:$0xf] %v643_v32  ;;  %v379_v40 = vrot.slane %v375_v27, 4  ;;  %v1563_v42 = vshll.u32 %v4834_v33, 16  ;;  %v1567_v44 = vshrl.u32 %v4834_v33, 16  ;;  %v4234_v45 = vcombine.low %v4034_v24, %v4834_v33  ;;  %s6589_s26 = scalar_lea.vmem [#allocation3], %s3999_s25 }
  0x40   : > { %v1556_v46 = vrot.slane %v1554_v29, 4  ;;  %588 = vst [vmem:[#allocation2 + $0x18] sm:$0xf] %v587_v37  ;;  %v1559_v48 = vrot.slane %v1557_v30, 5  ;;  %v285_v50 = vsel %vm4795_vm12, %v277_v26, %v284_v35  ;;  %v383_v51 = vrot.slane %v381_v28, 7 }
  0x41   : > { %v4018_v49 = vld [vmem:[#allocation2 + $0xc] sm:$0xf]  ;;  %v384_v52 = vshll.u32 %v233_v13, 16  ;;  %v4845_v58 = vrot.slane %v1567_v44, 4  ;;  %2837 = vrot.lane.b32.xlu1 %v4234_v45, %s4627_s30  ;;  %589 = vst.msk [vmem:[#allocation2 + $0x1c] sm:$0xf] %vm162_vm0, %v285_v50  ;;  %v629_v62 = vsel %vm4780_vm10, %v378_v38, %v628_v41  ;;  %v640_v21 = vsel %vm4855_vm13, %v405_v47, %v639_v56 }
  0x42   : > { %v1139_v57 = vld [vmem:[#allocation2 + $0x6c] sm:$0xe]  ;;  %v4848_v59 = vld [vmem:[#allocation2 + $0x10] sm:$0xf]  ;;  %v1362_v60 = vshrl.u32 %v4018_v49, 16  ;;  %v1365_v61 = vshll.u32 %v4018_v49, 16  ;;  %v1560_v0 = vor.u32 %v1559_v48, %v1556_v46 }
  0x43   : > { %v6738_v63 = vmov 0  ;;  %v1375_v2 = vshrl.u32 %v4848_v59, 16  ;;  %v4226_v3 = vcombine.low %v4018_v49, %v4848_v59  ;;  %v386_v4 = vor.u32 %v384_v52, %v383_v51  ;;  %630 = vst [vmem:[#allocation2 + $0x60] sm:$0xf] %v629_v62  ;;  %v4861_v5 = vld [vmem:[#allocation2 + $0x10] sm:$0xf] }
  0x44   : > { %v6739_v63 = vsel %vm4855_vm13, 4294967295, %v6738_v63  ;;  %v1131_v6 = vld [vmem:[#allocation2 + $0xc] sm:$0xe]  ;;  %v4863_v7 = vrot.slane %v1362_v60, 4  ;;  %v4865_v8 = vrot.slane %v1365_v61, 5  ;;  %v388_v9 = vrot.slane %v383_v51, 4 }
  0x45   : > { %6740 = vst [vmem:[#allocation6_spill] sm:$0xff] %v6739_v63  ;;  %v269_v10 = vrot.slane %v4809_v54, 4  ;;  %v4868_v12 = vld [vmem:[#allocation2 + $0x70] sm:$0xf]  ;;  %v4870_v13 = vrot.slane %v1560_v0, 4  ;;  %2821 = vrot.lane.b32.xlu0 %v4226_v3, %s4627_s30  ;;  %v387_v14 = vsel %vm4795_vm12, %v379_v40, %v386_v4  ;;  %v4003_v15 = vrot.slane %v1131_v6, 9 }
  0x46   : > { %v1206_v16 = vrot.slane %v4861_v5, 5  ;;  %v4066_v17 = vld [vmem:[#allocation2 + $0xc] sm:$0xe]  ;;  %v4036_v18 = vld [vmem:[#allocation2 + $0x78] sm:$0xf]  ;;  %v633_v54 = vsel %vm4855_vm13, %v388_v9, %v632_v53  ;;  %v4011_v23 = vrot.slane %v1139_v57, 9  ;;  %v1368_v4 = vor.u32 %v4865_v8, %v4863_v7 }
  0x47   : > { %v4876_v19 = vld [vmem:[#allocation2 + $0x7c] sm:$0xf]  ;;  %631 = vst.msk [vmem:[#allocation2 + $0x64] sm:$0xf] %vm162_vm0, %v387_v14  ;;  %v584_v20 = vsel %vm4855_vm13, %v269_v10, %v583_v55  ;;  %v1578_v24 = vshrl.u32 %v4036_v18, 16  ;;  %v1581_v25 = vshll.u32 %v4036_v18, 16 }
  0x48   : > { %v1591_v26 = vshrl.u32 %v4876_v19, 16  ;;  %v4235_v27 = vcombine.low %v4036_v18, %v4876_v19  ;;  %v4020_v28 = vld [vmem:[#allocation2 + $0x18] sm:$0xf]  ;;  %634 = vst [vmem:[#allocation2 + $0x68] sm:$0x1] %v633_v54  ;;  %v1207_v31 = vsel %vm4766_vm7, %v4003_v15, %v1206_v16  ;;  %v1208_v39 = vrot.slane %v1206_v16, 4 }
  0x49   : > { %585 = vst [vmem:[#allocation2 + $0x14] sm:$0x1] %v584_v20  ;;  %641 = vst [vmem:[#allocation2 + $0x74] sm:$0x1] %v640_v21  ;;  %v1386_v29 = vshrl.u32 %v4020_v28, 16  ;;  %v1389_v30 = vshll.u32 %v4020_v28, 16 }
  0x4a   : > { %v4074_v32 = vld [vmem:[#allocation2 + $0x6c] sm:$0xe]  ;;  %v4891_v35 = vrot.slane %v1578_v24, 4  ;;  %v4893_v47 = vrot.slane %v1581_v25, 5  ;;  %2839 = vrot.lane.b32.xlu1 %v4235_v27, %s4627_s30  ;;  %v4896_v37 = vld [vmem:[#allocation2 + $0x1c] sm:$0xf] }
  0x4b   : > { %v1262_v38 = vrot.slane %v4868_v12, 5  ;;  %v4082_v40 = vrot.slane %v4066_v17, 9  ;;  %v4899_v41 = vrot.slane %v1386_v29, 4  ;;  %v4901_v44 = vrot.slane %v1389_v30, 5  ;;  %v1138_v48 = vld [vmem:[#allocation2 + $0x60] sm:$0xe] }
  0x4c   : > { %v1399_v45 = vshrl.u32 %v4896_v37, 16  ;;  %v4227_v46 = vcombine.low %v4020_v28, %v4896_v37  ;;  %v4010_v49 = vrot.slane %v1138_v48, 9  ;;  %v1811_v52 = vrot.slane %v4848_v59, 5  ;;  %v711_v53 = vld [vmem:[#allocation2 + $0x60] sm:$0xf] }
  0x4d   : > { %v4907_v50 = vsel %vm4766_vm7, %v4011_v23, %v1262_v38  ;;  %v1264_v51 = vrot.slane %v1262_v38, 4  ;;  %v4090_v55 = vrot.slane %v4074_v32, 9  ;;  %v1867_v56 = vrot.slane %v4834_v33, 5  ;;  %v4912_v61 = vld [vmem:[#allocation2 + $0x18] sm:$0xf] }
  0x4e   : > { %2823 = vrot.lane.b32.xlu0 %v4227_v46, %s4627_s30  ;;  %v939_v57 = vshrl.u32 %v711_v53, 16  ;;  %v942_v60 = vshll.u32 %v711_v53, 16  ;;  %v712_v62 = vld [vmem:[#allocation2 + $0x64] sm:$0xf]  ;;  %v1812_v0 = vsel %vm4766_vm7, %v4082_v40, %v1811_v52  ;;  %v1813_v3 = vrot.slane %v1811_v52, 4 }
  0x4f   : > { %v1371_v6 = vshll.u32 %v4848_v59, 16  ;;  %v4919_v9 = vld [vmem:[#allocation2 + $0x1c] sm:$0xf]  ;;  %v735_v10 = vld [vmem:[#allocation2 + $0x68] sm:$0x1]  ;;  %v1255_v14 = vrot.slane %v712_v62, 5  ;;  %v4925_v16 = vsel %vm4766_vm7, %v4090_v55, %v1867_v56  ;;  %v1392_v18 = vor.u32 %v4901_v44, %v4899_v41 }
  0x50   : > { %v4921_v15 = vld [vmem:[#allocation2 + $0x14] sm:$0x1]  ;;  %v1869_v17 = vrot.slane %v1867_v56, 4  ;;  %v1258_v54 = vrot.slane %v735_v10, 5  ;;  %v4274_v21 = vcombine.low %v4912_v61, %v4919_v9  ;;  %v1584_v23 = vor.u32 %v4893_v47, %v4891_v35 }
  0x51   : > { %v1209_v20 = vrot.slane %v4921_v15, 5  ;;  %v4930_v7 = vld [vmem:[#allocation2 + $0x74] sm:$0x1]  ;;  %v1256_v24 = vsel %vm4766_vm7, %v4010_v49, %v1255_v14  ;;  %v1257_v25 = vrot.slane %v1255_v14, 4  ;;  %v941_v38 = vrot.slane %v939_v57, 4 }
  0x52   : > { %v4050_v8 = vld [vmem:[#allocation2 + $0x14] sm:$0x1]  ;;  %v1265_v27 = vrot.slane %v4930_v7, 5  ;;  %v944_v40 = vrot.slane %v942_v60, 5  ;;  %v948_v57 = vshll.u32 %v712_v62, 16  ;;  %v1369_v14 = vrot.slane %v1368_v4, 4 }
  0x53   : > { %v1814_v28 = vrot.slane %v4050_v8, 5  ;;  %v4939_v29 = vld [vmem:[#allocation2 + $0x74] sm:$0x1]  ;;  %v1210_v30 = vsel %vm4766_vm7, %v1208_v39, %v1209_v20  ;;  %v1259_v41 = vsel %vm4766_vm7, %v1257_v25, %v1258_v54  ;;  %v697_v60 = vld [vmem:[#allocation2 + $0xc] sm:$0xf]  ;;  %vm3318_vm15 = vcmask 64512  }
  0x54   : > { %v1870_v32 = vrot.slane %v4939_v29, 5  ;;  %v4211_v44 = vcombine.low %v1207_v31, %v1210_v30  ;;  %v1266_v46 = vsel %vm4766_vm7, %v1264_v51, %v1265_v27  ;;  %v4218_v49 = vcombine.low %v1256_v24, %v1259_v41  ;;  %v590_v41 = vld [vmem:[#allocation2 + $0x20] sm:$0x1] }
  0x55   : > { %v1815_v48 = vsel %vm4766_vm7, %v1813_v3, %v1814_v28  ;;  %v4219_v52 = vcombine.low %v4907_v50, %v1266_v46  ;;  %v945_v56 = vor.u32 %v944_v40, %v941_v38  ;;  %v952_v31 = vshrl.u32 %v712_v62, 16 }
  0x56   : > { %v4258_v53 = vcombine.low %v1812_v0, %v1815_v48  ;;  %v1871_v39 = vsel %vm4766_vm7, %v1869_v17, %v1870_v32  ;;  %2727 = vrot.lane.b32.xlu0 %v4211_v44, %s4625_s28  ;;  %2741 = vrot.lane.b32.xlu1 %v4218_v49, %s4625_s28  ;;  %v958_v51 = vshll.u32 %v735_v10, 16  ;;  %v1373_v3 = vrot.slane %v1371_v6, 5 }
  0x57   : > { %v4266_v55 = vcombine.low %v4925_v16, %v1871_v39  ;;  %v1377_v50 = vrot.slane %v1375_v2, 4  ;;  %v946_v0 = vrot.slane %v945_v56, 4  ;;  %v950_v54 = vrot.slane %v948_v57, 5 }
  0x58   : > { %v954_v20 = vrot.slane %v952_v31, 4  ;;  %v1381_v17 = vshll.u32 %v4050_v8, 16  ;;  %v960_v24 = vrot.slane %v958_v51, 5  ;;  %v1374_v16 = vsel %vm4786_vm11, %v1369_v14, %v1373_v3 }
  0x59   : > { %v1378_v25 = vor.u32 %v1377_v50, %v1373_v3  ;;  %v771_v27 = vshrl.u32 %v697_v60, 16  ;;  %v951_v62 = vsel %vm4786_vm11, %v946_v0, %v950_v54  ;;  %v774_v59 = vshll.u32 %v697_v60, 16 }
  0x5a   : > { %2981 = vrot.lane.b32.xlu0 %v4258_v53, %s4628_s3  ;;  %v955_v4 = vor.u32 %v954_v20, %v950_v54  ;;  %v1383_v6 = vrot.slane %v1381_v17, 5  ;;  %2743 = vrot.lane.b32.xlu1 %v4219_v52, %s4625_s28  ;;  %v780_v8 = vshll.u32 %v4861_v5, 16  ;;  %v784_v28 = vshrl.u32 %v4861_v5, 16  ;;  %v713_v52 = vld [vmem:[#allocation2 + $0x6c] sm:$0xf] }
  0x5b   : > { %v1379_v2 = vrot.slane %v1378_v25, 4  ;;  %v773_v10 = vrot.slane %v771_v27, 4  ;;  %v776_v32 = vrot.slane %v774_v59, 5  ;;  %v790_v38 = vshll.u32 %v4921_v15, 16 }
  0x5c   : > { %v956_v30 = vrot.slane %v955_v4, 4  ;;  %v286_v40 = vrot.slane %v4828_v22, 4  ;;  %v782_v46 = vrot.slane %v780_v8, 5  ;;  %v786_v48 = vrot.slane %v784_v28, 4 }
  0x5d   : > { %v1384_v44 = vsel %vm4786_vm11, %v1379_v2, %v1383_v6  ;;  %v4970_v49 = vrot.slane %v1392_v18, 4  ;;  %v777_v5 = vor.u32 %v776_v32, %v773_v10  ;;  %v792_v56 = vrot.slane %v790_v38, 5 }
  0x5e   : > { %v961_v53 = vsel %vm4786_vm11, %v956_v30, %v960_v24  ;;  %v4242_v39 = vcombine.low %v1374_v16, %v1384_v44  ;;  %2997 = vrot.lane.b32.xlu1 %v4266_v55, %s4628_s3  ;;  %v787_v57 = vor.u32 %v786_v48, %v782_v46  ;;  %v591_v22 = vsel %vm4855_vm13, %v286_v40, %v590_v41  ;;  %v4067_v16 = vld [vmem:[#allocation2 + $0x18] sm:$0xe] }
  0x5f   : > { %v4202_v15 = vcombine.low %v951_v62, %v961_v53  ;;  %v1395_v31 = vshll.u32 %v4896_v37, 16  ;;  %v778_v60 = vrot.slane %v777_v5, 4  ;;  %592 = vst [vmem:[#allocation2 + $0x20] sm:$0x1] %v591_v22  ;;  %v1401_v18 = vrot.slane %v1399_v45, 4 }
  0x60   : > { %v963_v51 = vshrl.u32 %v713_v52, 16  ;;  %v966_v14 = vshll.u32 %v713_v52, 16  ;;  %v788_v3 = vrot.slane %v787_v57, 4  ;;  %v972_v55 = vshll.u32 %v4868_v12, 16 }
  0x61   : > { %2661 = vrot.lane.b32.xlu0 %v4202_v15, %s4626_s29  ;;  %v1397_v50 = vrot.slane %v1395_v31, 5  ;;  %v976_v0 = vshrl.u32 %v4868_v12, 16  ;;  %v783_v54 = vsel %vm4786_vm11, %v778_v60, %v782_v46  ;;  %v982_v24 = vshll.u32 %v4930_v7, 16  ;;  %v222_v15 = vld [vmem:[%s4764_s27 + $0x10] sm:$0xf] }
  0x62   : > { %v965_v20 = vrot.slane %v963_v51, 4  ;;  %v968_v17 = vrot.slane %v966_v14, 5  ;;  %v793_v45 = vsel %vm4786_vm11, %v788_v3, %v792_v56  ;;  %v974_v62 = vrot.slane %v972_v55, 5  ;;  %v223_v51 = vld [vmem:[%s4764_s27 + $0x14] sm:$0xf] }
  0x63   : > { %v1398_v25 = vsel %vm4786_vm11, %v4970_v49, %v1397_v50  ;;  %v1402_v27 = vor.u32 %v1401_v18, %v1397_v50  ;;  %v4195_v4 = vcombine.low %v783_v54, %v793_v45  ;;  %v978_v12 = vrot.slane %v976_v0, 4  ;;  %v646_v18 = vld [vmem:[#allocation2 + $0x80] sm:$0x1]  ;;  %v4075_v0 = vld [vmem:[#allocation2 + $0x78] sm:$0xe] }
  0x64   : > { %v969_v6 = vor.u32 %v968_v17, %v965_v20  ;;  %v984_v59 = vrot.slane %v982_v24, 5  ;;  %v4083_v10 = vrot.slane %v4067_v16, 9  ;;  %v1818_v7 = vrot.slane %v4896_v37, 5 }
  0x65   : > { %2901 = vrot.lane.b32.xlu0 %v4242_v39, %s4629_s4  ;;  %v1403_v2 = vrot.slane %v1402_v27, 4  ;;  %v1565_v8 = vrot.slane %v1563_v42, 5  ;;  %2647 = vrot.lane.b32.xlu1 %v4195_v4, %s4626_s29  ;;  %v979_v30 = vor.u32 %v978_v12, %v974_v62  ;;  %v1573_v32 = vshll.u32 %v4939_v29, 16 }
  0x66   : > { %v970_v28 = vrot.slane %v969_v6, 4  ;;  %v1974_v38 = vshrl.u32 %v4912_v61, 16  ;;  %v4051_v40 = vld [vmem:[#allocation2 + $0x20] sm:$0x1]  ;;  %v1819_v41 = vsel %vm4766_vm7, %v4083_v10, %v1818_v7  ;;  %v1820_v44 = vrot.slane %v1818_v7, 4 }
  0x67   : > { %v1566_v37 = vsel %vm4786_vm11, %v4870_v13, %v1565_v8  ;;  %v1570_v33 = vor.u32 %v4845_v58, %v1565_v8  ;;  %v1405_v42 = vshll.u32 %v4051_v40, 16  ;;  %v980_v48 = vrot.slane %v979_v30, 4  ;;  %v5034_v6 = vld [vmem:[#allocation2 + $0x20] sm:$0x1] }
  0x68   : > { %v975_v46 = vsel %vm4786_vm11, %v970_v28, %v974_v62  ;;  %v1821_v29 = vrot.slane %v4051_v40, 5  ;;  %v1575_v52 = vrot.slane %v1573_v32, 5  ;;  %v1976_v53 = vrot.slane %v1974_v38, 4  ;;  %v5045_v28 = vld [vmem:[#allocation2 + $0x7c] sm:$0xf] }
  0x69   : > { %v1571_v49 = vrot.slane %v1570_v33, 4  ;;  %v1977_v39 = vshll.u32 %v4912_v61, 16  ;;  %v1407_v5 = vrot.slane %v1405_v42, 5  ;;  %v985_v56 = vsel %vm4786_vm11, %v980_v48, %v984_v59  ;;  %v238_v42 = vld [vmem:[%s4764_s27 + $0x50] sm:$0xf] }
  0x6a   : > { %v1822_v13 = vsel %vm4766_vm7, %v1820_v44, %v1821_v29  ;;  %v1987_v58 = vshrl.u32 %v4919_v9, 16  ;;  %v4203_v57 = vcombine.low %v975_v46, %v985_v56  ;;  %v422_v50 = vrot.slane %v4823_v11, 4  ;;  %v649_v61 = vld [vmem:[#allocation2 + $0x84] sm:$0xf] }
  0x6b   : > { %v4259_v22 = vcombine.low %v1819_v41, %v1822_v13  ;;  %v1576_v31 = vsel %vm4786_vm11, %v1571_v49, %v1575_v52  ;;  %v1979_v60 = vrot.slane %v1977_v39, 5  ;;  %v1408_v14 = vsel %vm4786_vm11, %v1403_v2, %v1407_v5  ;;  %v597_v52 = vld [vmem:[#allocation2 + $0x2c] sm:$0x1]  ;;  %v239_v13 = vld [vmem:[%s4764_s27 + $0x54] sm:$0xf] }
  0x6c   : > { %v4250_v3 = vcombine.low %v1566_v37, %v1576_v31  ;;  %v5022_v55 = vrot.slane %v1584_v23, 4  ;;  %v4243_v54 = vcombine.low %v1398_v25, %v1408_v14  ;;  %2663 = vrot.lane.b32.xlu1 %v4203_v57, %s4626_s29  ;;  %v1587_v20 = vshll.u32 %v4876_v19, 16  ;;  %v593_v23 = vld [vmem:[#allocation2 + $0x24] sm:$0xf] }
  0x6d   : > { %v1593_v17 = vrot.slane %v1591_v26, 4  ;;  %v288_v24 = vshrl.u32 %v222_v15, 16  ;;  %v647_v16 = vsel %vm4855_vm13, %v422_v50, %v646_v18  ;;  %v291_v45 = vshll.u32 %v222_v15, 16 }
  0x6e   : > { %v296_v11 = vshrl.u32 %v223_v51, 16  ;;  %v299_v27 = vshll.u32 %v223_v51, 16  ;;  %2903 = vrot.lane.b32.xlu0 %v4243_v54, %s4629_s4  ;;  %648 = vst [vmem:[#allocation2 + $0x80] sm:$0x1] %v647_v16  ;;  %v5031_v35 = vrot.slane %v1587_v20, 5  ;;  %v4091_v25 = vrot.slane %v4075_v0, 9 }
  0x6f   : > { %v290_v47 = vrot.slane %v288_v24, 7  ;;  %v1874_v62 = vrot.slane %v4876_v19, 5  ;;  %v1980_v26 = vor.u32 %v1979_v60, %v1976_v53  ;;  %v1983_v12 = vshll.u32 %v4919_v9, 16  ;;  %v5043_v19 = vld [vmem:[#allocation2 + $0x78] sm:$0xf] }
  0x70   : > { %v298_v4 = vrot.slane %v296_v11, 7  ;;  %v1989_v59 = vrot.slane %v1987_v58, 4  ;;  %2917 = vrot.lane.b32.xlu1 %v4250_v3, %s4629_s4  ;;  %v1590_v2 = vsel %vm4786_vm11, %v5022_v55, %v5031_v35  ;;  %v1594_v10 = vor.u32 %v1593_v17, %v5031_v35  ;;  %v4146_v58 = vld [vmem:[#allocation2 + $0x18] sm:$0xe] }
  0x71   : > { %v293_v7 = vor.u32 %v291_v45, %v290_v47  ;;  %v294_v8 = vrot.slane %v290_v47, 4  ;;  %v5049_v32 = vsel %vm4766_vm7, %v4091_v25, %v1874_v62  ;;  %v1876_v38 = vrot.slane %v1874_v62, 4 }
  0x72   : > { %v301_v30 = vor.u32 %v299_v27, %v298_v4  ;;  %v1981_v40 = vrot.slane %v1980_v26, 4  ;;  %2983 = vrot.lane.b32.xlu0 %v4259_v22, %s4628_s3  ;;  %v1595_v41 = vrot.slane %v1594_v10, 4  ;;  %v1985_v37 = vrot.slane %v1983_v12, 5 }
  0x73   : > { %v594_v44 = vsel %vm4780_vm10, %v293_v7, %v593_v23  ;;  %v1993_v33 = vshll.u32 %v5034_v6, 16  ;;  %v2166_v48 = vshrl.u32 %v5043_v19, 16  ;;  %v2169_v29 = vshll.u32 %v5043_v19, 16 }
  0x74   : > { %v302_v46 = vsel %vm4795_vm12, %v294_v8, %v301_v30  ;;  %595 = vst [vmem:[#allocation2 + $0x24] sm:$0xf] %v594_v44  ;;  %v2179_v49 = vshrl.u32 %v5045_v28, 16  ;;  %v1986_v53 = vsel %vm4786_vm11, %v1981_v40, %v1985_v37  ;;  %v1990_v39 = vor.u32 %v1989_v59, %v1985_v37 }
  0x75   : > { %596 = vst.msk [vmem:[#allocation2 + $0x28] sm:$0xf] %vm162_vm0, %v302_v46  ;;  %v1995_v5 = vrot.slane %v1993_v33, 5  ;;  %v4282_v56 = vcombine.low %v5043_v19, %v5045_v28  ;;  %v4059_v15 = vld [vmem:[#allocation2 + $0x80] sm:$0x1]  ;;  %v2168_v57 = vrot.slane %v2166_v48, 4 }
  0x76   : > { %v2171_v22 = vrot.slane %v2169_v29, 5  ;;  %v303_v31 = vrot.slane %v298_v4, 4  ;;  %v424_v60 = vshrl.u32 %v238_v42, 16  ;;  %3077 = vrot.lane.b32.xlu0 %v4274_v21, %s4630_s5  ;;  %v1597_v18 = vshll.u32 %v4059_v15, 16  ;;  %v5100_v37 = vld [vmem:[#allocation2 + $0x80] sm:$0x1] }
  0x77   : > { %v1877_v51 = vrot.slane %v4059_v15, 5  ;;  %v1991_v14 = vrot.slane %v1990_v39, 4  ;;  %v427_v3 = vshll.u32 %v238_v42, 16  ;;  %v432_v0 = vshrl.u32 %v239_v13, 16  ;;  %v699_v42 = vld [vmem:[#allocation2 + $0x18] sm:$0xf] }
  0x78   : > { %v598_v50 = vsel %vm4855_vm13, %v303_v31, %v597_v52  ;;  %v426_v55 = vrot.slane %v424_v60, 7  ;;  %v435_v54 = vshll.u32 %v239_v13, 16  ;;  %v1599_v20 = vrot.slane %v1597_v18, 5  ;;  %v5110_v39 = vld [vmem:[#allocation2 + $0x1c] sm:$0xf] }
  0x79   : > { %v1878_v17 = vsel %vm4766_vm7, %v1876_v38, %v1877_v51  ;;  %v1996_v24 = vsel %vm4786_vm11, %v1991_v14, %v1995_v5  ;;  %599 = vst [vmem:[#allocation2 + $0x2c] sm:$0x1] %v598_v50  ;;  %v4162_v21 = vrot.slane %v4146_v58, 9  ;;  %v5080_v23 = vrot.slane %v432_v0, 7 }
  0x7a   : > { %v4267_v16 = vcombine.low %v5049_v32, %v1878_v17  ;;  %v4290_v45 = vcombine.low %v1986_v53, %v1996_v24  ;;  %v429_v11 = vor.u32 %v427_v3, %v426_v55  ;;  %v430_v27 = vrot.slane %v426_v55, 4 }
  0x7b   : > { %v1600_v35 = vsel %vm4786_vm11, %v1595_v41, %v1599_v20  ;;  %v4100_v47 = vld [vmem:[#allocation2 + $0x24] sm:$0xf]  ;;  %v2423_v25 = vrot.slane %v4919_v9, 5  ;;  %v2426_v62 = vrot.slane %v5034_v6, 5  ;;  %v437_v32 = vor.u32 %v435_v54, %v5080_v23  ;;  %v5122_v20 = vld [vmem:[#allocation2 + $0x20] sm:$0x1] }
  0x7c   : > { %v4251_v4 = vcombine.low %v1590_v2, %v1600_v35  ;;  %v5084_v26 = vld [vmem:[#allocation2 + $0x28] sm:$0xf]  ;;  %v1998_v12 = vshrl.u32 %v4100_v47, 16  ;;  %v2001_v59 = vshll.u32 %v4100_v47, 16  ;;  %v650_v10 = vsel %vm4780_vm10, %v429_v11, %v649_v61 }
  0x7d   : > { %v2011_v7 = vshrl.u32 %v5084_v26, 16  ;;  %v4275_v8 = vcombine.low %v4100_v47, %v5084_v26  ;;  %v2007_v30 = vshll.u32 %v5084_v26, 16  ;;  %651 = vst [vmem:[#allocation2 + $0x84] sm:$0xf] %v650_v10  ;;  %v5095_v2 = vsel %vm4766_vm7, %v4162_v21, %v2423_v25  ;;  %v653_v10 = vld [vmem:[#allocation2 + $0x8c] sm:$0x1] }
  0x7e   : > { %2919 = vrot.lane.b32.xlu1 %v4251_v4, %s4629_s4  ;;  %v2000_v9 = vrot.slane %v1998_v12, 4  ;;  %v2003_v6 = vrot.slane %v2001_v59, 5  ;;  %v2425_v38 = vrot.slane %v2423_v25, 4  ;;  %v438_v44 = vsel %vm4795_vm12, %v430_v27, %v437_v32 }
  0x7f   : > { %3079 = vrot.lane.b32.xlu0 %v4275_v8, %s4630_s5  ;;  %v2009_v40 = vrot.slane %v2007_v30, 5  ;;  %v2013_v41 = vrot.slane %v2011_v7, 4  ;;  %v2172_v33 = vor.u32 %v2171_v22, %v2168_v57  ;;  %652 = vst.msk [vmem:[#allocation2 + $0x88] sm:$0xf] %vm162_vm0, %v438_v44  ;;  %v2175_v52 = vshll.u32 %v5045_v28, 16 }
  0x80   : > { %v5102_v46 = vld [vmem:[#allocation2 + $0x2c] sm:$0x1]  ;;  %v2004_v48 = vor.u32 %v2003_v6, %v2000_v9  ;;  %v2427_v29 = vsel %vm4766_vm7, %v2425_v38, %v2426_v62  ;;  %v2181_v53 = vrot.slane %v2179_v49, 4  ;;  %v2185_v31 = vshll.u32 %v5100_v37, 16  ;;  %v4147_v7 = vld [vmem:[#allocation2 + $0x24] sm:$0xe] }
  0x81   : > { %v2014_v5 = vor.u32 %v2013_v41, %v2009_v40  ;;  %v2017_v13 = vshll.u32 %v5102_v46, 16  ;;  %v4306_v58 = vcombine.low %v5095_v2, %v2427_v29  ;;  %v2173_v15 = vrot.slane %v2172_v33, 4  ;;  %v4154_v41 = vld [vmem:[#allocation2 + $0x78] sm:$0xe] }
  0x82   : > { %2999 = vrot.lane.b32.xlu1 %v4267_v16, %s4628_s3  ;;  %v2005_v57 = vrot.slane %v2004_v48, 4  ;;  %v2177_v22 = vrot.slane %v2175_v52, 5  ;;  %v795_v60 = vshrl.u32 %v699_v42, 16  ;;  %v798_v51 = vshll.u32 %v699_v42, 16 }
  0x83   : > { %3157 = vrot.lane.b32.xlu0 %v4290_v45, %s4631_s6  ;;  %v2015_v18 = vrot.slane %v2014_v5, 4  ;;  %v2019_v49 = vrot.slane %v2017_v13, 5  ;;  %v804_v14 = vshll.u32 %v5110_v39, 16  ;;  %v2187_v54 = vrot.slane %v2185_v31, 5  ;;  %v701_v5 = vld [vmem:[#allocation2 + $0x24] sm:$0xf] }
  0x84   : > { %v2010_v3 = vsel %vm4786_vm11, %v2005_v57, %v2009_v40  ;;  %v4116_v50 = vld [vmem:[#allocation2 + $0x84] sm:$0xf]  ;;  %v2178_v55 = vsel %vm4786_vm11, %v2173_v15, %v2177_v22  ;;  %v2182_v0 = vor.u32 %v2181_v53, %v2177_v22  ;;  %v797_v21 = vrot.slane %v795_v60, 4  ;;  %v5163_v60 = vld [vmem:[#allocation2 + $0x28] sm:$0xf] }
  0x85   : > { %v2020_v17 = vsel %vm4786_vm11, %v2015_v18, %v2019_v49  ;;  %v2190_v24 = vshrl.u32 %v4116_v50, 16  ;;  %v2193_v61 = vshll.u32 %v4116_v50, 16  ;;  %v800_v11 = vrot.slane %v798_v51, 5  ;;  %v5169_v51 = vld [vmem:[#allocation2 + $0x2c] sm:$0x1] }
  0x86   : > { %3093 = vrot.lane.b32.xlu1 %v4282_v56, %s4630_s5  ;;  %v4291_v16 = vcombine.low %v2010_v3, %v2020_v17  ;;  %v2183_v45 = vrot.slane %v2182_v0, 4  ;;  %v806_v27 = vrot.slane %v804_v14, 5  ;;  %v5130_v35 = vld [vmem:[#allocation2 + $0x88] sm:$0xf]  ;;  %v808_v62 = vshrl.u32 %v5110_v39, 16 }
  0x87   : > { %v2192_v47 = vrot.slane %v2190_v24, 4  ;;  %v2195_v25 = vrot.slane %v2193_v61, 5  ;;  %v814_v4 = vshll.u32 %v5122_v20, 16  ;;  %v2203_v12 = vshrl.u32 %v5130_v35, 16 }
  0x88   : > { %3159 = vrot.lane.b32.xlu0 %v4291_v16, %s4631_s6  ;;  %v4283_v59 = vcombine.low %v4116_v50, %v5130_v35  ;;  %v2188_v19 = vsel %vm4786_vm11, %v2183_v45, %v2187_v54  ;;  %v801_v56 = vor.u32 %v800_v11, %v797_v21  ;;  %v810_v30 = vrot.slane %v808_v62, 4  ;;  %v715_v50 = vld [vmem:[#allocation2 + $0x78] sm:$0xf] }
  0x89   : > { %v4298_v8 = vcombine.low %v2178_v55, %v2188_v19  ;;  %v816_v32 = vrot.slane %v814_v4, 5  ;;  %v439_v9 = vrot.slane %v5080_v23, 4  ;;  %v2196_v2 = vor.u32 %v2195_v25, %v2192_v47 }
  0x8a   : > { %3095 = vrot.lane.b32.xlu1 %v4283_v59, %s4630_s5  ;;  %v802_v6 = vrot.slane %v801_v56, 4  ;;  %v2199_v38 = vshll.u32 %v5130_v35, 16  ;;  %v2205_v40 = vrot.slane %v2203_v12, 4  ;;  %v811_v44 = vor.u32 %v810_v30, %v806_v27  ;;  %v5185_v12 = vld [vmem:[#allocation2 + $0x80] sm:$0x1] }
  0x8b   : > { %v654_v33 = vsel %vm4855_vm13, %v439_v9, %v653_v10  ;;  %v4163_v42 = vrot.slane %v4147_v7, 9  ;;  %v2430_v48 = vrot.slane %v5084_v26, 5  ;;  %v5148_v29 = vrot.slane %v2196_v2, 4 }
  0x8c   : > { %3237 = vrot.lane.b32.xlu0 %v4306_v58, %s4632_s7  ;;  %v807_v23 = vsel %vm4786_vm11, %v802_v6, %v806_v27  ;;  %655 = vst [vmem:[#allocation2 + $0x8c] sm:$0x1] %v654_v33  ;;  %v5150_v52 = vrot.slane %v2199_v38, 5  ;;  %v2433_v53 = vrot.slane %v5102_v46, 5  ;;  %v812_v13 = vrot.slane %v811_v44, 4 }
  0x8d   : > { %v2431_v15 = vsel %vm4766_vm7, %v4163_v42, %v2430_v48  ;;  %v2432_v57 = vrot.slane %v2430_v48, 4  ;;  %v4170_v26 = vrot.slane %v4154_v41, 9  ;;  %v2479_v31 = vrot.slane %v5045_v28, 5 }
  0x8e   : > { %3173 = vrot.lane.b32.xlu1 %v4298_v8, %s4631_s6  ;;  %v2202_v58 = vsel %vm4786_vm11, %v5148_v29, %v5150_v52  ;;  %v2206_v22 = vor.u32 %v2205_v40, %v5150_v52  ;;  %v2482_v46 = vrot.slane %v5100_v37, 5  ;;  %v817_v18 = vsel %vm4786_vm11, %v812_v13, %v816_v32  ;;  %v5175_v37 = vld [vmem:[#allocation2 + $0x7c] sm:$0xf]  ;;  %v1132_v8 = vld [vmem:[#allocation2 + $0x18] sm:$0xe] }
  0x8f   : > { %v2434_v49 = vsel %vm4766_vm7, %v2432_v57, %v2433_v53  ;;  %v819_v14 = vshrl.u32 %v701_v5, 16  ;;  %v822_v3 = vshll.u32 %v701_v5, 16  ;;  %v4196_v55 = vcombine.low %v807_v23, %v817_v18  ;;  %v4155_v23 = vld [vmem:[#allocation2 + $0x84] sm:$0xe] }
  0x90   : > { %v2207_v0 = vrot.slane %v2206_v22, 4  ;;  %v4307_v54 = vcombine.low %v2431_v15, %v2434_v49  ;;  %v5173_v28 = vsel %vm4766_vm7, %v4170_v26, %v2479_v31  ;;  %v2481_v17 = vrot.slane %v2479_v31, 4  ;;  %v1133_v22 = vld [vmem:[#allocation2 + $0x24] sm:$0xe] }
  0x91   : > { %v821_v24 = vrot.slane %v819_v14, 4  ;;  %v824_v61 = vrot.slane %v822_v3, 5  ;;  %v828_v21 = vshll.u32 %v5163_v60, 16  ;;  %2649 = vrot.lane.b32.xlu0 %v4196_v55, %s4626_s29  ;;  %v832_v16 = vshrl.u32 %v5163_v60, 16 }
  0x92   : > { %v838_v45 = vshll.u32 %v5169_v51, 16  ;;  %v987_v11 = vshrl.u32 %v715_v50, 16  ;;  %v990_v27 = vshll.u32 %v715_v50, 16  ;;  %v2483_v25 = vsel %vm4766_vm7, %v2481_v17, %v2482_v46  ;;  %v717_v50 = vld [vmem:[#allocation2 + $0x84] sm:$0xf] }
  0x93   : > { %v5181_v47 = vld [vmem:[#allocation2 + $0x8c] sm:$0x1]  ;;  %v825_v62 = vor.u32 %v824_v61, %v821_v24  ;;  %v830_v4 = vrot.slane %v828_v21, 5  ;;  %v996_v59 = vshll.u32 %v5175_v37, 16  ;;  %v4314_v56 = vcombine.low %v5173_v28, %v2483_v25 }
  0x94   : > { %v2209_v19 = vshll.u32 %v5181_v47, 16  ;;  %v834_v10 = vrot.slane %v832_v16, 4  ;;  %v840_v7 = vrot.slane %v838_v45, 5  ;;  %v989_v32 = vrot.slane %v987_v11, 4  ;;  %v5221_v11 = vld [vmem:[#allocation2 + $0x8c] sm:$0x1] }
  0x95   : > { %v826_v30 = vrot.slane %v825_v62, 4  ;;  %v992_v9 = vrot.slane %v990_v27, 5  ;;  %v998_v6 = vrot.slane %v996_v59, 5  ;;  %3239 = vrot.lane.b32.xlu0 %v4307_v54, %s4632_s7  ;;  %v1000_v40 = vshrl.u32 %v5175_v37, 16 }
  0x96   : > { %v2211_v2 = vrot.slane %v2209_v19, 5  ;;  %v835_v38 = vor.u32 %v834_v10, %v830_v4  ;;  %v1006_v41 = vshll.u32 %v5185_v12, 16  ;;  %v4004_v42 = vrot.slane %v1132_v8, 9  ;;  %v1140_v8 = vld [vmem:[#allocation2 + $0x78] sm:$0xe] }
  0x97   : > { %v831_v44 = vsel %vm4786_vm11, %v826_v30, %v830_v4  ;;  %v993_v33 = vor.u32 %v992_v9, %v989_v32  ;;  %v1213_v48 = vrot.slane %v5110_v39, 5  ;;  %v1002_v53 = vrot.slane %v1000_v40, 4  ;;  %v5227_v4 = vld [vmem:[#allocation2 + $0x28] sm:$0xf] }
  0x98   : > { %v2212_v29 = vsel %vm4786_vm11, %v2207_v0, %v2211_v2  ;;  %v836_v52 = vrot.slane %v835_v38, 4  ;;  %v1008_v5 = vrot.slane %v1006_v41, 5  ;;  %v1216_v39 = vrot.slane %v5122_v20, 5  ;;  %v5211_v20 = vld [vmem:[#allocation2 + $0x88] sm:$0xf] }
  0x99   : > { %v4299_v13 = vcombine.low %v2202_v58, %v2212_v29  ;;  %v994_v15 = vrot.slane %v993_v33, 4  ;;  %v1214_v57 = vsel %vm4766_vm7, %v4004_v42, %v1213_v48  ;;  %v1215_v26 = vrot.slane %v1213_v48, 4  ;;  %v224_v41 = vld [vmem:[%s4764_s27 + $0x18] sm:$0xf] }
  0x9a   : > { %v841_v31 = vsel %vm4786_vm11, %v836_v52, %v840_v7  ;;  %v1003_v46 = vor.u32 %v1002_v53, %v998_v6  ;;  %v4171_v18 = vrot.slane %v4155_v23, 9  ;;  %v2486_v58 = vrot.slane %v5130_v35, 5  ;;  %v225_v23 = vld [vmem:[%s4764_s27 + $0x1c] sm:$0xf] }
  0x9b   : > { %3175 = vrot.lane.b32.xlu1 %v4299_v13, %s4631_s6  ;;  %v4197_v49 = vcombine.low %v831_v44, %v841_v31  ;;  %v999_v14 = vsel %vm4786_vm11, %v994_v15, %v998_v6  ;;  %v2489_v3 = vrot.slane %v5181_v47, 5  ;;  %v1217_v0 = vsel %vm4766_vm7, %v1215_v26, %v1216_v39  ;;  %v1141_v13 = vld [vmem:[#allocation2 + $0x84] sm:$0xe] }
  0x9c   : > { %v1004_v55 = vrot.slane %v1003_v46, 4  ;;  %v4005_v54 = vrot.slane %v1133_v22, 9  ;;  %v1220_v28 = vrot.slane %v5163_v60, 5  ;;  %v4212_v17 = vcombine.low %v1214_v57, %v1217_v0 }
  0x9d   : > { %2651 = vrot.lane.b32.xlu0 %v4197_v49, %s4626_s29  ;;  %v2487_v24 = vsel %vm4766_vm7, %v4171_v18, %v2486_v58  ;;  %v2488_v61 = vrot.slane %v2486_v58, 4  ;;  %v1223_v35 = vrot.slane %v5169_v51, 5  ;;  %v1011_v60 = vshrl.u32 %v717_v50, 16  ;;  %v4022_v51 = vld [vmem:[#allocation2 + $0x24] sm:$0xf] }
  0x9e   : > { %v1009_v21 = vsel %vm4786_vm11, %v1004_v55, %v1008_v5  ;;  %v1221_v16 = vsel %vm4766_vm7, %v4005_v54, %v1220_v28  ;;  %v1222_v45 = vrot.slane %v1220_v28, 4  ;;  %v1014_v25 = vshll.u32 %v717_v50, 16  ;;  %v600_v55 = vld [vmem:[#allocation2 + $0x30] sm:$0xf] }
  0x9f   : > { %3253 = vrot.lane.b32.xlu1 %v4314_v56, %s4632_s7  ;;  %v4204_v27 = vcombine.low %v999_v14, %v1009_v21  ;;  %v2490_v47 = vsel %vm4766_vm7, %v2488_v61, %v2489_v3  ;;  %v1020_v62 = vshll.u32 %v5211_v20, 16  ;;  %v1013_v10 = vrot.slane %v1011_v60, 4  ;;  %v5253_v61 = vld [vmem:[#allocation2 + $0x2c] sm:$0x1] }
  0xa0   : > { %v4315_v59 = vcombine.low %v2487_v24, %v2490_v47  ;;  %v1224_v19 = vsel %vm4766_vm7, %v1222_v45, %v1223_v35  ;;  %v1024_v7 = vshrl.u32 %v5211_v20, 16  ;;  %v1016_v30 = vrot.slane %v1014_v25, 5  ;;  %v5255_v35 = vld [vmem:[#allocation2 + $0x84] sm:$0xf] }
  0xa1   : > { %2729 = vrot.lane.b32.xlu0 %v4212_v17, %s4625_s28  ;;  %v4213_v56 = vcombine.low %v1221_v16, %v1224_v19  ;;  %v1022_v32 = vrot.slane %v1020_v62, 5  ;;  %v1030_v9 = vshll.u32 %v5221_v11, 16  ;;  %v1410_v2 = vshrl.u32 %v4022_v51, 16  ;;  %v5264_v62 = vld [vmem:[#allocation2 + $0x88] sm:$0xf] }
  0xa2   : > { %v1026_v6 = vrot.slane %v1024_v7, 4  ;;  %v1413_v38 = vshll.u32 %v4022_v51, 16  ;;  %v1423_v40 = vshrl.u32 %v5227_v4, 16  ;;  %v1017_v44 = vor.u32 %v1016_v30, %v1013_v10  ;;  %v604_v10 = vld [vmem:[#allocation2 + $0x38] sm:$0x1] }
  0xa3   : > { %2665 = vrot.lane.b32.xlu1 %v4204_v27, %s4626_s29  ;;  %v1032_v33 = vrot.slane %v1030_v9, 5  ;;  %v4228_v42 = vcombine.low %v4022_v51, %v5227_v4  ;;  %v4012_v48 = vrot.slane %v1140_v8, 9  ;;  %v1412_v52 = vrot.slane %v1410_v2, 4  ;;  %v240_v7 = vld [vmem:[%s4764_s27 + $0x58] sm:$0xf] }
  0xa4   : > { %v1027_v29 = vor.u32 %v1026_v6, %v1022_v32  ;;  %v1415_v53 = vrot.slane %v1413_v38, 5  ;;  %v1269_v5 = vrot.slane %v5175_v37, 5  ;;  %v1018_v15 = vrot.slane %v1017_v44, 4 }
  0xa5   : > { %2731 = vrot.lane.b32.xlu0 %v4213_v56, %s4625_s28  ;;  %v1272_v57 = vrot.slane %v5185_v12, 5  ;;  %v305_v26 = vshrl.u32 %v224_v41, 16  ;;  %v308_v22 = vshll.u32 %v224_v41, 16  ;;  %v313_v18 = vshrl.u32 %v225_v23, 16  ;;  %v4498_v41 = vld [vmem:[%s6725_s1] sm:$0xff]  }
  0xa6   : > { %v1028_v31 = vrot.slane %v1027_v29, 4  ;;  %v1270_v46 = vsel %vm4766_vm7, %v4012_v48, %v1269_v5  ;;  %v1271_v39 = vrot.slane %v1269_v5, 4  ;;  %v1023_v49 = vsel %vm4786_vm11, %v1018_v15, %v1022_v32  ;;  %v241_v32 = vld [vmem:[%s4764_s27 + $0x5c] sm:$0xf]  ;;  %4367 = vmatprep.subr.bf16.mxu0 %v4498_v41  ;;  %4405 = vmatprep.subr.bf16.mxu1 %v4498_v41 }
  0xa7   : > { %3255 = vrot.lane.b32.xlu1 %v4315_v59, %s4632_s7  ;;  %v307_v37 = vrot.slane %v305_v26, 7  ;;  %v316_v14 = vshll.u32 %v225_v23, 16  ;;  %v4013_v58 = vrot.slane %v1141_v13, 9  ;;  %v315_v50 = vrot.slane %v313_v18, 7  ;;  %4368 = vmatpush3.bf16.msra.mxu0 %v4498_v41  ;;  %v4500_v18 = vld [vmem:[%s6725_s1 + $0x8] sm:$0xff]  }
  0xa8   : > { %v1033_v3 = vsel %vm4786_vm11, %v1028_v31, %v1032_v33  ;;  %v1273_v12 = vsel %vm4766_vm7, %v1271_v39, %v1272_v57  ;;  %v1276_v0 = vrot.slane %v5211_v20, 5  ;;  %v1279_v60 = vrot.slane %v5221_v11, 5  ;;  %v5290_v26 = vpop.permute.xlu0 %2725  ;;  %4408 = vmatpush3.bf16.msra.mxu1 %v4498_v41  ;;  %4369 = vmatprep.subr.bf16.mxu0 %v4500_v18 }
  0xa9   : > { %v4205_v54 = vcombine.low %v1023_v49, %v1033_v3  ;;  %2825 = vrot.lane.b32.xlu0 %v4228_v42, %s4627_s30  ;;  %v4220_v28 = vcombine.low %v1270_v46, %v1273_v12  ;;  %v310_v17 = vor.u32 %v308_v22, %v307_v37  ;;  %v311_v24 = vrot.slane %v307_v37, 4  ;;  %v656_v37 = vld [vmem:[#allocation2 + $0x90] sm:$0xf]  ;;  %4406 = vmatprep.subr.bf16.mxu1 %v4500_v18 }
  0xaa   : > { %v318_v21 = vor.u32 %v316_v14, %v315_v50  ;;  %v1277_v16 = vsel %vm4766_vm7, %v4013_v58, %v1276_v0  ;;  %v1278_v45 = vrot.slane %v1276_v0, 4  ;;  %v1416_v27 = vor.u32 %v1415_v53, %v1412_v52 }
  0xab   : > { %2667 = vrot.lane.b32.xlu1 %v4205_v54, %s4626_s29  ;;  %v601_v20 = vsel %vm4780_vm10, %v310_v17, %v600_v55  ;;  %v1419_v47 = vshll.u32 %v5227_v4, 16  ;;  %v1425_v25 = vrot.slane %v1423_v40, 4  ;;  %v1429_v11 = vshll.u32 %v5253_v61, 16  ;;  %v4068_v40 = vld [vmem:[#allocation2 + $0x24] sm:$0xe]  ;;  %4370 = vmatpush3.bf16.msra.mxu0 %v4500_v18 }
  0xac   : > { %v319_v51 = vsel %vm4795_vm12, %v311_v24, %v318_v21  ;;  %602 = vst [vmem:[#allocation2 + $0x30] sm:$0xf] %v601_v20  ;;  %v1280_v59 = vsel %vm4766_vm7, %v1278_v45, %v1279_v60  ;;  %v1602_v19 = vshrl.u32 %v5255_v35, 16  ;;  %v1417_v8 = vrot.slane %v1416_v27, 4  ;;  %4409 = vmatpush3.bf16.msra.mxu1 %v4500_v18  ;;  %v5310_v60 = vld [vmem:[#allocation2 + $0x8c] sm:$0x1] }
  0xad   : > { %603 = vst.msk [vmem:[#allocation2 + $0x34] sm:$0xf] %vm162_vm0, %v319_v51  ;;  %v1421_v56 = vrot.slane %v1419_v47, 5  ;;  %v1605_v30 = vshll.u32 %v5255_v35, 16  ;;  %v4221_v9 = vcombine.low %v1277_v16, %v1280_v59  ;;  %v1431_v6 = vrot.slane %v1429_v11, 5  ;;  %v5318_v59 = vpop.permute.xlu0 %2645 }
  0xae   : > { %v5276_v2 = vrot.slane %v1602_v19, 4  ;;  %v1615_v38 = vshrl.u32 %v5264_v62, 16  ;;  %v4236_v42 = vcombine.low %v5255_v35, %v5264_v62  ;;  %v320_v48 = vrot.slane %v315_v50, 4 }
  0xaf   : > { %2745 = vrot.lane.b32.xlu1 %v4220_v28, %s4625_s28  ;;  %v1426_v44 = vor.u32 %v1425_v25, %v1421_v56  ;;  %v1607_v33 = vrot.slane %v1605_v30, 5  ;;  %v1422_v23 = vsel %vm4786_vm11, %v1417_v8, %v1421_v56  ;;  %v441_v29 = vshrl.u32 %v240_v7, 16 }
  0xb0   : > { %v444_v52 = vshll.u32 %v240_v7, 16  ;;  %v449_v53 = vshrl.u32 %v241_v32, 16  ;;  %v605_v13 = vsel %vm4855_vm13, %v320_v48, %v604_v10  ;;  %v4084_v15 = vrot.slane %v4068_v40, 9 }
  0xb1   : > { %v1427_v5 = vrot.slane %v1426_v44, 4  ;;  %v1825_v57 = vrot.slane %v5227_v4, 5  ;;  %606 = vst [vmem:[#allocation2 + $0x38] sm:$0x1] %v605_v13  ;;  %v443_v22 = vrot.slane %v441_v29, 7  ;;  %v452_v46 = vshll.u32 %v241_v32, 16 }
  0xb2   : > { %v5292_v31 = vrot.slane %v449_v53, 7  ;;  %v1828_v39 = vrot.slane %v5253_v61, 5  ;;  %v1608_v3 = vor.u32 %v1607_v33, %v5276_v2  ;;  %v1611_v54 = vshll.u32 %v5264_v62, 16 }
  0xb3   : > { %v4024_v49 = vld [vmem:[#allocation2 + $0x30] sm:$0xf]  ;;  %2747 = vrot.lane.b32.xlu1 %v4221_v9, %s4625_s28  ;;  %v1432_v4 = vsel %vm4786_vm11, %v1427_v5, %v1431_v6  ;;  %v5303_v14 = vsel %vm4766_vm7, %v4084_v15, %v1825_v57  ;;  %v1827_v58 = vrot.slane %v1825_v57, 4  ;;  %v446_v0 = vor.u32 %v444_v52, %v443_v22 }
  0xb4   : > { %v4025_v12 = vld [vmem:[#allocation2 + $0x34] sm:$0xf]  ;;  %v1434_v50 = vshrl.u32 %v4024_v49, 16  ;;  %v1437_v55 = vshll.u32 %v4024_v49, 16  ;;  %v447_v61 = vrot.slane %v443_v22, 4  ;;  %v454_v16 = vor.u32 %v452_v46, %v5292_v31 }
  0xb5   : > { %v1447_v28 = vshrl.u32 %v4025_v12, 16  ;;  %v4229_v17 = vcombine.low %v4024_v49, %v4025_v12  ;;  %v1443_v24 = vshll.u32 %v4025_v12, 16  ;;  %v657_v45 = vsel %vm4780_vm10, %v446_v0, %v656_v37  ;;  %v4069_v20 = vld [vmem:[#allocation2 + $0x30] sm:$0xe]  ;;  %v5331_v29 = vld [vmem:[#allocation2 + $0x34] sm:$0xf] }
  0xb6   : > { %v1436_v35 = vrot.slane %v1434_v50, 4  ;;  %v1439_v21 = vrot.slane %v1437_v55, 5  ;;  %v4244_v27 = vcombine.low %v1422_v23, %v1432_v4  ;;  %658 = vst [vmem:[#allocation2 + $0x90] sm:$0xf] %v657_v45  ;;  %v5316_v51 = vsel %vm4766_vm7, %v1827_v58, %v1828_v39  ;;  %v5328_v44 = vld [vmem:[#allocation2 + $0x30] sm:$0xf] }
  0xb7   : > { %2827 = vrot.lane.b32.xlu0 %v4229_v17, %s4627_s30  ;;  %2841 = vrot.lane.b32.xlu1 %v4236_v42, %s4627_s30  ;;  %v1445_v47 = vrot.slane %v1443_v24, 5  ;;  %v1449_v25 = vrot.slane %v1447_v28, 4  ;;  %v455_v19 = vsel %vm4795_vm12, %v447_v61, %v454_v16  ;;  %v1609_v10 = vrot.slane %v1608_v3, 4  ;;  %v660_v22 = vld [vmem:[#allocation2 + $0x98] sm:$0x1]  ;;  %v5343_v39 = vpop.permute.xlu0 %2821  ;;  %v5359_v61 = vpop.permute.xlu1 %2837 }
  0xb8   : > { %v1440_v11 = vor.u32 %v1439_v21, %v1436_v35  ;;  %v1613_v7 = vrot.slane %v1611_v54, 5  ;;  %v4053_v8 = vld [vmem:[#allocation2 + $0x38] sm:$0x1]  ;;  %659 = vst.msk [vmem:[#allocation2 + $0x94] sm:$0xf] %vm162_vm0, %v455_v19  ;;  %v1617_v30 = vrot.slane %v1615_v38, 4  ;;  %v4260_v40 = vcombine.low %v5303_v14, %v5316_v51 }
  0xb9   : > { %v1450_v56 = vor.u32 %v1449_v25, %v1445_v47  ;;  %v1621_v32 = vshll.u32 %v5310_v60, 16  ;;  %v4085_v9 = vrot.slane %v4069_v20, 9  ;;  %v1453_v2 = vshll.u32 %v4053_v8, 16  ;;  %v4076_v50 = vld [vmem:[#allocation2 + $0x84] sm:$0xe] }
  0xba   : > { %v1441_v6 = vrot.slane %v1440_v11, 4  ;;  %v1832_v41 = vrot.slane %v4025_v12, 5  ;;  %v1618_v42 = vor.u32 %v1617_v30, %v1613_v7  ;;  %v1835_v23 = vrot.slane %v4053_v8, 5  ;;  %v226_v24 = vld [vmem:[%s4764_s27 + $0x20] sm:$0xf] }
  0xbb   : > { %2905 = vrot.lane.b32.xlu0 %v4244_v27, %s4629_s4  ;;  %v1451_v33 = vrot.slane %v1450_v56, 4  ;;  %v1623_v48 = vrot.slane %v1621_v32, 5  ;;  %v1455_v52 = vrot.slane %v1453_v2, 5  ;;  %v1614_v53 = vsel %vm4786_vm11, %v1609_v10, %v1613_v7  ;;  %v227_v51 = vld [vmem:[%s4764_s27 + $0x24] sm:$0xf] }
  0xbc   : > { %v1446_v38 = vsel %vm4786_vm11, %v1441_v6, %v1445_v47  ;;  %v1834_v5 = vrot.slane %v1832_v41, 4  ;;  %v1619_v13 = vrot.slane %v1618_v42, 4  ;;  %v5339_v15 = vsel %vm4766_vm7, %v4085_v9, %v1832_v41 }
  0xbd   : > { %v456_v57 = vrot.slane %v5292_v31, 4  ;;  %v2022_v46 = vshrl.u32 %v5328_v44, 16  ;;  %v1456_v18 = vsel %vm4786_vm11, %v1451_v33, %v1455_v52  ;;  %v4040_v49 = vld [vmem:[#allocation2 + $0x90] sm:$0xf]  ;;  %v2025_v37 = vshll.u32 %v5328_v44, 16  ;;  %v5373_v52 = vpop.permute.xlu1 %2839 }
  0xbe   : > { %v1836_v4 = vsel %vm4766_vm7, %v1834_v5, %v1835_v23  ;;  %v2035_v14 = vshrl.u32 %v5331_v29, 16  ;;  %v4245_v58 = vcombine.low %v1446_v38, %v1456_v18  ;;  %v1626_v3 = vshrl.u32 %v4040_v49, 16  ;;  %v4077_v8 = vld [vmem:[#allocation2 + $0x90] sm:$0xe] }
  0xbf   : > { %v1629_v31 = vshll.u32 %v4040_v49, 16  ;;  %v1624_v12 = vsel %vm4786_vm11, %v1619_v13, %v1623_v48  ;;  %v4041_v55 = vld [vmem:[#allocation2 + $0x94] sm:$0xf]  ;;  %v4261_v54 = vcombine.low %v5339_v15, %v1836_v4  ;;  %v661_v28 = vsel %vm4855_vm13, %v456_v57, %v660_v22  ;;  %v5382_v15 = vld [vmem:[#allocation2 + $0x38] sm:$0x1] }
  0xc0   : > { %v4252_v0 = vcombine.low %v1614_v53, %v1624_v12  ;;  %v4276_v17 = vcombine.low %v5328_v44, %v5331_v29  ;;  %2907 = vrot.lane.b32.xlu0 %v4245_v58, %s4629_s4  ;;  %v1628_v35 = vrot.slane %v1626_v3, 4  ;;  %v1639_v16 = vshrl.u32 %v4041_v55, 16  ;;  %662 = vst [vmem:[#allocation2 + $0x98] sm:$0x1] %v661_v28  ;;  %v5366_v56 = vpop.permute.xlu0 %2823  ;;  %v5384_v57 = vld [vmem:[#allocation2 + $0x90] sm:$0xf] }
  0xc1   : > { %v1631_v21 = vrot.slane %v1629_v31, 5  ;;  %v4237_v45 = vcombine.low %v4040_v49, %v4041_v55  ;;  %v1635_v20 = vshll.u32 %v4041_v55, 16  ;;  %v2024_v27 = vrot.slane %v2022_v46, 4 }
  0xc2   : > { %v4092_v47 = vrot.slane %v4076_v50, 9  ;;  %v1881_v25 = vrot.slane %v5264_v62, 5  ;;  %v1641_v19 = vrot.slane %v1639_v16, 4  ;;  %v1884_v10 = vrot.slane %v5310_v60, 5  ;;  %v607_v60 = vld [vmem:[#allocation2 + $0x3c] sm:$0xf] }
  0xc3   : > { %2843 = vrot.lane.b32.xlu1 %v4237_v45, %s4627_s30  ;;  %v1632_v11 = vor.u32 %v1631_v21, %v1628_v35  ;;  %v322_v7 = vshrl.u32 %v226_v24, 16  ;;  %v1637_v30 = vrot.slane %v1635_v20, 5  ;;  %v2027_v32 = vrot.slane %v2025_v37, 5  ;;  %v5403_v21 = vld [vmem:[#allocation2 + $0x94] sm:$0xf] }
  0xc4   : > { %v1883_v9 = vrot.slane %v1881_v25, 4  ;;  %v325_v6 = vshll.u32 %v226_v24, 16  ;;  %2985 = vrot.lane.b32.xlu0 %v4260_v40, %s4628_s3  ;;  %v5371_v62 = vsel %vm4766_vm7, %v4092_v47, %v1881_v25  ;;  %v330_v33 = vshrl.u32 %v227_v51, 16  ;;  %v242_v47 = vld [vmem:[%s4764_s27 + $0x60] sm:$0xf] }
  0xc5   : > { %v1633_v2 = vrot.slane %v1632_v11, 4  ;;  %v324_v41 = vrot.slane %v322_v7, 7  ;;  %v1642_v42 = vor.u32 %v1641_v19, %v1637_v30  ;;  %v333_v48 = vshll.u32 %v227_v51, 16  ;;  %v243_v7 = vld [vmem:[%s4764_s27 + $0x64] sm:$0xf] }
  0xc6   : > { %v4093_v23 = vrot.slane %v4077_v8, 9  ;;  %v1888_v38 = vrot.slane %v4041_v55, 5  ;;  %v5380_v40 = vsel %vm4766_vm7, %v1883_v9, %v1884_v10  ;;  %v332_v18 = vrot.slane %v330_v33, 7 }
  0xc7   : > { %2921 = vrot.lane.b32.xlu1 %v4252_v0, %s4629_s4  ;;  %v1638_v53 = vsel %vm4786_vm11, %v1633_v2, %v1637_v30  ;;  %v327_v5 = vor.u32 %v325_v6, %v324_v41  ;;  %v328_v13 = vrot.slane %v324_v41, 4  ;;  %v4061_v22 = vld [vmem:[#allocation2 + $0x98] sm:$0x1]  ;;  %v1643_v46 = vrot.slane %v1642_v42, 4  ;;  %v611_v6 = vld [vmem:[#allocation2 + $0x44] sm:$0x1] }
  0xc8   : > { %v5388_v49 = vsel %vm4766_vm7, %v4093_v23, %v1888_v38  ;;  %v1890_v4 = vrot.slane %v1888_v38, 4  ;;  %2987 = vrot.lane.b32.xlu0 %v4261_v54, %s4628_s3  ;;  %v1645_v37 = vshll.u32 %v4061_v22, 16  ;;  %v1891_v3 = vrot.slane %v4061_v22, 5  ;;  %v5393_v12 = vpop.permute.xlu0 %2727  ;;  %v5413_v25 = vpop.permute.xlu1 %2741  ;;  %v4148_v2 = vld [vmem:[#allocation2 + $0x30] sm:$0xe] }
  0xc9   : > { %v608_v58 = vsel %vm4780_vm10, %v327_v5, %v607_v60  ;;  %v2028_v31 = vor.u32 %v2027_v32, %v2024_v27  ;;  %v335_v50 = vor.u32 %v333_v48, %v332_v18  ;;  %v2031_v55 = vshll.u32 %v5331_v29, 16  ;;  %v4513_v5 = vld [vmem:[#allocation2 + $0x4] sm:$0xf] }
  0xca   : > { %609 = vst [vmem:[#allocation2 + $0x3c] sm:$0xf] %v608_v58  ;;  %v2037_v0 = vrot.slane %v2035_v14, 4  ;;  %v2041_v28 = vshll.u32 %v5382_v15, 16  ;;  %v1647_v24 = vrot.slane %v1645_v37, 5  ;;  %v5401_v54 = vsel %vm4766_vm7, %v1890_v4, %v1891_v3 }
  0xcb   : > { %v2029_v35 = vrot.slane %v2028_v31, 4  ;;  %v2214_v16 = vshrl.u32 %v5384_v57, 16  ;;  %v4268_v45 = vcombine.low %v5371_v62, %v5380_v40  ;;  %v336_v20 = vsel %vm4795_vm12, %v328_v13, %v335_v50  ;;  %v4514_v13 = vld [vmem:[#allocation2] sm:$0xf]  ;;  %v663_v3 = vld [vmem:[#allocation2 + $0x9c] sm:$0xf] }
  0xcc   : > { %v4269_v14 = vcombine.low %v5388_v49, %v5401_v54  ;;  %v2033_v27 = vrot.slane %v2031_v55, 5  ;;  %v1648_v51 = vsel %vm4786_vm11, %v1643_v46, %v1647_v24  ;;  %3081 = vrot.lane.b32.xlu0 %v4276_v17, %s4630_s5  ;;  %610 = vst.msk [vmem:[#allocation2 + $0x40] sm:$0xf] %vm162_vm0, %v336_v20  ;;  %v2043_v11 = vrot.slane %v2041_v28, 5  ;;  %v5431_v33 = vpop.permute.xlu0 %2981  ;;  %v5440_v31 = vpop.permute.xlu1 %2743  ;;  %v703_v49 = vld [vmem:[#allocation2 + $0x30] sm:$0xf] }
  0xcd   : > { %v5422_v19 = vrot.slane %v2214_v16, 4  ;;  %v2217_v10 = vshll.u32 %v5384_v57, 16  ;;  %v4253_v8 = vcombine.low %v1638_v53, %v1648_v51  ;;  %v2227_v9 = vshrl.u32 %v5403_v21, 16  ;;  %v5479_v54 = vld [vmem:[#allocation2 + $0x34] sm:$0xf] }
  0xce   : > { %v2034_v30 = vsel %vm4786_vm11, %v2029_v35, %v2033_v27  ;;  %v2038_v32 = vor.u32 %v2037_v0, %v2033_v27  ;;  %v4284_v44 = vcombine.low %v5384_v57, %v5403_v21  ;;  %v337_v17 = vrot.slane %v332_v18, 4 }
  0xcf   : > { %v458_v62 = vshrl.u32 %v242_v47, 16  ;;  %v461_v41 = vshll.u32 %v242_v47, 16  ;;  %2923 = vrot.lane.b32.xlu1 %v4253_v8, %s4629_s4  ;;  %v2219_v48 = vrot.slane %v2217_v10, 5  ;;  %v466_v60 = vshrl.u32 %v243_v7, 16  ;;  %v5452_v10 = vld [vmem:[#allocation2 + $0x98] sm:$0x1] }
  0xd0   : > { %v2039_v42 = vrot.slane %v2038_v32, 4  ;;  %v469_v23 = vshll.u32 %v243_v7, 16  ;;  %v612_v53 = vsel %vm4855_vm13, %v337_v17, %v611_v6  ;;  %v4178_v22 = vcombine.low %v4514_v13, %v4513_v5 }
  0xd1   : > { %v4104_v38 = vld [vmem:[#allocation2 + $0x3c] sm:$0xf]  ;;  %v460_v40 = vrot.slane %v458_v62, 7  ;;  %v4164_v46 = vrot.slane %v4148_v2, 9  ;;  %613 = vst [vmem:[#allocation2 + $0x44] sm:$0x1] %v612_v53  ;;  %v2220_v17 = vor.u32 %v2219_v48, %v5422_v19 }
  0xd2   : > { %v2046_v18 = vshrl.u32 %v4104_v38, 16  ;;  %v2049_v4 = vshll.u32 %v4104_v38, 16  ;;  %v2044_v37 = vsel %vm4786_vm11, %v2039_v42, %v2043_v11  ;;  %v5438_v58 = vrot.slane %v466_v60, 7 }
  0xd3   : > { %v4292_v50 = vcombine.low %v2034_v30, %v2044_v37  ;;  %v463_v55 = vor.u32 %v461_v41, %v460_v40  ;;  %v464_v0 = vrot.slane %v460_v40, 4  ;;  %3001 = vrot.lane.b32.xlu1 %v4268_v45, %s4628_s3  ;;  %v5443_v28 = vld [vmem:[#allocation2 + $0x40] sm:$0xf]  ;;  %v2437_v20 = vrot.slane %v5331_v29, 5  ;;  %v5454_v45 = vpop.permute.xlu0 %2661 }
  0xd4   : > { %v2048_v24 = vrot.slane %v2046_v18, 4  ;;  %v2051_v35 = vrot.slane %v2049_v4, 5  ;;  %v471_v16 = vor.u32 %v469_v23, %v5438_v58  ;;  %v2059_v27 = vshrl.u32 %v5443_v28, 16  ;;  %v5472_v23 = vpop.permute.xlu1 %2997 }
  0xd5   : > { %v4277_v47 = vcombine.low %v4104_v38, %v5443_v28  ;;  %v2055_v51 = vshll.u32 %v5443_v28, 16  ;;  %v664_v11 = vsel %vm4780_vm10, %v463_v55, %v663_v3  ;;  %v5460_v29 = vsel %vm4766_vm7, %v4164_v46, %v2437_v20 }
  0xd6   : > { %v2052_v7 = vor.u32 %v2051_v35, %v2048_v24  ;;  %v472_v8 = vsel %vm4795_vm12, %v464_v0, %v471_v16  ;;  %665 = vst [vmem:[#allocation2 + $0x9c] sm:$0xf] %v664_v11  ;;  %v2439_v30 = vrot.slane %v2437_v20, 4  ;;  %v2061_v6 = vrot.slane %v2059_v27, 4 }
  0xd7   : > { %3083 = vrot.lane.b32.xlu0 %v4277_v47, %s4630_s5  ;;  %v2057_v32 = vrot.slane %v2055_v51, 5  ;;  %666 = vst.msk [vmem:[#allocation2 + $0xa0] sm:$0xf] %vm162_vm0, %v472_v8  ;;  %v2440_v2 = vrot.slane %v5382_v15, 5  ;;  %3003 = vrot.lane.b32.xlu1 %v4269_v14, %s4628_s3  ;;  %v2223_v41 = vshll.u32 %v5403_v21, 16  ;;  %v2229_v42 = vrot.slane %v2227_v9, 4  ;;  %v5489_v46 = vpop.permute.xlu0 %2901 }
  0xd8   : > { %v2053_v62 = vrot.slane %v2052_v7, 4  ;;  %v2233_v60 = vshll.u32 %v5452_v10, 16  ;;  %v5474_v38 = vld [vmem:[#allocation2 + $0x44] sm:$0x1]  ;;  %v2221_v19 = vrot.slane %v2220_v17, 4  ;;  %v5486_v5 = vsel %vm3269_vm14, %v4178_v22, %v5318_v59  ;;  %v5505_v27 = vpop.permute.xlu1 %2647 }
  0xd9   : > { %v2062_v53 = vor.u32 %v2061_v6, %v2057_v32  ;;  %v2441_v15 = vsel %vm4766_vm7, %v2439_v30, %v2440_v2  ;;  %v2065_v48 = vshll.u32 %v5474_v38, 16  ;;  %v2225_v40 = vrot.slane %v2223_v41, 5  ;;  %v4149_v6 = vld [vmem:[#allocation2 + $0x3c] sm:$0xe] }
  0xda   : > { %v2058_v14 = vsel %vm4786_vm11, %v2053_v62, %v2057_v32  ;;  %v4308_v13 = vcombine.low %v5460_v29, %v2441_v15  ;;  %v2235_v3 = vrot.slane %v2233_v60, 5  ;;  %v843_v59 = vshrl.u32 %v703_v49, 16 }
  0xdb   : > { %3161 = vrot.lane.b32.xlu0 %v4292_v50, %s4631_s6  ;;  %v2063_v9 = vrot.slane %v2062_v53, 4  ;;  %3097 = vrot.lane.b32.xlu1 %v4284_v44, %s4630_s5  ;;  %v2067_v18 = vrot.slane %v2065_v48, 5  ;;  %v2226_v4 = vsel %vm4786_vm11, %v2221_v19, %v2225_v40  ;;  %v2230_v37 = vor.u32 %v2229_v42, %v2225_v40  ;;  %v5497_v50 = vld [vmem:[#allocation2 + $0x38] sm:$0x1]  ;;  %v667_v42 = vld [vmem:[#allocation2 + $0xa4] sm:$0x1] }
  0xdc   : > { %v846_v22 = vshll.u32 %v703_v49, 16  ;;  %v852_v0 = vshll.u32 %v5479_v54, 16  ;;  %v856_v24 = vshrl.u32 %v5479_v54, 16  ;;  %v845_v7 = vrot.slane %v843_v59, 4  ;;  %v4156_v40 = vld [vmem:[#allocation2 + $0x90] sm:$0xe] }
  0xdd   : > { %v4120_v55 = vld [vmem:[#allocation2 + $0x9c] sm:$0xf]  ;;  %v2068_v35 = vsel %vm4786_vm11, %v2063_v9, %v2067_v18  ;;  %v2231_v20 = vrot.slane %v2230_v37, 4  ;;  %v862_v41 = vshll.u32 %v5497_v50, 16  ;;  %v473_v15 = vrot.slane %v5438_v58, 4 }
  0xde   : > { %v5503_v57 = vld [vmem:[#allocation2 + $0xa0] sm:$0xf]  ;;  %v2238_v44 = vshrl.u32 %v4120_v55, 16  ;;  %v2241_v16 = vshll.u32 %v4120_v55, 16  ;;  %v4293_v47 = vcombine.low %v2058_v14, %v2068_v35  ;;  %v848_v32 = vrot.slane %v846_v22, 5  ;;  %v5524_v59 = vpop.permute.xlu1 %2663 }
  0xdf   : > { %v2251_v51 = vshrl.u32 %v5503_v57, 16  ;;  %v4285_v11 = vcombine.low %v4120_v55, %v5503_v57  ;;  %v2236_v30 = vsel %vm4786_vm11, %v2231_v20, %v2235_v3  ;;  %v854_v17 = vrot.slane %v852_v0, 5 }
  0xe0   : > { %v2240_v8 = vrot.slane %v2238_v44, 4  ;;  %v2243_v29 = vrot.slane %v2241_v16, 5  ;;  %3163 = vrot.lane.b32.xlu0 %v4293_v47, %s4631_s6  ;;  %v4300_v2 = vcombine.low %v2226_v4, %v2236_v30  ;;  %v858_v62 = vrot.slane %v856_v24, 4  ;;  %v5514_v60 = vpop.permute.xlu0 %2903  ;;  %v705_v47 = vld [vmem:[#allocation2 + $0x3c] sm:$0xf] }
  0xe1   : > { %3099 = vrot.lane.b32.xlu1 %v4285_v11, %s4630_s5  ;;  %v849_v53 = vor.u32 %v848_v32, %v845_v7  ;;  %v2247_v48 = vshll.u32 %v5503_v57, 16  ;;  %v864_v14 = vrot.slane %v862_v41, 5  ;;  %v2253_v9 = vrot.slane %v2251_v51, 4  ;;  %v5540_v51 = vld [vmem:[#allocation2 + $0x40] sm:$0xf] }
  0xe2   : > { %v2244_v19 = vor.u32 %v2243_v29, %v2240_v8  ;;  %v859_v49 = vor.u32 %v858_v62, %v854_v17  ;;  %v4165_v18 = vrot.slane %v4149_v6, 9  ;;  %v668_v4 = vsel %vm4855_vm13, %v473_v15, %v667_v42  ;;  %v5547_v8 = vld [vmem:[#allocation2 + $0x44] sm:$0x1]  ;;  %v719_v41 = vld [vmem:[#allocation2 + $0x90] sm:$0xf] }
  0xe3   : > { %v850_v37 = vrot.slane %v849_v53, 4  ;;  %v5522_v55 = vrot.slane %v2247_v48, 5  ;;  %669 = vst [vmem:[#allocation2 + $0xa4] sm:$0x1] %v668_v4  ;;  %v2444_v22 = vrot.slane %v5443_v28, 5  ;;  %v2447_v0 = vrot.slane %v5474_v38, 5  ;;  %v5565_v48 = vpop.permute.xlu1 %2917 }
  0xe4   : > { %v5520_v3 = vrot.slane %v2244_v19, 4  ;;  %3241 = vrot.lane.b32.xlu0 %v4308_v13, %s4632_s7  ;;  %v860_v58 = vrot.slane %v859_v49, 4  ;;  %v4172_v24 = vrot.slane %v4156_v40, 9  ;;  %v5530_v35 = vpop.permute.xlu0 %2983  ;;  %v2493_v20 = vrot.slane %v5403_v21, 5  ;;  %v5563_v19 = vld [vmem:[#allocation2 + $0x94] sm:$0xf] }
  0xe5   : > { %3177 = vrot.lane.b32.xlu1 %v4300_v2, %s4631_s6  ;;  %v855_v44 = vsel %vm4786_vm11, %v850_v37, %v854_v17  ;;  %v2254_v13 = vor.u32 %v2253_v9, %v5522_v55  ;;  %v2445_v38 = vsel %vm4766_vm7, %v4165_v18, %v2444_v22  ;;  %v2446_v11 = vrot.slane %v2444_v22, 4  ;;  %v5569_v18 = vld [vmem:[#allocation2 + $0x98] sm:$0x1] }
  0xe6   : > { %v2250_v16 = vsel %vm4786_vm11, %v5520_v3, %v5522_v55  ;;  %v865_v28 = vsel %vm4786_vm11, %v860_v58, %v864_v14  ;;  %v2496_v7 = vrot.slane %v5452_v10, 5  ;;  %v5551_v32 = vsel %vm4766_vm7, %v4172_v24, %v2493_v20 }
  0xe7   : > { %v4198_v29 = vcombine.low %v855_v44, %v865_v28  ;;  %v2255_v30 = vrot.slane %v2254_v13, 4  ;;  %v2495_v21 = vrot.slane %v2493_v20, 4  ;;  %v2448_v6 = vsel %vm4766_vm7, %v2446_v11, %v2447_v0  ;;  %v1134_v28 = vld [vmem:[#allocation2 + $0x30] sm:$0xe] }
  0xe8   : > { %v867_v2 = vshrl.u32 %v705_v47, 16  ;;  %v870_v17 = vshll.u32 %v705_v47, 16  ;;  %v876_v62 = vshll.u32 %v5540_v51, 16  ;;  %v4309_v10 = vcombine.low %v2445_v38, %v2448_v6  ;;  %v5571_v37 = vpop.permute.xlu0 %3077 }
  0xe9   : > { %2653 = vrot.lane.b32.xlu0 %v4198_v29, %s4626_s29  ;;  %v5559_v42 = vsel %vm4766_vm7, %v2495_v21, %v2496_v7  ;;  %v880_v53 = vshrl.u32 %v5540_v51, 16  ;;  %v886_v15 = vshll.u32 %v5547_v8, 16  ;;  %v1035_v0 = vshrl.u32 %v719_v41, 16 }
  0xea   : > { %v4316_v40 = vcombine.low %v5551_v32, %v5559_v42  ;;  %v869_v49 = vrot.slane %v867_v2, 4  ;;  %v872_v14 = vrot.slane %v870_v17, 5  ;;  %v878_v9 = vrot.slane %v876_v62, 5  ;;  %v5573_v4 = vld [vmem:[#allocation2 + $0xa4] sm:$0x1] }
  0xeb   : > { %v882_v58 = vrot.slane %v880_v53, 4  ;;  %v888_v22 = vrot.slane %v886_v15, 5  ;;  %v1038_v24 = vshll.u32 %v719_v41, 16  ;;  %v2257_v44 = vshll.u32 %v5573_v4, 16 }
  0xec   : > { %v873_v13 = vor.u32 %v872_v14, %v869_v49  ;;  %v1044_v20 = vshll.u32 %v5563_v19, 16  ;;  %v1048_v47 = vshrl.u32 %v5563_v19, 16  ;;  %v1037_v11 = vrot.slane %v1035_v0, 4 }
  0xed   : > { %3243 = vrot.lane.b32.xlu0 %v4309_v10, %s4632_s7  ;;  %v883_v38 = vor.u32 %v882_v58, %v878_v9  ;;  %v1040_v7 = vrot.slane %v1038_v24, 5  ;;  %v1054_v29 = vshll.u32 %v5569_v18, 16  ;;  %v2259_v21 = vrot.slane %v2257_v44, 5  ;;  %v4157_v24 = vld [vmem:[#allocation2 + $0x9c] sm:$0xe] }
  0xee   : > { %v874_v6 = vrot.slane %v873_v13, 4  ;;  %v1046_v2 = vrot.slane %v1044_v20, 5  ;;  %v1050_v17 = vrot.slane %v1048_v47, 4  ;;  %v4006_v15 = vrot.slane %v1134_v28, 9  ;;  %v1135_v28 = vld [vmem:[#allocation2 + $0x3c] sm:$0xe] }
  0xef   : > { %v884_v62 = vrot.slane %v883_v38, 4  ;;  %v1041_v41 = vor.u32 %v1040_v7, %v1037_v11  ;;  %v1056_v53 = vrot.slane %v1054_v29, 5  ;;  %v2260_v14 = vsel %vm4786_vm11, %v2255_v30, %v2259_v21 }
  0xf0   : > { %v5580_v49 = vpop.permute.xlu1 %2919  ;;  %v879_v10 = vsel %vm4786_vm11, %v874_v6, %v878_v9  ;;  %v1051_v58 = vor.u32 %v1050_v17, %v1046_v2  ;;  %v1227_v0 = vrot.slane %v5479_v54, 5  ;;  %v4301_v13 = vcombine.low %v2250_v16, %v2260_v14  ;;  %v5609_v6 = vld [vmem:[#allocation2 + $0xa0] sm:$0xf] }
  0xf1   : > { %v5587_v44 = vpop.permute.xlu0 %3079  ;;  %v889_v20 = vsel %vm4786_vm11, %v884_v62, %v888_v22  ;;  %v1042_v47 = vrot.slane %v1041_v41, 4  ;;  %v1230_v30 = vrot.slane %v5497_v50, 5  ;;  %v4173_v3 = vrot.slane %v4157_v24, 9  ;;  %v721_v22 = vld [vmem:[#allocation2 + $0x9c] sm:$0xf] }
  0xf2   : > { %v4199_v9 = vcombine.low %v879_v10, %v889_v20  ;;  %v1052_v38 = vrot.slane %v1051_v58, 4  ;;  %v1228_v54 = vsel %vm4766_vm7, %v4006_v15, %v1227_v0  ;;  %v1229_v11 = vrot.slane %v1227_v0, 4  ;;  %3179 = vrot.lane.b32.xlu1 %v4301_v13, %s4631_s6  ;;  %v4515_v41 = vld [vmem:[#allocation2 + $0x60] sm:$0xf]  ;;  %v4516_v15 = vld [vmem:[#allocation2 + $0x64] sm:$0xf] }
  0xf3   : > { %v1047_v7 = vsel %vm4786_vm11, %v1042_v47, %v1046_v2  ;;  %v2500_v55 = vrot.slane %v5503_v57, 5  ;;  %v2503_v16 = vrot.slane %v5573_v4, 5  ;;  %v4007_v21 = vrot.slane %v1135_v28, 9  ;;  %v5620_v0 = vld [vmem:[#allocation2 + $0xa4] sm:$0x1] }
  0xf4   : > { %2655 = vrot.lane.b32.xlu0 %v4199_v9, %s4626_s29  ;;  %v1057_v50 = vsel %vm4786_vm11, %v1052_v38, %v1056_v53  ;;  %v1231_v29 = vsel %vm4766_vm7, %v1229_v11, %v1230_v30  ;;  %v5611_v17 = vpop.permute.xlu1 %2999  ;;  %v3320_v57 = vsel %vm3318_vm15, %v5486_v5, %v5290_v26  ;;  %v4186_v14 = vcombine.low %v4515_v41, %v4516_v15  ;;  %v4026_v30 = vld [vmem:[#allocation2 + $0x3c] sm:$0xf] }
  0xf5   : > { %v5613_v2 = vpop.permute.xlu0 %3157  ;;  %v4214_v4 = vcombine.low %v1228_v54, %v1231_v29  ;;  %v2502_v62 = vrot.slane %v2500_v55, 4  ;;  %v4206_v53 = vcombine.low %v1047_v7, %v1057_v50  ;;  %v1234_v10 = vrot.slane %v5540_v51, 5  ;;  %v4517_v7 = vld [vmem:[#allocation2 + $0x10] sm:$0xf] }
  0xf6   : > { %v1237_v58 = vrot.slane %v5547_v8, 5  ;;  %v1059_v24 = vshrl.u32 %v721_v22, 16  ;;  %3257 = vrot.lane.b32.xlu1 %v4316_v40, %s4632_s7  ;;  %v2501_v26 = vsel %vm4766_vm7, %v4173_v3, %v2500_v55  ;;  %v1062_v13 = vshll.u32 %v721_v22, 16  ;;  %v4518_v3 = vld [vmem:[#allocation2 + $0xc] sm:$0xf] }
  0xf7   : > { %v2504_v5 = vsel %vm4766_vm7, %v2502_v62, %v2503_v16  ;;  %v1068_v20 = vshll.u32 %v5609_v6, 16  ;;  %vm3351_vm1 = vcmask 97280   ;;  %v1235_v51 = vsel %vm4766_vm7, %v4007_v21, %v1234_v10  ;;  %v5645_v21 = vld [vmem:[#allocation2 + $0x40] sm:$0xf]  ;;  %v1142_v62 = vld [vmem:[#allocation2 + $0x90] sm:$0xe] }
  0xf8   : > { %2733 = vrot.lane.b32.xlu0 %v4214_v4, %s4625_s28  ;;  %v1236_v8 = vrot.slane %v1234_v10, 4  ;;  %v1061_v47 = vrot.slane %v1059_v24, 4  ;;  %v1064_v32 = vrot.slane %v1062_v13, 5  ;;  %v1072_v40 = vshrl.u32 %v5609_v6, 16  ;;  %v5642_v16 = vpop.permute.xlu1 %3093 }
  0xf9   : > { %v1070_v42 = vrot.slane %v1068_v20, 5  ;;  %v1078_v28 = vshll.u32 %v5620_v0, 16  ;;  %v4317_v38 = vcombine.low %v2501_v26, %v2504_v5  ;;  %v3296_v54 = vsel %vm3269_vm14, %v4186_v14, %v5454_v45  ;;  %v228_v5 = vld [vmem:[%s4764_s27 + $0x28] sm:$0xf] }
  0xfa   : > { %v5636_v9 = vpop.permute.xlu0 %3159  ;;  %v1238_v11 = vsel %vm4766_vm7, %v1236_v8, %v1237_v58  ;;  %v4179_v55 = vcombine.low %v4518_v3, %v4517_v7  ;;  %2669 = vrot.lane.b32.xlu1 %v4206_v53, %s4626_s29  ;;  %v1065_v50 = vor.u32 %v1064_v32, %v1061_v47  ;;  %v1074_v29 = vrot.slane %v1072_v40, 4  ;;  %v4519_v7 = vld [vmem:[#allocation2 + $0x70] sm:$0xf]  ;;  %v4520_v3 = vld [vmem:[#allocation2 + $0x6c] sm:$0xf] }
  0xfb   : > { %v4215_v22 = vcombine.low %v1235_v51, %v1238_v11  ;;  %v1458_v4 = vshrl.u32 %v4026_v30, 16  ;;  %v5649_v45 = vsel %vm3351_vm1, %v3320_v57, %v5343_v39  ;;  %v1461_v15 = vshll.u32 %v4026_v30, 16 }
  0xfc   : > { %v3275_v41 = vsel %vm3269_vm14, %v4179_v55, %v5505_v27  ;;  %v1066_v14 = vrot.slane %v1065_v50, 4  ;;  %v1075_v53 = vor.u32 %v1074_v29, %v1070_v42  ;;  %v1080_v10 = vrot.slane %v1078_v28, 5  ;;  %v229_v27 = vld [vmem:[%s4764_s27 + $0x2c] sm:$0xf]  ;;  %v5674_v32 = vpop.permute.xlu1 %3095 }
  0xfd   : > { %2735 = vrot.lane.b32.xlu0 %v4215_v22, %s4625_s28  ;;  %v3322_v58 = vsel %vm3318_vm15, %v3275_v41, %v5393_v12  ;;  %v5658_v24 = vsel %vm3318_vm15, %v3296_v54, %v5413_v25  ;;  %v4230_v26 = vcombine.low %v4026_v30, %v5645_v21  ;;  %v4014_v39 = vrot.slane %v1142_v62, 9  ;;  %v1143_v54 = vld [vmem:[#allocation2 + $0x9c] sm:$0xe]  ;;  %v614_v62 = vld [vmem:[#allocation2 + $0x48] sm:$0xf] }
  0xfe   : > { %v1283_v57 = vrot.slane %v5563_v19, 5  ;;  %v5664_v13 = vpop.permute.xlu0 %3237  ;;  %3259 = vrot.lane.b32.xlu1 %v4317_v38, %s4632_s7  ;;  %v1071_v20 = vsel %vm4786_vm11, %v1066_v14, %v1070_v42  ;;  %v1076_v51 = vrot.slane %v1075_v53, 4  ;;  %v1460_v12 = vrot.slane %v1458_v4, 4 }
  0xff   : > { %v1286_v8 = vrot.slane %v5569_v18, 5  ;;  %v1463_v25 = vrot.slane %v1461_v15, 5  ;;  %v3355_v19 = vsel %vm3351_vm1, %v3322_v58, %v5366_v56  ;;  %v339_v42 = vshrl.u32 %v228_v5, 16 }
 0x100   : > { %v1284_v47 = vsel %vm4766_vm7, %v4014_v39, %v1283_v57  ;;  %v1285_v30 = vrot.slane %v1283_v57, 4  ;;  %v1081_v40 = vsel %vm4786_vm11, %v1076_v51, %v1080_v10  ;;  %v342_v28 = vshll.u32 %v228_v5, 16  ;;  %v5689_v57 = vld [vmem:[#allocation2 + $0x44] sm:$0x1]  ;;  %v4042_v51 = vld [vmem:[#allocation2 + $0x9c] sm:$0xf] }
 0x101   : > { %2829 = vrot.lane.b32.xlu0 %v4230_v26, %s4627_s30  ;;  %v347_v38 = vshrl.u32 %v229_v27, 16  ;;  %v4207_v18 = vcombine.low %v1071_v20, %v1081_v40  ;;  %v4187_v55 = vcombine.low %v4520_v3, %v4519_v7  ;;  %v350_v22 = vshll.u32 %v229_v27, 16 }
 0x102   : > { %v1287_v11 = vsel %vm4766_vm7, %v1285_v30, %v1286_v8  ;;  %vm3384_vm2 = vcmask 130048   ;;  %v1471_v56 = vshrl.u32 %v5645_v21, 16  ;;  %v341_v50 = vrot.slane %v339_v42, 7 }
 0x103   : > { %v349_v29 = vrot.slane %v347_v38, 7  ;;  %2671 = vrot.lane.b32.xlu1 %v4207_v18, %s4626_s29  ;;  %v4222_v4 = vcombine.low %v1284_v47, %v1287_v11  ;;  %v4015_v41 = vrot.slane %v1143_v54, 9  ;;  %v1290_v15 = vrot.slane %v5609_v6, 5  ;;  %v5685_v53 = vpop.permute.xlu0 %2649  ;;  %v244_v54 = vld [vmem:[%s4764_s27 + $0x68] sm:$0xf] }
 0x104   : > { %v1293_v14 = vrot.slane %v5620_v0, 5  ;;  %v3388_v10 = vsel %vm3384_vm2, %v3355_v19, %v5514_v60  ;;  %v344_v58 = vor.u32 %v342_v28, %v341_v50  ;;  %v345_v26 = vrot.slane %v341_v50, 4  ;;  %v5695_v0 = vpop.permute.xlu1 %3173  ;;  %v5707_v19 = vld [vmem:[#allocation2 + $0xa0] sm:$0xf] }
 0x105   : > { %v352_v39 = vor.u32 %v350_v22, %v349_v29  ;;  %v3299_v5 = vsel %vm3269_vm14, %v4187_v55, %v5524_v59  ;;  %v1291_v27 = vsel %vm4766_vm7, %v4015_v41, %v1290_v15  ;;  %v1292_v20 = vrot.slane %v1290_v15, 4 }
 0x106   : > { %v1464_v6 = vor.u32 %v1463_v25, %v1460_v12  ;;  %v615_v60 = vsel %vm4780_vm10, %v344_v58, %v614_v62  ;;  %vm3417_vm3 = vcmask 162816   ;;  %v1467_v47 = vshll.u32 %v5645_v21, 16  ;;  %v4070_v62 = vld [vmem:[#allocation2 + $0x3c] sm:$0xe] }
 0x107   : > { %v353_v8 = vsel %vm4795_vm12, %v345_v26, %v352_v39  ;;  %2749 = vrot.lane.b32.xlu1 %v4222_v4, %s4625_s28  ;;  %616 = vst [vmem:[#allocation2 + $0x48] sm:$0xf] %v615_v60  ;;  %v1294_v59 = vsel %vm4766_vm7, %v1292_v20, %v1293_v14  ;;  %v1473_v25 = vrot.slane %v1471_v56, 4  ;;  %v1477_v30 = vshll.u32 %v5689_v57, 16  ;;  %v5722_v55 = vpop.permute.xlu0 %3239 }
 0x108   : > { %617 = vst.msk [vmem:[#allocation2 + $0x4c] sm:$0xf] %vm162_vm0, %v353_v8  ;;  %v1465_v12 = vrot.slane %v1464_v6, 4  ;;  %v4223_v40 = vcombine.low %v1291_v27, %v1294_v59  ;;  %v1469_v42 = vrot.slane %v1467_v47, 5  ;;  %v1650_v28 = vshrl.u32 %v4042_v51, 16 }
 0x109   : > { %v1653_v38 = vshll.u32 %v4042_v51, 16  ;;  %v3386_v18 = vsel %vm3384_vm2, %v5649_v45, %v5489_v46  ;;  %v3338_v11 = vsel %vm3318_vm15, %v3299_v5, %v5440_v31  ;;  %v5717_v7 = vsel %vm3417_vm3, %v3388_v10, %v5530_v35  ;;  %v618_v45 = vld [vmem:[#allocation2 + $0x50] sm:$0x1]  ;;  %v245_v31 = vld [vmem:[%s4764_s27 + $0x6c] sm:$0xf] }
 0x10a   : > { %v3369_v3 = vsel %vm3351_vm1, %v5658_v24, %v5359_v61  ;;  %v1474_v56 = vor.u32 %v1473_v25, %v1469_v42  ;;  %v1479_v50 = vrot.slane %v1477_v30, 5  ;;  %v1663_v46 = vshrl.u32 %v5707_v19, 16 }
 0x10b   : > { %v5726_v22 = vsel %vm3384_vm2, %v3369_v3, %v5565_v48  ;;  %2751 = vrot.lane.b32.xlu1 %v4223_v40, %s4625_s28  ;;  %v1470_v35 = vsel %vm4786_vm11, %v1465_v12, %v1469_v42  ;;  %v4238_v4 = vcombine.low %v4042_v51, %v5707_v19  ;;  %v354_v61 = vrot.slane %v349_v29, 4  ;;  %v670_v12 = vld [vmem:[#allocation2 + $0xa8] sm:$0xf] }
 0x10c   : > { %v475_v24 = vshrl.u32 %v244_v54, 16  ;;  %v1475_v48 = vrot.slane %v1474_v56, 4  ;;  %v1652_v15 = vrot.slane %v1650_v28, 4  ;;  %v1655_v14 = vrot.slane %v1653_v38, 5 }
 0x10d   : > { %v5734_v41 = vpop.permute.xlu1 %3175  ;;  %v478_v10 = vshll.u32 %v244_v54, 16  ;;  %vm3450_vm4 = vcmask 195584   ;;  %v619_v58 = vsel %vm4855_vm13, %v354_v61, %v618_v45  ;;  %v483_v39 = vshrl.u32 %v245_v31, 16  ;;  %v5757_v61 = vld [vmem:[#allocation2 + $0xa4] sm:$0x1] }
 0x10e   : > { %v477_v26 = vrot.slane %v475_v24, 7  ;;  %v4028_v5 = vld [vmem:[#allocation2 + $0x48] sm:$0xf]  ;;  %v1480_v29 = vsel %vm4786_vm11, %v1475_v48, %v1479_v50  ;;  %v3419_v20 = vsel %vm3417_vm3, %v3386_v18, %v5431_v33  ;;  %620 = vst [vmem:[#allocation2 + $0x50] sm:$0x1] %v619_v58  ;;  %v486_v6 = vshll.u32 %v245_v31, 16 }
 0x10f   : > { %v5738_v27 = vld [vmem:[#allocation2 + $0x4c] sm:$0xf]  ;;  %v4086_v51 = vrot.slane %v4070_v62, 9  ;;  %v1482_v8 = vshrl.u32 %v4028_v5, 16  ;;  %v1485_v60 = vshll.u32 %v4028_v5, 16  ;;  %2845 = vrot.lane.b32.xlu1 %v4238_v4, %s4627_s30  ;;  %v5749_v30 = vpop.permute.xlu0 %2651  ;;  %v4246_v40 = vcombine.low %v1470_v35, %v1480_v29 }
 0x110   : > { %v1495_v47 = vshrl.u32 %v5738_v27, 16  ;;  %v4231_v59 = vcombine.low %v4028_v5, %v5738_v27  ;;  %v1491_v42 = vshll.u32 %v5738_v27, 16  ;;  %v480_v33 = vor.u32 %v478_v10, %v477_v26 }
 0x111   : > { %v5747_v25 = vpop.permute.xlu1 %3253  ;;  %v481_v28 = vrot.slane %v477_v26, 4  ;;  %v1484_v38 = vrot.slane %v1482_v8, 4  ;;  %v1487_v54 = vrot.slane %v1485_v60, 5  ;;  %v485_v3 = vrot.slane %v483_v39, 7  ;;  %v4071_v8 = vld [vmem:[#allocation2 + $0x48] sm:$0xe] }
 0x112   : > { %2831 = vrot.lane.b32.xlu0 %v4231_v59, %s4627_s30  ;;  %v1497_v18 = vrot.slane %v1495_v47, 4  ;;  %v1493_v56 = vrot.slane %v1491_v42, 5  ;;  %v671_v50 = vsel %vm4780_vm10, %v480_v33, %v670_v12  ;;  %v1839_v45 = vrot.slane %v5645_v21, 5 }
 0x113   : > { %v1842_v31 = vrot.slane %v5689_v57, 5  ;;  %v1488_v4 = vor.u32 %v1487_v54, %v1484_v38  ;;  %v488_v35 = vor.u32 %v486_v6, %v485_v3  ;;  %672 = vst [vmem:[#allocation2 + $0xa8] sm:$0xf] %v671_v50  ;;  %v1656_v24 = vor.u32 %v1655_v14, %v1652_v15  ;;  %v5771_v29 = vpop.permute.xlu0 %2729  ;;  %v674_v38 = vld [vmem:[#allocation2 + $0xb0] sm:$0x1] }
 0x114   : > { %v1659_v62 = vshll.u32 %v5707_v19, 16  ;;  %v3371_v48 = vsel %vm3351_vm1, %v3338_v11, %v5373_v52  ;;  %v1498_v10 = vor.u32 %v1497_v18, %v1493_v56  ;;  %v1841_v58 = vrot.slane %v1839_v45, 4 }
 0x115   : > { %v1665_v26 = vrot.slane %v1663_v46, 4  ;;  %v5762_v39 = vpop.permute.xlu1 %2665  ;;  %v4055_v21 = vld [vmem:[#allocation2 + $0x50] sm:$0x1]  ;;  %v1489_v57 = vrot.slane %v1488_v4, 4  ;;  %v489_v5 = vsel %vm4795_vm12, %v481_v28, %v488_v35  ;;  %v5769_v15 = vsel %vm4766_vm7, %v4086_v51, %v1839_v45 }
 0x116   : > { %2909 = vrot.lane.b32.xlu0 %v4246_v40, %s4629_s4  ;;  %v1661_v14 = vrot.slane %v1659_v62, 5  ;;  %v1499_v52 = vrot.slane %v1498_v10, 4  ;;  %v1501_v11 = vshll.u32 %v4055_v21, 16  ;;  %673 = vst.msk [vmem:[#allocation2 + $0xac] sm:$0xf] %vm162_vm0, %v489_v5  ;;  %v1843_v46 = vsel %vm4766_vm7, %v1841_v58, %v1842_v31 }
 0x117   : > { %v1669_v6 = vshll.u32 %v5757_v61, 16  ;;  %v3452_v60 = vsel %vm3450_vm4, %v3419_v20, %v5571_v37  ;;  %v3404_v51 = vsel %vm3384_vm2, %v3371_v48, %v5580_v49  ;;  %v1657_v47 = vrot.slane %v1656_v24, 4  ;;  %v5800_v35 = vpop.permute.xlu0 %2731 }
 0x118   : > { %v1666_v59 = vor.u32 %v1665_v26, %v1661_v14  ;;  %v1494_v12 = vsel %vm4786_vm11, %v1489_v57, %v1493_v56  ;;  %v1503_v40 = vrot.slane %v1501_v11, 5  ;;  %v5786_v42 = vsel %vm3450_vm4, %v5717_v7, %v5587_v44 }
 0x119   : > { %v5790_v33 = vsel %vm3417_vm3, %v3404_v51, %v5611_v17  ;;  %v4262_v37 = vcombine.low %v5769_v15, %v1843_v46  ;;  %v1671_v28 = vrot.slane %v1669_v6, 5  ;;  %v4087_v49 = vrot.slane %v4071_v8, 9  ;;  %v5796_v44 = vpop.permute.xlu1 %3255  ;;  %v5823_v15 = vld [vmem:[#allocation2 + $0x4c] sm:$0xf]  ;;  %v4078_v6 = vld [vmem:[#allocation2 + $0x9c] sm:$0xe] }
 0x11a   : > { %v1667_v20 = vrot.slane %v1666_v59, 4  ;;  %v1504_v54 = vsel %vm4786_vm11, %v1499_v52, %v1503_v40  ;;  %v4044_v18 = vld [vmem:[#allocation2 + $0xa8] sm:$0xf]  ;;  %v1846_v56 = vrot.slane %v5738_v27, 5  ;;  %v1849_v50 = vrot.slane %v4055_v21, 5 }
 0x11b   : > { %v490_v45 = vrot.slane %v485_v3, 4  ;;  %v4247_v7 = vcombine.low %v1494_v12, %v1504_v54  ;;  %v1674_v31 = vshrl.u32 %v4044_v18, 16  ;;  %v1677_v17 = vshll.u32 %v4044_v18, 16  ;;  %v5809_v3 = vld [vmem:[#allocation2 + $0x48] sm:$0xf] }
 0x11c   : > { %v1662_v4 = vsel %vm4786_vm11, %v1657_v47, %v1661_v14  ;;  %vm3483_vm5 = vcmask 228352   ;;  %v5805_v24 = vsel %vm3417_vm3, %v5726_v22, %v5472_v23  ;;  %v1848_v62 = vrot.slane %v1846_v56, 4  ;;  %v230_v12 = vld [vmem:[%s4764_s27 + $0x30] sm:$0xf]  ;;  %v231_v40 = vld [vmem:[%s4764_s27 + $0x34] sm:$0xf] }
 0x11d   : > { %v675_v27 = vsel %vm4855_vm13, %v490_v45, %v674_v38  ;;  %2911 = vrot.lane.b32.xlu0 %v4247_v7, %s4629_s4  ;;  %v5812_v48 = vld [vmem:[#allocation2 + $0xac] sm:$0xf]  ;;  %v1676_v10 = vrot.slane %v1674_v31, 4  ;;  %v1679_v58 = vrot.slane %v1677_v17, 5  ;;  %v1672_v26 = vsel %vm4786_vm11, %v1667_v20, %v1671_v28  ;;  %v5832_v20 = vpop.permute.xlu1 %2667  ;;  %v5840_v38 = vpop.permute.xlu0 %2825  ;;  %v4079_v17 = vld [vmem:[#allocation2 + $0xa8] sm:$0xe] }
 0x11e   : > { %v1847_v21 = vsel %vm4766_vm7, %v4087_v49, %v1846_v56  ;;  %676 = vst [vmem:[#allocation2 + $0xb0] sm:$0x1] %v675_v27  ;;  %v1687_v23 = vshrl.u32 %v5812_v48, 16  ;;  %v4239_v22 = vcombine.low %v4044_v18, %v5812_v48  ;;  %v1850_v57 = vsel %vm4766_vm7, %v1848_v62, %v1849_v50 }
 0x11f   : > { %v1683_v5 = vshll.u32 %v5812_v48, 16  ;;  %v3485_v14 = vsel %vm3483_vm5, %v3452_v60, %v5613_v2  ;;  %v1680_v52 = vor.u32 %v1679_v58, %v1676_v10  ;;  %v2070_v11 = vshrl.u32 %v5809_v3, 16 }
 0x120   : > { %v2073_v46 = vshll.u32 %v5809_v3, 16  ;;  %2847 = vrot.lane.b32.xlu1 %v4239_v22, %s4627_s30  ;;  %v4254_v8 = vcombine.low %v1662_v4, %v1672_v26  ;;  %v4263_v51 = vcombine.low %v1847_v21, %v1850_v57  ;;  %v1689_v59 = vrot.slane %v1687_v23, 4  ;;  %v621_v23 = vld [vmem:[#allocation2 + $0x54] sm:$0xf] }
 0x121   : > { %v1685_v47 = vrot.slane %v1683_v5, 5  ;;  %2989 = vrot.lane.b32.xlu0 %v4262_v37, %s4628_s3  ;;  %v1681_v28 = vrot.slane %v1680_v52, 4  ;;  %v5835_v2 = vrot.slane %v2070_v11, 4  ;;  %v2083_v60 = vshrl.u32 %v5823_v15, 16  ;;  %v5861_v5 = vpop.permute.xlu1 %2745 }
 0x122   : > { %v4278_v49 = vcombine.low %v5809_v3, %v5823_v15  ;;  %v4094_v18 = vrot.slane %v4078_v6, 9  ;;  %v1895_v56 = vrot.slane %v5707_v19, 5  ;;  %v1898_v50 = vrot.slane %v5757_v61, 5  ;;  %v4502_v57 = vld [vmem:[%s6725_s1 + $0x10] ss:$0 sps:$4 sm:$0x33]  }
 0x123   : > { %v1690_v54 = vor.u32 %v1689_v59, %v1685_v47  ;;  %v5844_v45 = vrot.slane %v2073_v46, 5  ;;  %v356_v7 = vshrl.u32 %v230_v12, 16  ;;  %v359_v37 = vshll.u32 %v230_v12, 16 }
 0x124   : > { %v364_v31 = vshrl.u32 %v231_v40, 16  ;;  %2925 = vrot.lane.b32.xlu1 %v4254_v8, %s4629_s4  ;;  %v1686_v62 = vsel %vm4786_vm11, %v1681_v28, %v1685_v47  ;;  %v1897_v3 = vrot.slane %v1895_v56, 4  ;;  %v367_v10 = vshll.u32 %v231_v40, 16  ;;  %v5879_v28 = vld [vmem:[#allocation2 + $0x50] sm:$0x1] }
 0x125   : > { %v4063_v4 = vld [vmem:[#allocation2 + $0xb0] sm:$0x1]  ;;  %v1691_v27 = vrot.slane %v1690_v54, 4  ;;  %2991 = vrot.lane.b32.xlu0 %v4263_v51, %s4628_s3  ;;  %v358_v58 = vrot.slane %v356_v7, 7  ;;  %vm3516_vm6 = vcmask 261120   ;;  %v1896_v26 = vsel %vm4766_vm7, %v4094_v18, %v1895_v56 }
 0x126   : > { %v1693_v19 = vshll.u32 %v4063_v4, 16  ;;  %v5850_v61 = vrot.slane %v364_v31, 7  ;;  %v1899_v21 = vsel %vm4766_vm7, %v1897_v3, %v1898_v50  ;;  %v3518_v22 = vsel %vm3516_vm6, %v3485_v14, %v5664_v13  ;;  %v5899_v31 = vld [vmem:[#allocation2 + $0xac] sm:$0xf]  ;;  %v246_v3 = vld [vmem:[%s4764_s27 + $0x70] sm:$0xf] }
 0x127   : > { %vm3569_vm8 = vcmask 293888   ;;  %v361_v11 = vor.u32 %v359_v37, %v358_v58  ;;  %v362_v46 = vrot.slane %v358_v58, 4  ;;  %v4095_v6 = vrot.slane %v4079_v17, 9 }
 0x128   : > { %v1695_v52 = vrot.slane %v1693_v19, 5  ;;  %4373 = vmatprep.mubr.msk.bf16.mxu0 %vm3569_vm8, %v3518_v22  ;;  %v3468_v51 = vsel %vm3450_vm4, %v5805_v24, %v5642_v16  ;;  %v369_v13 = vor.u32 %v367_v10, %v5850_v61  ;;  %v1902_v14 = vrot.slane %v5812_v48, 5  ;;  %v5881_v16 = vld [vmem:[#allocation2 + $0xa8] sm:$0xf] }
 0x129   : > { %v5864_v8 = vpop.permute.xlu0 %2827  ;;  %v1905_v47 = vrot.slane %v4063_v4, 5  ;;  %v3487_v12 = vsel %vm3483_vm5, %v5786_v42, %v5636_v9  ;;  %3085 = vrot.lane.b32.xlu0 %v4278_v49, %s4630_s5  ;;  %v622_v40 = vsel %vm4780_vm10, %v361_v11, %v621_v23  ;;  %vm3602_vm9 = vcmask 1041408  }
 0x12a   : > { %v1696_v59 = vsel %vm4786_vm11, %v1691_v27, %v1695_v52  ;;  %v4270_v48 = vcombine.low %v1896_v26, %v1899_v21  ;;  %v370_v54 = vsel %vm4795_vm12, %v362_v46, %v369_v13  ;;  %623 = vst [vmem:[#allocation2 + $0x54] sm:$0xf] %v622_v40  ;;  %v1904_v18 = vrot.slane %v1902_v14, 4  ;;  %4411 = vmatprep.subr.msk.bf16.mxu0 %vm3602_vm9, %v4502_v57  ;;  %v247_v21 = vld [vmem:[%s4764_s27 + $0x74] sm:$0xf] }
 0x12b   : > { %v4255_v24 = vcombine.low %v1686_v62, %v1696_v59  ;;  %4412 = vmatprep.subr.msk.bf16.mxu1 %vm3602_vm9, %v4502_v57  ;;  %624 = vst.msk [vmem:[#allocation2 + $0x58] sm:$0xf] %vm162_vm0, %v370_v54  ;;  %v1903_v9 = vsel %vm4766_vm7, %v4095_v6, %v1902_v14  ;;  %v2076_v42 = vor.u32 %v5844_v45, %v5835_v2  ;;  %v2079_v49 = vshll.u32 %v5823_v15, 16  ;;  %v5903_v2 = vpop.permute.xlu1 %2747 }
 0x12c   : > { %v2085_v56 = vrot.slane %v2083_v60, 4  ;;  %v1906_v7 = vsel %vm4766_vm7, %v1904_v18, %v1905_v47  ;;  %v2089_v37 = vshll.u32 %v5879_v28, 16  ;;  %v2262_v17 = vshrl.u32 %v5881_v16, 16 }
 0x12d   : > { %v5893_v50 = vpop.permute.xlu0 %2905  ;;  %2927 = vrot.lane.b32.xlu1 %v4255_v24, %s4629_s4  ;;  %v2265_v4 = vshll.u32 %v5881_v16, 16  ;;  %v5908_v60 = vsel %vm3450_vm4, %v5790_v33, %v5674_v32  ;;  %v3501_v45 = vsel %vm3483_vm5, %v3468_v51, %v5695_v0  ;;  %v2077_v62 = vrot.slane %v2076_v42, 4  ;;  %v625_v0 = vld [vmem:[#allocation2 + $0x5c] sm:$0x1] }
 0x12e   : > { %v2081_v27 = vrot.slane %v2079_v49, 5  ;;  %v4271_v10 = vcombine.low %v1903_v9, %v1906_v7  ;;  %v2091_v19 = vrot.slane %v2089_v37, 5  ;;  %v5913_v58 = vrot.slane %v2262_v17, 4  ;;  %v677_v9 = vld [vmem:[#allocation2 + $0xb4] sm:$0xf] }
 0x12f   : > { %v5915_v26 = vrot.slane %v2265_v4, 5  ;;  %v4286_v32 = vcombine.low %v5881_v16, %v5899_v31  ;;  %v3604_v33 = vsel %vm3602_vm9, %v4502_v57, 0  ;;  %v3520_v52 = vsel %vm3516_vm6, %v3487_v12, %v5722_v55  ;;  %v5936_v12 = vpop.permute.xlu1 %2841  ;;  %v4150_v37 = vld [vmem:[#allocation2 + $0x48] sm:$0xe] }
 0x130   : > { %v2082_v23 = vsel %vm4786_vm11, %v2077_v62, %v2081_v27  ;;  %v2086_v22 = vor.u32 %v2085_v56, %v2081_v27  ;;  %4372 = vmatpush3.bf16.msra.mxu0 %v3604_v33  ;;  %v371_v11 = vrot.slane %v5850_v61, 4  ;;  %v492_v46 = vshrl.u32 %v246_v3, 16  ;;  %4410 = vmatpush3.bf16.msra.mxu1 %v3604_v33  ;;  %v5950_v27 = vld [vmem:[#allocation2 + $0x18] sm:$0xf] }
 0x131   : > { %3005 = vrot.lane.b32.xlu1 %v4270_v48, %s4628_s3  ;;  %v495_v6 = vshll.u32 %v246_v3, 16  ;;  %v4108_v51 = vld [vmem:[#allocation2 + $0x54] sm:$0xf]  ;;  %v500_v14 = vshrl.u32 %v247_v21, 16  ;;  %v503_v47 = vshll.u32 %v247_v21, 16  ;;  %v3534_v59 = vsel %vm3516_vm6, %v3501_v45, %v5747_v25 }
 0x132   : > { %v2087_v13 = vrot.slane %v2086_v22, 4  ;;  %v5929_v57 = vpop.permute.xlu0 %2907  ;;  %v5931_v40 = vld [vmem:[#allocation2 + $0x58] sm:$0xf]  ;;  %v2094_v16 = vshrl.u32 %v4108_v51, 16  ;;  %v2097_v24 = vshll.u32 %v4108_v51, 16  ;;  %v626_v55 = vsel %vm4855_vm13, %v371_v11, %v625_v0  ;;  %4389 = vmatprep.mubr.msk.bf16.mxu1 %vm3569_vm8, %v3534_v59 }
 0x133   : > { %v494_v61 = vrot.slane %v492_v46, 7  ;;  %v2107_v48 = vshrl.u32 %v5931_v40, 16  ;;  %v4279_v54 = vcombine.low %v4108_v51, %v5931_v40  ;;  %627 = vst [vmem:[#allocation2 + $0x5c] sm:$0x1] %v626_v55  ;;  %v2103_v18 = vshll.u32 %v5931_v40, 16  ;;  %4374 = vmatmul.mubr.msk.bf16.vlgmr.msra.gmra.mrb[0].mxu0 %vm3569_vm8, %v3520_v52 }
 0x134   : > { %v2092_v25 = vsel %vm4786_vm11, %v2087_v13, %v2091_v19  ;;  %v2096_v42 = vrot.slane %v2094_v16, 4  ;;  %v2099_v49 = vrot.slane %v2097_v24, 5  ;;  %v5948_v62 = vrot.slane %v500_v14, 7  ;;  %v5952_v3 = vld [vmem:[#allocation2 + $0x1c] sm:$0xf] }
 0x135   : > { %3007 = vrot.lane.b32.xlu1 %v4271_v10, %s4628_s3  ;;  %v4294_v56 = vcombine.low %v2082_v23, %v2092_v25  ;;  %v497_v7 = vor.u32 %v495_v6, %v494_v61  ;;  %3087 = vrot.lane.b32.xlu0 %v4279_v54, %s4630_s5  ;;  %v5946_v17 = vrot.slane %v2103_v18, 5  ;;  %v2109_v4 = vrot.slane %v2107_v48, 4  ;;  %v5969_v13 = vld [vmem:[#allocation2 + $0xb0] sm:$0x1]  ;;  %v5973_v59 = vpop.permute.xlu1 %2843 }
 0x136   : > { %v498_v45 = vrot.slane %v494_v61, 4  ;;  %v4180_v19 = vcombine.low %v5950_v27, %v5952_v3  ;;  %v2275_v10 = vshrl.u32 %v5899_v31, 16  ;;  %v2100_v21 = vor.u32 %v2099_v49, %v2096_v42  ;;  %v5959_v22 = vpop.permute.xlu0 %2985  ;;  %v4158_v27 = vld [vmem:[#allocation2 + $0xa8] sm:$0xe] }
 0x137   : > { %v678_v23 = vsel %vm4780_vm10, %v497_v7, %v677_v9  ;;  %v2110_v33 = vor.u32 %v2109_v4, %v5946_v17  ;;  %v505_v0 = vor.u32 %v503_v47, %v5948_v62  ;;  %v4166_v52 = vrot.slane %v4150_v37, 9  ;;  %v5978_v47 = vld [vmem:[#allocation2 + $0x24] sm:$0xf] }
 0x138   : > { %679 = vst [vmem:[#allocation2 + $0xb4] sm:$0xf] %v678_v23  ;;  %v2451_v11 = vrot.slane %v5823_v15, 5  ;;  %v3503_v46 = vsel %vm3483_vm5, %v5908_v60, %v5734_v41  ;;  %v2101_v6 = vrot.slane %v2100_v21, 4  ;;  %v2454_v51 = vrot.slane %v5879_v28, 5 }
 0x139   : > { %3101 = vrot.lane.b32.xlu1 %v4286_v32, %s4630_s5  ;;  %v2268_v14 = vor.u32 %v5915_v26, %v5913_v58  ;;  %3165 = vrot.lane.b32.xlu0 %v4294_v56, %s4631_s6  ;;  %v506_v15 = vsel %vm4795_vm12, %v498_v45, %v505_v0  ;;  %v5980_v41 = vld [vmem:[#allocation2 + $0x28] sm:$0xf]  ;;  %v5988_v26 = vld [vmem:[#allocation2 + $0x4c] sm:$0xf]  ;;  %v2111_v24 = vrot.slane %v2110_v33, 4  ;;  %v2271_v61 = vshll.u32 %v5899_v31, 16 }
 0x13a   : > { %v4181_v60 = vcombine.low %v5978_v47, %v5980_v41  ;;  %v5986_v28 = vsel %vm4766_vm7, %v4166_v52, %v2451_v11  ;;  %v2453_v32 = vrot.slane %v2451_v11, 4  ;;  %v707_v58 = vld [vmem:[#allocation2 + $0x48] sm:$0xf]  ;;  %v5990_v16 = vld [vmem:[#allocation2 + $0x5c] sm:$0x1]  ;;  %v2277_v48 = vrot.slane %v2275_v10, 4  ;;  %v6004_v37 = vpop.permute.xlu0 %2987  ;;  %v6013_v11 = vpop.permute.xlu1 %2921 }
 0x13b   : > { %680 = vst.msk [vmem:[#allocation2 + $0xb8] sm:$0xf] %vm162_vm0, %v506_v15  ;;  %v2269_v55 = vrot.slane %v2268_v14, 4  ;;  %v2106_v54 = vsel %vm4786_vm11, %v2101_v6, %v5946_v17  ;;  %v2113_v25 = vshll.u32 %v5990_v16, 16  ;;  %v2281_v9 = vshll.u32 %v5969_v13, 16 }
 0x13c   : > { %v2455_v18 = vsel %vm4766_vm7, %v2453_v32, %v2454_v51  ;;  %v2273_v49 = vrot.slane %v2271_v61, 5  ;;  %v3536_v56 = vsel %vm3516_vm6, %v3503_v46, %v5796_v44  ;;  %v891_v7 = vshrl.u32 %v707_v58, 16  ;;  %v6010_v0 = vld [vmem:[#allocation2 + $0x50] sm:$0x1]  ;;  %v6072_v41 = vld [vmem:[#allocation2 + $0x58] sm:$0xf] }
 0x13d   : > { %v4310_v42 = vcombine.low %v5986_v28, %v2455_v18  ;;  %v2115_v4 = vrot.slane %v2113_v25, 5  ;;  %v2283_v45 = vrot.slane %v2281_v9, 5  ;;  %v894_v10 = vshll.u32 %v707_v58, 16  ;;  %4390 = vmatmul.mubr.msk.bf16.vlgmr.msra.gmra.mrb[0].mxu1 %vm3569_vm8, %v3536_v56 }
 0x13e   : > { %v900_v17 = vshll.u32 %v5988_v26, 16  ;;  %v2274_v23 = vsel %vm4786_vm11, %v2269_v55, %v2273_v49  ;;  %v2278_v33 = vor.u32 %v2277_v48, %v2273_v49  ;;  %v893_v52 = vrot.slane %v891_v7, 4  ;;  %v6025_v56 = vpop.permute.xlu0 %3081  ;;  %v4525_v7 = vld [vmem:[#allocation2 + $0x78] sm:$0xf] }
 0x13f   : > { %v4124_v21 = vld [vmem:[#allocation2 + $0xb4] sm:$0xf]  ;;  %v904_v44 = vshrl.u32 %v5988_v26, 16  ;;  %v2116_v46 = vsel %vm4786_vm11, %v2111_v24, %v2115_v4  ;;  %v896_v14 = vrot.slane %v894_v10, 5  ;;  %v910_v18 = vshll.u32 %v6010_v0, 16 }
 0x140   : > { %v2286_v6 = vshrl.u32 %v4124_v21, 16  ;;  %v2289_v51 = vshll.u32 %v4124_v21, 16  ;;  %v4295_v15 = vcombine.low %v2106_v54, %v2116_v46  ;;  %v2279_v28 = vrot.slane %v2278_v33, 4  ;;  %v4526_v4 = vld [vmem:[#allocation2 + $0x7c] sm:$0xf] }
 0x141   : > { %v902_v32 = vrot.slane %v900_v17, 5  ;;  %v906_v58 = vrot.slane %v904_v44, 4  ;;  %v897_v25 = vor.u32 %v896_v14, %v893_v52  ;;  %v4188_v10 = vcombine.low %v4525_v7, %v4526_v4  ;;  %v681_v44 = vld [vmem:[#allocation2 + $0xbc] sm:$0x1]  ;;  %v4151_v14 = vld [vmem:[#allocation2 + $0x54] sm:$0xe] }
 0x142   : > { %v6017_v61 = vld [vmem:[#allocation2 + $0xb8] sm:$0xf]  ;;  %v2288_v55 = vrot.slane %v2286_v6, 4  ;;  %v2291_v48 = vrot.slane %v2289_v51, 5  ;;  %3167 = vrot.lane.b32.xlu0 %v4295_v15, %s4631_s6  ;;  %v2284_v49 = vsel %vm4786_vm11, %v2279_v28, %v2283_v45  ;;  %v912_v52 = vrot.slane %v910_v18, 5  ;;  %v6030_v45 = vpop.permute.xlu1 %2923 }
 0x143   : > { %v2299_v9 = vshrl.u32 %v6017_v61, 16  ;;  %v4287_v24 = vcombine.low %v4124_v21, %v6017_v61  ;;  %v907_v54 = vor.u32 %v906_v58, %v902_v32  ;;  %v4302_v17 = vcombine.low %v2274_v23, %v2284_v49  ;;  %v709_v18 = vld [vmem:[#allocation2 + $0x54] sm:$0xf]  ;;  %v6086_v7 = vld [vmem:[#allocation2 + $0x5c] sm:$0x1] }
 0x144   : > { %v898_v33 = vrot.slane %v897_v25, 4  ;;  %v507_v6 = vrot.slane %v5948_v62, 4  ;;  %v2292_v51 = vor.u32 %v2291_v48, %v2288_v55  ;;  %v2295_v21 = vshll.u32 %v6017_v61, 16  ;;  %v4159_v63 = vld [vmem:[#allocation2 + $0xb4] sm:$0xe] }
 0x145   : > { %3103 = vrot.lane.b32.xlu1 %v4287_v24, %s4630_s5  ;;  %v908_v46 = vrot.slane %v907_v54, 4  ;;  %v2301_v28 = vrot.slane %v2299_v9, 4  ;;  %v3278_v55 = vsel %vm3269_vm14, %v4180_v19, %v5685_v53  ;;  %v4167_v48 = vrot.slane %v4151_v14, 9 }
 0x146   : > { %v903_v15 = vsel %vm4786_vm11, %v898_v33, %v902_v32  ;;  %3245 = vrot.lane.b32.xlu0 %v4310_v42, %s4632_s7  ;;  %v682_v58 = vsel %vm4855_vm13, %v507_v6, %v681_v44  ;;  %v6039_v25 = vrot.slane %v2292_v51, 4  ;;  %v6041_v62 = vrot.slane %v2295_v21, 5 }
 0x147   : > { %v913_v23 = vsel %vm4786_vm11, %v908_v46, %v912_v52  ;;  %683 = vst [vmem:[#allocation2 + $0xbc] sm:$0x1] %v682_v58  ;;  %v2458_v42 = vrot.slane %v5931_v40, 5  ;;  %v6054_v9 = vsel %vm3269_vm14, %v4181_v60, %v5749_v30  ;;  %v6058_v24 = vsel %vm3269_vm14, %v4188_v10, %v5762_v39  ;;  %v6079_v60 = vld [vmem:[#allocation2 + $0x84] sm:$0xf] }
 0x148   : > { %v4200_v32 = vcombine.low %v903_v15, %v913_v23  ;;  %v6063_v53 = vsel %vm3318_vm15, %v3278_v55, %v5771_v29  ;;  %v2461_v40 = vrot.slane %v5990_v16, 5  ;;  %v2302_v30 = vor.u32 %v2301_v28, %v6041_v62  ;;  %v6081_v16 = vld [vmem:[#allocation2 + $0x88] sm:$0xf]  ;;  %v6098_v58 = vld [vmem:[#allocation2 + $0xb0] sm:$0x1] }
 0x149   : > { %3181 = vrot.lane.b32.xlu1 %v4302_v17, %s4631_s6  ;;  %v6066_v3 = vpop.permute.xlu0 %3083  ;;  %v2459_v47 = vsel %vm4766_vm7, %v4167_v48, %v2458_v42  ;;  %v2460_v39 = vrot.slane %v2458_v42, 4  ;;  %v2298_v29 = vsel %vm4786_vm11, %v6039_v25, %v6041_v62  ;;  %v2507_v54 = vrot.slane %v5899_v31, 5  ;;  %v723_v10 = vld [vmem:[#allocation2 + $0xa8] sm:$0xf]  ;;  %v6088_v17 = vpop.permute.xlu1 %3001  ;;  %v6095_v31 = vld [vmem:[#allocation2 + $0xac] sm:$0xf] }
 0x14a   : > { %2657 = vrot.lane.b32.xlu0 %v4200_v32, %s4626_s29  ;;  %v915_v4 = vshrl.u32 %v709_v18, 16  ;;  %v4174_v52 = vrot.slane %v4158_v27, 9  ;;  %v2510_v44 = vrot.slane %v5969_v13, 5  ;;  %v918_v46 = vshll.u32 %v709_v18, 16 }
 0x14b   : > { %v2462_v33 = vsel %vm4766_vm7, %v2460_v39, %v2461_v40  ;;  %v924_v21 = vshll.u32 %v6072_v41, 16  ;;  %v928_v14 = vshrl.u32 %v6072_v41, 16  ;;  %v2303_v15 = vrot.slane %v2302_v30, 4 }
 0x14c   : > { %v4311_v6 = vcombine.low %v2459_v47, %v2462_v33  ;;  %v917_v51 = vrot.slane %v915_v4, 4  ;;  %v920_v28 = vrot.slane %v918_v46, 5  ;;  %v934_v23 = vshll.u32 %v6086_v7, 16 }
 0x14d   : > { %v1083_v25 = vshrl.u32 %v723_v10, 16  ;;  %v2509_v13 = vrot.slane %v2507_v54, 4  ;;  %v926_v55 = vrot.slane %v924_v21, 5  ;;  %v930_v32 = vrot.slane %v928_v14, 4  ;;  %v6103_v42 = vpop.permute.xlu0 %3161  ;;  %v6108_v46 = vpop.permute.xlu1 %3003 }
 0x14e   : > { %v6100_v62 = vld [vmem:[#allocation2 + $0xbc] sm:$0x1]  ;;  %3247 = vrot.lane.b32.xlu0 %v4311_v6, %s4632_s7  ;;  %v1086_v48 = vshll.u32 %v723_v10, 16  ;;  %v921_v40 = vor.u32 %v920_v28, %v917_v51  ;;  %v936_v27 = vrot.slane %v934_v23, 5  ;;  %v1092_v4 = vshll.u32 %v6095_v31, 16 }
 0x14f   : > { %v2305_v18 = vshll.u32 %v6100_v62, 16  ;;  %v1085_v30 = vrot.slane %v1083_v25, 4  ;;  %v931_v47 = vor.u32 %v930_v32, %v926_v55  ;;  %v1096_v33 = vshrl.u32 %v6095_v31, 16  ;;  %v1136_v23 = vld [vmem:[#allocation2 + $0x48] sm:$0xe] }
 0x150   : > { %v1088_v39 = vrot.slane %v1086_v48, 5  ;;  %v2508_v21 = vsel %vm4766_vm7, %v4174_v52, %v2507_v54  ;;  %v922_v10 = vrot.slane %v921_v40, 4  ;;  %v1102_v14 = vshll.u32 %v6098_v58, 16 }
 0x151   : > { %v2307_v6 = vrot.slane %v2305_v18, 5  ;;  %v932_v19 = vrot.slane %v931_v47, 4  ;;  %v1094_v51 = vrot.slane %v1092_v4, 5  ;;  %v1098_v28 = vrot.slane %v1096_v33, 4 }
 0x152   : > { %v1089_v49 = vor.u32 %v1088_v39, %v1085_v30  ;;  %v2511_v32 = vsel %vm4766_vm7, %v2509_v13, %v2510_v44  ;;  %v927_v48 = vsel %vm4786_vm11, %v922_v10, %v926_v55  ;;  %v1104_v18 = vrot.slane %v1102_v14, 5  ;;  %v6121_v47 = vpop.permute.xlu0 %3163 }
 0x153   : > { %v2308_v25 = vsel %vm4786_vm11, %v2303_v15, %v2307_v6  ;;  %v937_v52 = vsel %vm4786_vm11, %v932_v19, %v936_v27  ;;  %v1099_v30 = vor.u32 %v1098_v28, %v1094_v51  ;;  %v6126_v15 = vsel %vm3318_vm15, %v6054_v9, %v5800_v35  ;;  %v6131_v27 = vpop.permute.xlu1 %3097  ;;  %v725_v6 = vld [vmem:[#allocation2 + $0xb4] sm:$0xf] }
 0x154   : > { %v4303_v54 = vcombine.low %v2298_v29, %v2308_v25  ;;  %v1090_v40 = vrot.slane %v1089_v49, 4  ;;  %v4201_v39 = vcombine.low %v927_v48, %v937_v52  ;;  %v4008_v44 = vrot.slane %v1136_v23, 9  ;;  %v1137_v49 = vld [vmem:[#allocation2 + $0x54] sm:$0xe]  ;;  %v6160_v23 = vld [vmem:[#allocation2 + $0xbc] sm:$0x1] }
 0x155   : > { %v1241_v13 = vrot.slane %v5988_v26, 5  ;;  %v4318_v55 = vcombine.low %v2508_v21, %v2511_v32  ;;  %v1100_v29 = vrot.slane %v1099_v30, 4  ;;  %v4175_v4 = vrot.slane %v4159_v63, 9 }
 0x156   : > { %3183 = vrot.lane.b32.xlu1 %v4303_v54, %s4631_s6  ;;  %v2514_v19 = vrot.slane %v6017_v61, 5  ;;  %2659 = vrot.lane.b32.xlu0 %v4201_v39, %s4626_s29  ;;  %v1095_v35 = vsel %vm4786_vm11, %v1090_v40, %v1094_v51  ;;  %v2517_v26 = vrot.slane %v6100_v62, 5  ;;  %v6741_v63 = vcombine.low %v6079_v60, %v6081_v16  ;;  %v6158_v16 = vld [vmem:[#allocation2 + $0xb8] sm:$0xf]  ;;  %v6164_v32 = vpop.permute.xlu0 %3241  ;;  %v4030_v39 = vld [vmem:[#allocation2 + $0x54] sm:$0xf] }
 0x157   : > { %v1242_v9 = vsel %vm4766_vm7, %v4008_v44, %v1241_v13  ;;  %v1243_v33 = vrot.slane %v1241_v13, 4  ;;  %v6147_v21 = vsel %vm3351_vm1, %v6063_v53, %v5840_v38  ;;  %v1105_v10 = vsel %vm4786_vm11, %v1100_v29, %v1104_v18  ;;  %v6174_v44 = vpop.permute.xlu1 %3099 }
 0x158   : > { %v3305_v61 = vsel %vm3269_vm14, %v6741_v63, %v5832_v20  ;;  %v2516_v14 = vrot.slane %v2514_v19, 4  ;;  %v6742_v51 = vrot.slane %v6010_v0, 5  ;;  %v2515_v28 = vsel %vm4766_vm7, %v4175_v4, %v2514_v19  ;;  %v6182_v19 = vld [vmem:[#allocation2 + $0x58] sm:$0xf] }
 0x159   : > { %v4009_v60 = vrot.slane %v1137_v49, 9  ;;  %v1248_v20 = vrot.slane %v6072_v41, 5  ;;  %v4208_v38 = vcombine.low %v1095_v35, %v1105_v10  ;;  %v1251_v25 = vrot.slane %v6086_v7, 5  ;;  %v1144_v49 = vld [vmem:[#allocation2 + $0xa8] sm:$0xe] }
 0x15a   : > { %v1245_v62 = vsel %vm4766_vm7, %v1243_v33, %v6742_v51  ;;  %3261 = vrot.lane.b32.xlu1 %v4318_v55, %s4632_s7  ;;  %v1107_v0 = vshrl.u32 %v725_v6, 16  ;;  %v2518_v48 = vsel %vm4766_vm7, %v2516_v14, %v2517_v26  ;;  %v1110_v54 = vshll.u32 %v725_v6, 16 }
 0x15b   : > { %v4216_v53 = vcombine.low %v1242_v9, %v1245_v62  ;;  %v1249_v18 = vsel %vm4766_vm7, %v4009_v60, %v1248_v20  ;;  %v1250_v41 = vrot.slane %v1248_v20, 4  ;;  %v1116_v40 = vshll.u32 %v6158_v16, 16  ;;  %v4032_v62 = vld [vmem:[#allocation2 + $0x60] sm:$0xf]  ;;  %v6188_v60 = vpop.permute.xlu0 %2653 }
 0x15c   : > { %v1109_v52 = vrot.slane %v1107_v0, 4  ;;  %v1120_v30 = vshrl.u32 %v6158_v16, 16  ;;  %v1126_v7 = vshll.u32 %v6160_v23, 16  ;;  %v3340_v13 = vsel %vm3318_vm15, %v6058_v24, %v5861_v5  ;;  %v1145_v0 = vld [vmem:[#allocation2 + $0xb4] sm:$0xe] }
 0x15d   : > { %2737 = vrot.lane.b32.xlu0 %v4216_v53, %s4625_s28  ;;  %v1300_v55 = vrot.slane %v6098_v58, 5  ;;  %v1252_v29 = vsel %vm4766_vm7, %v1250_v41, %v1251_v25  ;;  %v1112_v4 = vrot.slane %v1110_v54, 5  ;;  %v4319_v35 = vcombine.low %v2515_v28, %v2518_v48  ;;  %v6196_v25 = vld [vmem:[#allocation2 + $0x64] sm:$0xf]  ;;  %v6199_v54 = vpop.permute.xlu1 %3177 }
 0x15e   : > { %2673 = vrot.lane.b32.xlu1 %v4208_v38, %s4626_s29  ;;  %v4217_v9 = vcombine.low %v1249_v18, %v1252_v29  ;;  %v1118_v33 = vrot.slane %v1116_v40, 5  ;;  %v1122_v26 = vrot.slane %v1120_v30, 4  ;;  %v1128_v63 = vrot.slane %v1126_v7, 5 }
 0x15f   : > { %v1113_v6 = vor.u32 %v1112_v4, %v1109_v52  ;;  %v1506_v10 = vshrl.u32 %v4030_v39, 16  ;;  %v1509_v14 = vshll.u32 %v4030_v39, 16  ;;  %v4232_v24 = vcombine.low %v4030_v39, %v6182_v19  ;;  %v6211_v39 = vld [vmem:[#allocation2 + $0x5c] sm:$0x1] }
 0x160   : > { %v1123_v5 = vor.u32 %v1122_v26, %v1118_v33  ;;  %v4016_v58 = vrot.slane %v1144_v49, 9  ;;  %v1297_v51 = vrot.slane %v6095_v31, 5  ;;  %v3359_v28 = vsel %vm3351_vm1, %v6126_v15, %v5864_v8 }
 0x161   : > { %2739 = vrot.lane.b32.xlu0 %v4217_v9, %s4625_s28  ;;  %v3342_v20 = vsel %vm3318_vm15, %v3305_v61, %v5903_v2  ;;  %v1114_v38 = vrot.slane %v1113_v6, 4  ;;  %v1519_v53 = vshrl.u32 %v6182_v19, 16  ;;  %v1508_v31 = vrot.slane %v1506_v10, 4  ;;  %v6221_v9 = vld [vmem:[#allocation2 + $0xb4] sm:$0xf] }
 0x162   : > { %3263 = vrot.lane.b32.xlu1 %v4319_v35, %s4632_s7  ;;  %v1124_v48 = vrot.slane %v1123_v5, 4  ;;  %v1511_v18 = vrot.slane %v1509_v14, 5  ;;  %v1299_v41 = vrot.slane %v1297_v51, 4  ;;  %v1298_v2 = vsel %vm4766_vm7, %v4016_v58, %v1297_v51 }
 0x163   : > { %v1119_v8 = vsel %vm4786_vm11, %v1114_v38, %v1118_v33  ;;  %v1530_v15 = vshrl.u32 %v4032_v62, 16  ;;  %v1533_v61 = vshll.u32 %v4032_v62, 16  ;;  %v4233_v30 = vcombine.low %v4032_v62, %v6196_v25 }
 0x164   : > { %v1129_v52 = vsel %vm4786_vm11, %v1124_v48, %v1128_v63  ;;  %v1301_v40 = vsel %vm4766_vm7, %v1299_v41, %v1300_v55  ;;  %v4017_v7 = vrot.slane %v1145_v0, 9  ;;  %v3390_v29 = vsel %vm3384_vm2, %v6147_v21, %v5893_v50  ;;  %v6225_v63 = vpop.permute.xlu0 %3243  ;;  %v6236_v58 = vpop.permute.xlu1 %3179  ;;  %v6253_v41 = vld [vmem:[#allocation2 + $0x68] sm:$0x1] }
 0x165   : > { %2833 = vrot.lane.b32.xlu0 %v4232_v24, %s4627_s30  ;;  %v6218_v4 = vsel %vm3351_vm1, %v3340_v13, %v5936_v12  ;;  %v4209_v49 = vcombine.low %v1119_v8, %v1129_v52  ;;  %v1543_v35 = vshrl.u32 %v6196_v25, 16  ;;  %v4224_v33 = vcombine.low %v1298_v2, %v1301_v40  ;;  %v6233_v24 = vld [vmem:[#allocation2 + $0xb8] sm:$0xf]  ;;  %v249_v2 = vld [vmem:[%s4764_s27 + $0x7c] sm:$0xf] }
 0x166   : > { %v1532_v55 = vrot.slane %v1530_v15, 4  ;;  %v1304_v26 = vrot.slane %v6158_v16, 5  ;;  %v1307_v6 = vrot.slane %v6160_v23, 5  ;;  %v1512_v50 = vor.u32 %v1511_v18, %v1508_v31 }
 0x167   : > { %2675 = vrot.lane.b32.xlu1 %v4209_v49, %s4626_s29  ;;  %v1515_v21 = vshll.u32 %v6182_v19, 16  ;;  %v1521_v12 = vrot.slane %v1519_v53, 4  ;;  %v1525_v13 = vshll.u32 %v6211_v39, 16  ;;  %v1535_v10 = vrot.slane %v1533_v61, 5  ;;  %s3911_s29 = sshll.u32 %s6589_s26, 4  ;;  %s6671_s29 = int_to_ptr.vmem [resolvable:$true] %s3911_s29 }
 0x168   : > { %v1305_v14 = vsel %vm4766_vm7, %v4017_v7, %v1304_v26  ;;  %v1306_v5 = vrot.slane %v1304_v26, 4  ;;  %v1698_v23 = vshrl.u32 %v6221_v9, 16  ;;  %v6240_v51 = vsel %vm3384_vm2, %v3359_v28, %v5929_v57  ;;  %v248_v57 = vld [vmem:[%s4764_s27 + $0x78] sm:$0xf]  ;;  %v6264_v40 = vpop.permute.xlu0 %2655  ;;  %s4347_s27 = sshll.u32 %s4614_s12, 12 }
 0x169   : > { %2835 = vrot.lane.b32.xlu0 %v4233_v30, %s4627_s30  ;;  %v6244_v62 = vsel %vm3351_vm1, %v3342_v20, %v5973_v59  ;;  %v1513_v38 = vrot.slane %v1512_v50, 4  ;;  %v1517_v53 = vrot.slane %v1515_v21, 5  ;;  %v6248_v0 = vsel %vm3417_vm3, %v3390_v29, %v5959_v22  ;;  %v4072_v21 = vld [vmem:[#allocation2 + $0x54] sm:$0xe]  ;;  %s6668_s12 = scalar_lea.hbm %s6726_s2, %s4347_s27 }
 0x16a   : > { %v1308_v48 = vsel %vm4766_vm7, %v1306_v5, %v1307_v6  ;;  %v1527_v31 = vrot.slane %v1525_v13, 5  ;;  %v1701_v18 = vshll.u32 %v6221_v9, 16  ;;  %v6257_v20 = vrot.slane %v1698_v23, 4 }
 0x16b   : > { %2753 = vrot.lane.b32.xlu1 %v4224_v33, %s4625_s28  ;;  %v4225_v28 = vcombine.low %v1305_v14, %v1308_v48  ;;  %v1522_v59 = vor.u32 %v1521_v12, %v1517_v53  ;;  %v1711_v8 = vshrl.u32 %v6233_v24, 16  ;;  %v1518_v22 = vsel %vm4786_vm11, %v1513_v38, %v1517_v53  ;;  %v6267_v12 = vpop.permute.xlu1 %3257  ;;  %v684_v53 = vld [vmem:[#allocation2 + $0xc0] sm:$0xf] }
 0x16c   : > { %v1536_v15 = vor.u32 %v1535_v10, %v1532_v55  ;;  %v1539_v61 = vshll.u32 %v6196_v25, 16  ;;  %v1545_v52 = vrot.slane %v1543_v35, 4  ;;  %v1549_v7 = vshll.u32 %v6253_v41, 16 }
 0x16d   : > { %v1523_v30 = vrot.slane %v1522_v59, 4  ;;  %v509_v29 = vshrl.u32 %v248_v57, 16  ;;  %v512_v49 = vshll.u32 %v248_v57, 16  ;;  %v517_v6 = vshrl.u32 %v249_v2, 16 }
 0x16e   : > { %v1537_v33 = vrot.slane %v1536_v15, 4  ;;  %v1541_v26 = vrot.slane %v1539_v61, 5  ;;  %v520_v50 = vshll.u32 %v249_v2, 16  ;;  %v1703_v35 = vrot.slane %v1701_v18, 5  ;;  %v6279_v15 = vld [vmem:[#allocation2 + $0xbc] sm:$0x1] }
 0x16f   : > { %2755 = vrot.lane.b32.xlu1 %v4225_v28, %s4625_s28  ;;  %v1528_v55 = vsel %vm4786_vm11, %v1523_v30, %v1527_v31  ;;  %v4240_v13 = vcombine.low %v6221_v9, %v6233_v24  ;;  %v511_v10 = vrot.slane %v509_v29, 7  ;;  %v1551_v23 = vrot.slane %v1549_v7, 5  ;;  %v4073_v29 = vld [vmem:[#allocation2 + $0x60] sm:$0xe] }
 0x170   : > { %v4248_v14 = vcombine.low %v1518_v22, %v1528_v55  ;;  %v1546_v5 = vor.u32 %v1545_v52, %v1541_v26  ;;  %v519_v38 = vrot.slane %v517_v6, 7  ;;  %v1542_v48 = vsel %vm4786_vm11, %v1537_v33, %v1541_v26  ;;  %v6281_v22 = vpop.permute.xlu0 %2733  ;;  %v6294_v26 = vpop.permute.xlu1 %2669 }
 0x171   : > { %v514_v57 = vor.u32 %v512_v49, %v511_v10  ;;  %v515_v59 = vrot.slane %v511_v10, 4  ;;  %v4088_v2 = vrot.slane %v4072_v21, 9  ;;  %v1853_v18 = vrot.slane %v6182_v19, 5  ;;  %v688_v10 = vld [vmem:[#allocation2 + $0xc8] sm:$0x1] }
 0x172   : > { %2913 = vrot.lane.b32.xlu0 %v4248_v14, %s4629_s4  ;;  %v1547_v28 = vrot.slane %v1546_v5, 4  ;;  %v522_v31 = vor.u32 %v520_v50, %v519_v38  ;;  %v1856_v9 = vrot.slane %v6211_v39, 5  ;;  %v1704_v52 = vor.u32 %v1703_v35, %v6257_v20 }
 0x173   : > { %2849 = vrot.lane.b32.xlu1 %v4240_v13, %s4627_s30  ;;  %v685_v61 = vsel %vm4780_vm10, %v514_v57, %v684_v53  ;;  %v1707_v30 = vshll.u32 %v6233_v24, 16  ;;  %v1713_v7 = vrot.slane %v1711_v8, 4  ;;  %v1854_v49 = vsel %vm4766_vm7, %v4088_v2, %v1853_v18 }
 0x174   : > { %v1552_v19 = vsel %vm4786_vm11, %v1547_v28, %v1551_v23  ;;  %v523_v39 = vsel %vm4795_vm12, %v515_v59, %v522_v31  ;;  %686 = vst [vmem:[#allocation2 + $0xc0] sm:$0xf] %v685_v61  ;;  %v1855_v33 = vrot.slane %v1853_v18, 4  ;;  %v3406_v34 = vsel %vm3384_vm2, %v6218_v4, %v6013_v11  ;;  %v6315_v5 = vpop.permute.xlu0 %2735  ;;  %v6331_v59 = vpop.permute.xlu1 %3259 }
 0x175   : > { %v4249_v20 = vcombine.low %v1542_v48, %v1552_v19  ;;  %687 = vst.msk [vmem:[#allocation2 + $0xc4] sm:$0xf] %vm162_vm0, %v523_v39  ;;  %v1709_v8 = vrot.slane %v1707_v30, 5  ;;  %v1717_v6 = vshll.u32 %v6279_v15, 16  ;;  %v3425_v43 = vsel %vm3417_vm3, %v6240_v51, %v6004_v37  ;;  %v4080_v19 = vld [vmem:[#allocation2 + $0xb4] sm:$0xe] }
 0x176   : > { %v3408_v50 = vsel %vm3384_vm2, %v6244_v62, %v6030_v45  ;;  %v1857_v21 = vsel %vm4766_vm7, %v1855_v33, %v1856_v9  ;;  %v4089_v55 = vrot.slane %v4073_v29, 9  ;;  %v3456_v11 = vsel %vm3450_vm4, %v6248_v0, %v6025_v56  ;;  %v4110_v62 = vld [vmem:[#allocation2 + $0x60] sm:$0xf] }
 0x177   : > { %2915 = vrot.lane.b32.xlu0 %v4249_v20, %s4629_s4  ;;  %v4264_v4 = vcombine.low %v1854_v49, %v1857_v21  ;;  %v1705_v35 = vrot.slane %v1704_v52, 4  ;;  %v1714_v13 = vor.u32 %v1713_v7, %v1709_v8  ;;  %v1719_v14 = vrot.slane %v1717_v6, 5  ;;  %v4112_v20 = vld [vmem:[#allocation2 + $0x6c] sm:$0xf] }
 0x178   : > { %v1860_v37 = vrot.slane %v6196_v25, 5  ;;  %v1863_v51 = vrot.slane %v6253_v41, 5  ;;  %v524_v45 = vrot.slane %v519_v38, 4  ;;  %v3439_v23 = vsel %vm3417_vm3, %v3406_v34, %v6088_v17 }
 0x179   : > { %v3458_v56 = vsel %vm3450_vm4, %v3425_v43, %v6066_v3  ;;  %v6323_v0 = vsel %vm3417_vm3, %v3408_v50, %v6108_v46  ;;  %v1715_v53 = vrot.slane %v1714_v13, 4  ;;  %v3489_v25 = vsel %vm3483_vm5, %v3456_v11, %v6103_v42  ;;  %v6340_v42 = vld [vmem:[#allocation2 + $0x64] sm:$0xf] }
 0x17a   : > { %v1861_v41 = vsel %vm4766_vm7, %v4089_v55, %v1860_v37  ;;  %v1862_v38 = vrot.slane %v1860_v37, 4  ;;  %v689_v57 = vsel %vm4855_vm13, %v524_v45, %v688_v10  ;;  %v1710_v3 = vsel %vm4786_vm11, %v1705_v35, %v1709_v8  ;;  %v6353_v8 = vpop.permute.xlu0 %2829  ;;  %v6359_v55 = vld [vmem:[#allocation2 + $0x70] sm:$0xf]  ;;  %v6363_v10 = vpop.permute.xlu1 %2671 }
 0x17b   : > { %v4048_v17 = vld [vmem:[#allocation2 + $0xc0] sm:$0xf]  ;;  %2993 = vrot.lane.b32.xlu0 %v4264_v4, %s4628_s3  ;;  %v6338_v46 = vsel %vm3450_vm4, %v3439_v23, %v6131_v27  ;;  %690 = vst [vmem:[#allocation2 + $0xc8] sm:$0x1] %v689_v57  ;;  %v2118_v2 = vshrl.u32 %v4110_v62, 16  ;;  %v2121_v28 = vshll.u32 %v4110_v62, 16  ;;  %v1720_v61 = vsel %vm4786_vm11, %v1715_v53, %v1719_v14 }
 0x17c   : > { %v6342_v31 = vld [vmem:[#allocation2 + $0xc4] sm:$0xf]  ;;  %v1722_v18 = vshrl.u32 %v4048_v17, 16  ;;  %v1725_v9 = vshll.u32 %v4048_v17, 16  ;;  %v1864_v52 = vsel %vm4766_vm7, %v1862_v38, %v1863_v51  ;;  %v4280_v33 = vcombine.low %v4110_v62, %v6340_v42  ;;  %v4081_v13 = vld [vmem:[#allocation2 + $0xc0] sm:$0xe] }
 0x17d   : > { %v1735_v30 = vshrl.u32 %v6342_v31, 16  ;;  %v4241_v27 = vcombine.low %v4048_v17, %v6342_v31  ;;  %v4265_v7 = vcombine.low %v1861_v41, %v1864_v52  ;;  %v1731_v29 = vshll.u32 %v6342_v31, 16 }
 0x17e   : > { %v1724_v39 = vrot.slane %v1722_v18, 4  ;;  %v1727_v49 = vrot.slane %v1725_v9, 5  ;;  %v1909_v34 = vrot.slane %v6233_v24, 5  ;;  %v4256_v6 = vcombine.low %v1710_v3, %v1720_v61  ;;  %v6376_v3 = vld [vmem:[#allocation2 + $0x68] sm:$0x1] }
 0x17f   : > { %2851 = vrot.lane.b32.xlu1 %v4241_v27, %s4627_s30  ;;  %2995 = vrot.lane.b32.xlu0 %v4265_v7, %s4628_s3  ;;  %v1733_v43 = vrot.slane %v1731_v29, 5  ;;  %v1737_v50 = vrot.slane %v1735_v30, 4  ;;  %v3522_v21 = vsel %vm3516_vm6, %v3489_v25, %v6164_v32  ;;  %v4096_v4 = vrot.slane %v4080_v19, 9  ;;  %v6383_v29 = vld [vmem:[#allocation2 + $0xc0] sm:$0xf]  ;;  %v6385_v19 = vpop.permute.xlu1 %2749 }
 0x180   : > { %v1728_v11 = vor.u32 %v1727_v49, %v1724_v39  ;;  %v1911_v35 = vrot.slane %v1909_v34, 4  ;;  %v1912_v24 = vrot.slane %v6279_v15, 5  ;;  %4377 = vmatprep.mubr.msk.bf16.mxu0 %vm3569_vm8, %v3522_v21  ;;  %v2120_v37 = vrot.slane %v2118_v2, 4 }
 0x181   : > { %v1738_v14 = vor.u32 %v1737_v50, %v1733_v43  ;;  %v2123_v51 = vrot.slane %v2121_v28, 5  ;;  %v2142_v45 = vshrl.u32 %v4112_v20, 16  ;;  %v3491_v32 = vsel %vm3483_vm5, %v3458_v56, %v6121_v47 }
 0x182   : > { %v4065_v62 = vld [vmem:[#allocation2 + $0xc8] sm:$0x1]  ;;  %v1729_v23 = vrot.slane %v1728_v11, 4  ;;  %v2131_v53 = vshrl.u32 %v6340_v42, 16  ;;  %v2145_v25 = vshll.u32 %v4112_v20, 16  ;;  %v4281_v38 = vcombine.low %v4112_v20, %v6359_v55 }
 0x183   : > { %2929 = vrot.lane.b32.xlu1 %v4256_v6, %s4629_s4  ;;  %v1739_v15 = vrot.slane %v1738_v14, 4  ;;  %v1741_v41 = vshll.u32 %v4065_v62, 16  ;;  %3089 = vrot.lane.b32.xlu0 %v4280_v33, %s4630_s5  ;;  %v4097_v48 = vrot.slane %v4081_v13, 9  ;;  %v1910_v57 = vsel %vm4766_vm7, %v4096_v4, %v1909_v34 }
 0x184   : > { %v1913_v17 = vsel %vm4766_vm7, %v1911_v35, %v1912_v24  ;;  %v1916_v47 = vrot.slane %v6342_v31, 5  ;;  %v1919_v56 = vrot.slane %v4065_v62, 5  ;;  %v6378_v2 = vpop.permute.xlu0 %2831  ;;  %v1734_v28 = vsel %vm4786_vm11, %v1729_v23, %v1733_v43  ;;  %v6404_v35 = vld [vmem:[#allocation2 + $0x74] sm:$0x1] }
 0x185   : > { %v1743_v18 = vrot.slane %v1741_v41, 5  ;;  %v2144_v9 = vrot.slane %v2142_v45, 4  ;;  %v2124_v61 = vor.u32 %v2123_v51, %v2120_v37  ;;  %v2147_v52 = vrot.slane %v2145_v25, 5  ;;  %v6407_v51 = vld [vmem:[#allocation2 + $0xcc] sm:$0xf] }
 0x186   : > { %v1918_v30 = vrot.slane %v1916_v47, 4  ;;  %v2127_v27 = vshll.u32 %v6340_v42, 16  ;;  %v2133_v7 = vrot.slane %v2131_v53, 4  ;;  %v1917_v39 = vsel %vm4766_vm7, %v4097_v48, %v1916_v47  ;;  %v6422_v41 = vld [vmem:[#allocation2 + $0xd0] sm:$0xf] }
 0x187   : > { %v1744_v31 = vsel %vm4786_vm11, %v1739_v15, %v1743_v18  ;;  %3091 = vrot.lane.b32.xlu0 %v4281_v38, %s4630_s5  ;;  %v2125_v49 = vrot.slane %v2124_v61, 4  ;;  %v2137_v33 = vshll.u32 %v6376_v3, 16  ;;  %v2155_v20 = vshrl.u32 %v6359_v55, 16  ;;  %v6425_v38 = vpop.permute.xlu1 %2751 }
 0x188   : > { %v4257_v34 = vcombine.low %v1734_v28, %v1744_v31  ;;  %v1920_v6 = vsel %vm4766_vm7, %v1918_v30, %v1919_v56  ;;  %v2129_v43 = vrot.slane %v2127_v27, 5  ;;  %v3474_v50 = vsel %vm3450_vm4, %v6323_v0, %v6174_v44  ;;  %v6409_v45 = vpop.permute.xlu0 %2909 }
 0x189   : > { %v3505_v21 = vsel %vm3483_vm5, %v6338_v46, %v6199_v54  ;;  %v2310_v11 = vshrl.u32 %v6383_v29, 16  ;;  %v2313_v4 = vshll.u32 %v6383_v29, 16  ;;  %v4272_v24 = vcombine.low %v1910_v57, %v1913_v17  ;;  %v6413_v54 = vld [vmem:[#allocation2 + $0xc4] sm:$0xf]  ;;  %v4152_v57 = vld [vmem:[#allocation2 + $0x60] sm:$0xe] }
 0x18a   : > { %2931 = vrot.lane.b32.xlu1 %v4257_v34, %s4629_s4  ;;  %v4273_v13 = vcombine.low %v1917_v39, %v1920_v6  ;;  %v2134_v14 = vor.u32 %v2133_v7, %v2129_v43  ;;  %v2139_v37 = vrot.slane %v2137_v33, 5  ;;  %v2130_v44 = vsel %vm4786_vm11, %v2125_v49, %v2129_v43  ;;  %v6438_v39 = vld [vmem:[#allocation2 + $0xc8] sm:$0x1]  ;;  %s6677_s4 = scalar_lea.sflag [#allocation4], %s148_s24 }
 0x18b   : > { %v3524_v0 = vsel %vm3516_vm6, %v3491_v32, %v6225_v63  ;;  %v3538_v46 = vsel %vm3516_vm6, %v3505_v21, %v6267_v12  ;;  %v2148_v62 = vor.u32 %v2147_v52, %v2144_v9  ;;  %v2151_v53 = vshll.u32 %v6359_v55, 16  ;;  %v4153_v21 = vld [vmem:[#allocation2 + $0x6c] sm:$0xe] }
 0x18c   : > { %v2135_v23 = vrot.slane %v2134_v14, 4  ;;  %v2157_v25 = vrot.slane %v2155_v20, 4  ;;  %v2161_v15 = vshll.u32 %v6404_v35, 16  ;;  %4378 = vmatmul.mubr.msk.bf16.gmra.mrb[4].mxu0 %vm3569_vm8, %v3524_v0  ;;  %4393 = vmatprep.mubr.msk.bf16.mxu1 %vm3569_vm8, %v3538_v46  ;;  %v2312_v48 = vrot.slane %v2310_v11, 4  ;;  %v6449_v11 = vpop.permute.xlu1 %2845 }
 0x18d   : > { %v2315_v63 = vrot.slane %v2313_v4, 5  ;;  %v2334_v32 = vshrl.u32 %v6407_v51, 16  ;;  %v2337_v12 = vshll.u32 %v6407_v51, 16  ;;  %v2323_v47 = vshrl.u32 %v6413_v54, 16 }
 0x18e   : > { %3009 = vrot.lane.b32.xlu1 %v4272_v24, %s4628_s3  ;;  %v2140_v17 = vsel %vm4786_vm11, %v2135_v23, %v2139_v37  ;;  %v2149_v56 = vrot.slane %v2148_v62, 4  ;;  %v2153_v28 = vrot.slane %v2151_v53, 5  ;;  %v3507_v18 = vsel %vm3483_vm5, %v3474_v50, %v6236_v58  ;;  %v4145_v53 = vld [vmem:[#allocation2 + $0xd4] sm:$0x1] }
 0x18f   : > { %v4296_v9 = vcombine.low %v2130_v44, %v2140_v17  ;;  %v4288_v61 = vcombine.low %v6383_v29, %v6413_v54  ;;  %v2347_v52 = vshrl.u32 %v6422_v41, 16  ;;  %v2163_v27 = vrot.slane %v2161_v15, 5  ;;  %v6440_v49 = vpop.permute.xlu0 %2911 }
 0x190   : > { %v2158_v30 = vor.u32 %v2157_v25, %v2153_v28  ;;  %v2336_v7 = vrot.slane %v2334_v32, 4  ;;  %v4168_v31 = vrot.slane %v4152_v57, 9  ;;  %v2339_v33 = vrot.slane %v2337_v12, 5 }
 0x191   : > { %3169 = vrot.lane.b32.xlu0 %v4296_v9, %s4631_s6  ;;  %v2465_v34 = vrot.slane %v6340_v42, 5  ;;  %v2468_v58 = vrot.slane %v6376_v3, 5  ;;  %v2316_v20 = vor.u32 %v2315_v63, %v2312_v48  ;;  %v2154_v29 = vsel %vm4786_vm11, %v2149_v56, %v2153_v28 }
 0x192   : > { %3011 = vrot.lane.b32.xlu1 %v4273_v13, %s4628_s3  ;;  %v2159_v6 = vrot.slane %v2158_v30, 4  ;;  %v2319_v43 = vshll.u32 %v6413_v54, 16  ;;  %v2325_v50 = vrot.slane %v2323_v47, 4  ;;  %v2329_v3 = vshll.u32 %v6438_v39, 16  ;;  %v6474_v9 = vpop.permute.xlu1 %2847 }
 0x193   : > { %v2466_v4 = vsel %vm4766_vm7, %v4168_v31, %v2465_v34  ;;  %v2467_v24 = vrot.slane %v2465_v34, 4  ;;  %v2317_v42 = vrot.slane %v2316_v20, 4  ;;  %v4289_v14 = vcombine.low %v6407_v51, %v6422_v41  ;;  %v6467_v63 = vpop.permute.xlu0 %2989  ;;  %v4161_v34 = vld [vmem:[#allocation2 + $0xcc] sm:$0xe] }
 0x194   : > { %v2164_v13 = vsel %vm4786_vm11, %v2159_v6, %v2163_v27  ;;  %v2321_v37 = vrot.slane %v2319_v43, 5  ;;  %v3540_v44 = vsel %vm3516_vm6, %v3507_v18, %v6331_v59  ;;  %v2331_v62 = vrot.slane %v2329_v3, 5  ;;  %v4160_v18 = vld [vmem:[#allocation2 + $0xc0] sm:$0xe] }
 0x195   : > { %v4297_v0 = vcombine.low %v2154_v29, %v2164_v13  ;;  %v2469_v46 = vsel %vm4766_vm7, %v2467_v24, %v2468_v58  ;;  %v4169_v23 = vrot.slane %v4153_v21, 9  ;;  %4394 = vmatmul.mubr.msk.bf16.gmra.mrb[4].mxu1 %vm3569_vm8, %v3540_v44  ;;  %v2472_v48 = vrot.slane %v6359_v55, 5 }
 0x196   : > { %3105 = vrot.lane.b32.xlu1 %v4288_v61, %s4630_s5  ;;  %v4312_v25 = vcombine.low %v2466_v4, %v2469_v46  ;;  %v2322_v15 = vsel %vm4786_vm11, %v2317_v42, %v2321_v37  ;;  %v2326_v51 = vor.u32 %v2325_v50, %v2321_v37  ;;  %v2475_v59 = vrot.slane %v6404_v35, 5  ;;  %v2926_v24 = vpop.permute.xlu1 %2925 }
 0x197   : > { %3171 = vrot.lane.b32.xlu0 %v4297_v0, %s4631_s6  ;;  %v2340_v32 = vor.u32 %v2339_v33, %v2336_v7  ;;  %v2343_v12 = vshll.u32 %v6422_v41, 16  ;;  %v2349_v57 = vrot.slane %v2347_v52, 4  ;;  %v2473_v47 = vsel %vm4766_vm7, %v4169_v23, %v2472_v48  ;;  %v2992_v29 = vpop.permute.xlu0 %2991 }
 0x198   : > { %v2327_v17 = vrot.slane %v2326_v51, 4  ;;  %v2474_v56 = vrot.slane %v2472_v48, 4  ;;  %v2353_v28 = vshll.u32 %v4145_v53, 16  ;;  %v4176_v33 = vrot.slane %v4160_v18, 9 }
 0x199   : > { %v2341_v55 = vrot.slane %v2340_v32, 4  ;;  %v2345_v61 = vrot.slane %v2343_v12, 5  ;;  %v2521_v58 = vrot.slane %v6413_v54, 5  ;;  %v2524_v20 = vrot.slane %v6438_v39, 5  ;;  %v4531_v32 = vld [vmem:[#allocation2 + $0x3c] sm:$0xf] }
 0x19a   : > { %3107 = vrot.lane.b32.xlu1 %v4289_v14, %s4630_s5  ;;  %v2332_v35 = vsel %vm4786_vm11, %v2327_v17, %v2331_v62  ;;  %v2476_v30 = vsel %vm4766_vm7, %v2474_v56, %v2475_v59  ;;  %v2355_v52 = vrot.slane %v2353_v28, 5  ;;  %v2528_v50 = vrot.slane %v6422_v41, 5  ;;  %v4532_v12 = vld [vmem:[#allocation2 + $0x40] sm:$0xf]  ;;  %s4544_s5 = scalar_lea.vmem %s6671_s29, 4096 }
 0x19b   : > { %3249 = vrot.lane.b32.xlu0 %v4312_v25, %s4632_s7  ;;  %v4304_v27 = vcombine.low %v2322_v15, %v2332_v35  ;;  %v4313_v7 = vcombine.low %v2473_v47, %v2476_v30  ;;  %v2350_v31 = vor.u32 %v2349_v57, %v2345_v61  ;;  %v2346_v6 = vsel %vm4786_vm11, %v2341_v55, %v2345_v61  ;;  %v3086_v37 = vpop.permute.xlu0 %3085  ;;  %v4530_v25 = vld [vmem:[#allocation2 + $0x34] sm:$0xf]  ;;  %p4545_p12 = scmp.ne.s32.totalorder %s6671_s29, %s4544_s5 }
 0x19c   : > { %v2523_v21 = vrot.slane %v2521_v58, 4  ;;  %v4177_v4 = vrot.slane %v4161_v34, 9  ;;  %v2522_v54 = vsel %vm4766_vm7, %v4176_v33, %v2521_v58  ;;  %v2530_v39 = vrot.slane %v2528_v50, 4  ;;  %v4533_v34 = vld [vmem:[#allocation2 + $0x90] sm:$0xf] }
 0x19d   : > { %v2351_v43 = vrot.slane %v2350_v31, 4  ;;  %v2531_v3 = vrot.slane %v4145_v53, 5  ;;  %v4529_v53 = vld [vmem:[#allocation2 + $0x30] sm:$0xf]  ;;  %v4183_v57 = vcombine.low %v4531_v32, %v4532_v12  ;;  %p4546_p13 = pnand %p4545_p12, %p4690_p4 }
 0x19e   : > { %3185 = vrot.lane.b32.xlu1 %v4304_v27, %s4631_s6  ;;  %v2525_v14 = vsel %vm4766_vm7, %v2523_v21, %v2524_v20  ;;  %v2529_v44 = vsel %vm4766_vm7, %v4177_v4, %v2528_v50  ;;  %v4182_v15 = vcombine.low %v4529_v53, %v4530_v25  ;;  %v4535_v21 = vld [vmem:[#allocation2 + $0x9c] sm:$0xf]  ;;  %v4536_v4 = vld [vmem:[#allocation2 + $0xa0] sm:$0xf] }
 0x19f   : > { %3251 = vrot.lane.b32.xlu0 %v4313_v7, %s4632_s7  ;;  %v2356_v42 = vsel %vm4786_vm11, %v2351_v43, %v2355_v52  ;;  %v4320_v41 = vcombine.low %v2522_v54, %v2525_v14  ;;  %v2532_v36 = vsel %vm4766_vm7, %v2530_v39, %v2531_v3  ;;  %v6500_v0 = vpop.permute.xlu1 %2927  ;;  %p4547_p0 = pneg %p4546_p13 }
 0x1a0   : > { %v4305_v13 = vcombine.low %v2346_v6, %v2356_v42  ;;  %v4321_v46 = vcombine.low %v2529_v44, %v2532_v36  ;;  %v3284_v59 = vsel %vm3269_vm14, %v4182_v15, %v6188_v60  ;;  %v3287_v60 = vsel %vm3269_vm14, %v4183_v57, %v6264_v40 }
 0x1a1   : > { %v3328_v1 = vsel %vm3318_vm15, %v3284_v59, %v6281_v22  ;;  %v4191_v42 = vcombine.low %v4535_v21, %v4536_v4 }
 0x1a2   : > { %3187 = vrot.lane.b32.xlu1 %v4305_v13, %s4631_s6  ;;  %v3361_v17 = vsel %vm3351_vm1, %v3328_v1, %v6353_v8  ;;  %v3330_v8 = vsel %vm3318_vm15, %v3287_v60, %v6315_v5  ;;  %v4534_v5 = vld [vmem:[#allocation2 + $0x94] sm:$0xf]  ;;  %s4633_s6 = smov [#allocation3]  }
 0x1a3   : > { %v3006_v23 = vpop.permute.xlu1 %3005  ;;  %v3394_v56 = vsel %vm3384_vm2, %v3361_v17, %v6409_v45  ;;  %v3363_v45 = vsel %vm3351_vm1, %v3330_v8, %v6378_v2  ;;  %v4190_v58 = vcombine.low %v4533_v34, %v4534_v5 }
 0x1a4   : > { %v3427_v28 = vsel %vm3417_vm3, %v3394_v56, %v6467_v63  ;;  %v3396_v52 = vsel %vm3384_vm2, %v3363_v45, %v6440_v49 }
 0x1a5   : > { %v3460_v55 = vsel %vm3450_vm4, %v3427_v28, %v3086_v37  ;;  %v3429_v40 = vsel %vm3417_vm3, %v3396_v52, %v2992_v29  ;;  %v3308_v2 = vsel %vm3269_vm14, %v4190_v58, %v6294_v26  ;;  %v4537_v28 = vld [vmem:[#allocation2 + $0x48] sm:$0xf] }
 0x1a6   : > { %3265 = vrot.lane.b32.xlu1 %v4320_v41, %s4632_s7  ;;  %v3344_v49 = vsel %vm3318_vm15, %v3308_v2, %v6385_v19  ;;  %v3311_v19 = vsel %vm3269_vm14, %v4191_v42, %v6363_v10 }
 0x1a7   : > { %v3088_v62 = vpop.permute.xlu0 %3087  ;;  %v3008_v48 = vpop.permute.xlu1 %3007  ;;  %v3377_v29 = vsel %vm3351_vm1, %v3344_v49, %v6449_v11 }
 0x1a8   : > { %v3462_v27 = vsel %vm3450_vm4, %v3429_v40, %v3088_v62  ;;  %v3410_v43 = vsel %vm3384_vm2, %v3377_v29, %v2926_v24  ;;  %v3346_v24 = vsel %vm3318_vm15, %v3311_v19, %v6425_v38  ;;  %v4542_v19 = vld [vmem:[#allocation2 + $0xac] sm:$0xf] }
 0x1a9   : > { %v3443_v54 = vsel %vm3417_vm3, %v3410_v43, %v3006_v23  ;;  %v3379_v14 = vsel %vm3351_vm1, %v3346_v24, %v6474_v9 }
 0x1aa   : > { %3267 = vrot.lane.b32.xlu1 %v4321_v46, %s4632_s7  ;;  %v3412_v37 = vsel %vm3384_vm2, %v3379_v14, %v6500_v0  ;;  %s4548_s7 = sshll.u32 %s4633_s6, 4  ;;  %s4549_s7 = int_to_ptr.vmem [resolvable:$false] %s4548_s7 }
 0x1ab   : > { %v3166_v51 = vpop.permute.xlu0 %3165  ;;  %v3102_v18 = vpop.permute.xlu1 %3101  ;;  %v3445_v44 = vsel %vm3417_vm3, %v3412_v37, %v3008_v48  ;;  %s4550_s8 = scalar_lea.vmem %s4549_s7, 8192  ;;  %p4551_p1 = scmp.lt.s32.totalorder %s6671_s29, %s4549_s7 }
 0x1ac   : > { %v3493_v22 = vsel %vm3483_vm5, %v3460_v55, %v3166_v51  ;;  %v3476_v39 = vsel %vm3450_vm4, %v3443_v54, %v3102_v18  ;;  %v4538_v18 = vld [vmem:[#allocation2 + $0x4c] sm:$0xf]  ;;  %p4552_p2 = scmp.lt.s32.totalorder %s4550_s8, %s4544_s5 }
 0x1ad   : > { %v4184_v55 = vcombine.low %v4537_v28, %v4538_v18 }
 0x1ae   : > { %p4553_p3 = por %p4552_p2, %p4551_p1 }
 0x1b0   : > { %p4554_p5 = pnand %p4553_p3, %p4547_p0 }
 0x1b4   : > { %v3168_v47 = vpop.permute.xlu0 %3167 }
 0x1b5   : > { %v3495_v7 = vsel %vm3483_vm5, %v3462_v27, %v3168_v47 }
 0x1b7   : > { %v3104_v63 = vpop.permute.xlu1 %3103 }
 0x1b8   : > { %v3246_v61 = vpop.permute.xlu0 %3245  ;;  %v3478_v46 = vsel %vm3450_vm4, %v3445_v44, %v3104_v63 }
 0x1b9   : > { %v3526_v35 = vsel %vm3516_vm6, %v3493_v22, %v3246_v61  ;;  %v4539_v22 = vld [vmem:[#allocation2 + $0x54] sm:$0xf]  ;;  %v4540_v61 = vld [vmem:[#allocation2 + $0x58] sm:$0xf] }
 0x1ba   : > { %4381 = vmatprep.mubr.msk.bf16.mxu0 %vm3569_vm8, %v3526_v35  ;;  %v4185_v35 = vcombine.low %v4539_v22, %v4540_v61 }
 0x1bb   : > { %v3182_v20 = vpop.permute.xlu1 %3181 }
 0x1bc   : > { %v6524_v30 = vpop.permute.xlu0 %2657  ;;  %v3509_v3 = vsel %vm3483_vm5, %v3476_v39, %v3182_v20 }
 0x1bd   : > { %v3290_v63 = vsel %vm3269_vm14, %v4184_v55, %v6524_v30 }
 0x1c0   : > { %v3248_v31 = vpop.permute.xlu0 %3247 }
 0x1c1   : > { %v3528_v33 = vsel %vm3516_vm6, %v3495_v7, %v3248_v31 }
 0x1c2   : > { %4382 = vmatmul.mubr.msk.bf16.gmra.mrb[8].mxu0 %vm3569_vm8, %v3528_v33 }
 0x1c8   : > { %v3184_v6 = vpop.permute.xlu1 %3183  ;;  %v2660_v50 = vpop.permute.xlu0 %2659 }
 0x1c9   : > { %v3511_v10 = vsel %vm3483_vm5, %v3478_v46, %v3184_v6  ;;  %v3293_v27 = vsel %vm3269_vm14, %v4185_v35, %v2660_v50 }
 0x1cc   : > { %v3262_v26 = vpop.permute.xlu1 %3261 }
 0x1cd   : > { %v3542_v13 = vsel %vm3516_vm6, %v3509_v3, %v3262_v26 }
 0x1ce   : > { %4397 = vmatprep.mubr.msk.bf16.mxu1 %vm3569_vm8, %v3542_v13  ;;  %v4541_v13 = vld [vmem:[#allocation2 + $0xa8] sm:$0xf] }
 0x1cf   : > { %v2738_v11 = vpop.permute.xlu0 %2737 }
 0x1d0   : > { %v6551_v41 = vpop.permute.xlu1 %2673  ;;  %v3332_v7 = vsel %vm3318_vm15, %v3290_v63, %v2738_v11  ;;  %v4192_v11 = vcombine.low %v4541_v13, %v4542_v19 }
 0x1d3   : > { %v2740_v36 = vpop.permute.xlu0 %2739 }
 0x1d4   : > { %v3264_v62 = vpop.permute.xlu1 %3263  ;;  %v3334_v21 = vsel %vm3318_vm15, %v3293_v27, %v2740_v36 }
 0x1d5   : > { %v3544_v23 = vsel %vm3516_vm6, %v3511_v10, %v3264_v62  ;;  %v4543_v10 = vld [vmem:[#allocation2 + $0xb4] sm:$0xf] }
 0x1d6   : > { %4398 = vmatmul.mubr.msk.bf16.gmra.mrb[8].mxu1 %vm3569_vm8, %v3544_v23  ;;  %v4193_v62 = vcombine.low %v4543_v10, %v6158_v16 }
 0x1d7   : > { %v2834_v38 = vpop.permute.xlu0 %2833 }
 0x1d8   : > { %v3365_v5 = vsel %vm3351_vm1, %v3332_v7, %v2834_v38 }
 0x1d9   : > { %v6560_v9 = vpop.permute.xlu1 %2675 }
 0x1da   : > { %v3317_v35 = vsel %vm3269_vm14, %v4193_v62, %v6560_v9 }
 0x1db   : > { %v2836_v53 = vpop.permute.xlu0 %2835 }
 0x1dc   : > { %v3367_v39 = vsel %vm3351_vm1, %v3334_v21, %v2836_v53 }
 0x1dd   : > { %v6562_v25 = vpop.permute.xlu1 %2753 }
 0x1e1   : > { %v6564_v15 = vpop.permute.xlu1 %2755 }
 0x1e4   : > { %v2914_v0 = vpop.permute.xlu0 %2913 }
 0x1e5   : > { %v6566_v48 = vpop.permute.xlu1 %2849  ;;  %v3398_v30 = vsel %vm3384_vm2, %v3365_v5, %v2914_v0 }
 0x1e9   : > { %v2916_v51 = vpop.permute.xlu0 %2915 }
 0x1ea   : > { %v3400_v24 = vsel %vm3384_vm2, %v3367_v39, %v2916_v51  ;;  %v3314_v51 = vsel %vm3269_vm14, %v4192_v11, %v6551_v41 }
 0x1ed   : > { %v2994_v59 = vpop.permute.xlu0 %2993 }
 0x1ee   : > { %v3431_v43 = vsel %vm3417_vm3, %v3398_v30, %v2994_v59 }
 0x1f1   : > { %v6568_v1 = vpop.permute.xlu1 %2851  ;;  %v2996_v32 = vpop.permute.xlu0 %2995 }
 0x1f2   : > { %v3433_v37 = vsel %vm3417_vm3, %v3400_v24, %v2996_v32 }
 0x1f5   : > { %v6570_v12 = vpop.permute.xlu1 %2929  ;;  %v3090_v57 = vpop.permute.xlu0 %3089 }
 0x1f6   : > { %v3464_v4 = vsel %vm3450_vm4, %v3431_v43, %v3090_v57 }
 0x1f9   : > { %v3092_v47 = vpop.permute.xlu0 %3091 }
 0x1fa   : > { %v3466_v44 = vsel %vm3450_vm4, %v3433_v37, %v3092_v47  ;;  %v3348_v47 = vsel %vm3318_vm15, %v3314_v51, %v6562_v25 }
 0x1fb   : > { %v3381_v41 = vsel %vm3351_vm1, %v3348_v47, %v6566_v48  ;;  %v3350_v48 = vsel %vm3318_vm15, %v3317_v35, %v6564_v15 }
 0x1fc   : > { %v6572_v17 = vpop.permute.xlu1 %2931  ;;  %v3414_v61 = vsel %vm3384_vm2, %v3381_v41, %v6570_v12  ;;  %v3383_v12 = vsel %vm3351_vm1, %v3350_v48, %v6568_v1 }
 0x1fd   : > { %v3416_v9 = vsel %vm3384_vm2, %v3383_v12, %v6572_v17 }
 0x200   : > { %v6574_v56 = vpop.permute.xlu1 %3009 }
 0x203   : > { %v3170_v60 = vpop.permute.xlu0 %3169 }
 0x204   : > { %v6577_v8 = vpop.permute.xlu1 %3011  ;;  %v3497_v3 = vsel %vm3483_vm5, %v3464_v4, %v3170_v60 }
 0x205   : > { %v3449_v7 = vsel %vm3417_vm3, %v3416_v9, %v6577_v8 }
 0x206   : > { %v4375_v45 = vpop.f32.mrb[0].mxu0 }
 0x207   : > { %vm3769_vm0 = vcmp.ge.f32.partialorder %v4375_v45, 0.0  ;;  %v3801_v52 = vmul.f32 0.1, %v4375_v45  ;;  %v3640_v40 = vpop.f32.mrb[1].mxu0 }
 0x208   : > { %v6585_v31 = vpop.permute.xlu1 %3105  ;;  %vm3767_vm7 = vcmp.ge.f32.partialorder %v3640_v40, 0.0  ;;  %v3799_v33 = vmul.f32 0.1, %v3640_v40  ;;  %v4376_v34 = vpop.f32.mrb[2].mxu0 }
 0x209   : > { %v3172_v58 = vpop.permute.xlu0 %3171  ;;  %v3833_v20 = vsel %vm3769_vm0, %v4375_v45, %v3801_v52  ;;  %vm3770_vm10 = vcmp.ge.f32.partialorder %v4376_v34, 0.0  ;;  %v3802_v2 = vmul.f32 0.1, %v4376_v34  ;;  %v3643_v49 = vpop.f32.mrb[3].mxu0  ;;  %v3447_v45 = vsel %vm3417_vm3, %v3414_v61, %v6574_v56 }
 0x20a   : > { %3865 = vst [vmem:[%s6589_s26 + $0x10] sm:$0xff] %v3833_v20  ;;  %v3831_v29 = vsel %vm3767_vm7, %v3640_v40, %v3799_v33  ;;  %vm3768_vm11 = vcmp.ge.f32.partialorder %v3643_v49, 0.0  ;;  %v3800_v6 = vmul.f32 0.1, %v3643_v49  ;;  %v3499_v23 = vsel %vm3483_vm5, %v3466_v44, %v3172_v58 }
 0x20b   : > { %3863 = vst [vmem:[%s6589_s26] sm:$0xff] %v3831_v29  ;;  %v3834_v50 = vsel %vm3770_vm10, %v4376_v34, %v3802_v2  ;;  %v3480_v52 = vsel %vm3450_vm4, %v3447_v45, %v6585_v31 }
 0x20c   : > { %v3108_v42 = vpop.permute.xlu1 %3107  ;;  %3866 = vst [vmem:[%s6589_s26 + $0x18] sm:$0xff] %v3834_v50  ;;  %v3832_v54 = vsel %vm3768_vm11, %v3643_v49, %v3800_v6 }
 0x20d   : > { %v3250_v26 = vpop.permute.xlu0 %3249  ;;  %3864 = vst [vmem:[%s6589_s26 + $0x8] sm:$0xff] %v3832_v54  ;;  %v3482_v15 = vsel %vm3450_vm4, %v3449_v7, %v3108_v42 }
 0x20e   : > { %v3530_v14 = vsel %vm3516_vm6, %v3497_v3, %v3250_v26 }
 0x20f   : > { %4385 = vmatprep.mubr.msk.bf16.mxu0 %vm3569_vm8, %v3530_v14 }
 0x210   : > { %v3186_v36 = vpop.permute.xlu1 %3185  ;;  %v4391_v46 = vpop.f32.mrb[0].mxu1 }
 0x211   : > { %v3252_v38 = vpop.permute.xlu0 %3251  ;;  %vm3785_vm12 = vcmp.ge.f32.partialorder %v4391_v46, 0.0  ;;  %v3817_v53 = vmul.f32 0.1, %v4391_v46  ;;  %v3704_v0 = vpop.f32.mrb[1].mxu1  ;;  %v3513_v40 = vsel %vm3483_vm5, %v3480_v52, %v3186_v36 }
 0x212   : > { %v3532_v59 = vsel %vm3516_vm6, %v3499_v23, %v3252_v38  ;;  %vm3783_vm13 = vcmp.ge.f32.partialorder %v3704_v0, 0.0  ;;  %v3815_v32 = vmul.f32 0.1, %v3704_v0  ;;  %v4392_v57 = vpop.f32.mrb[2].mxu1 }
 0x213   : > { %4386 = vmatmul.mubr.msk.bf16.gmra.mrb[12].mxu0 %vm3569_vm8, %v3532_v59  ;;  %v3849_v16 = vsel %vm3785_vm12, %v4391_v46, %v3817_v53  ;;  %vm3786_vm9 = vcmp.ge.f32.partialorder %v4392_v57, 0.0  ;;  %v3818_v28 = vmul.f32 0.1, %v4392_v57  ;;  %v3707_v18 = vpop.f32.mrb[3].mxu1 }
 0x214   : > { %v3188_v55 = vpop.permute.xlu1 %3187  ;;  %3881 = vst [vmem:[%s6589_s26 + $0x90] sm:$0xff] %v3849_v16  ;;  %v3847_v60 = vsel %vm3783_vm13, %v3704_v0, %v3815_v32  ;;  %vm3784_vm0 = vcmp.ge.f32.partialorder %v3707_v18, 0.0  ;;  %v3816_v22 = vmul.f32 0.1, %v3707_v18 }
 0x215   : > { %3879 = vst [vmem:[%s6589_s26 + $0x80] sm:$0xff] %v3847_v60  ;;  %v3850_v25 = vsel %vm3786_vm9, %v4392_v57, %v3818_v28  ;;  %v3515_v31 = vsel %vm3483_vm5, %v3482_v15, %v3188_v55 }
 0x216   : > { %3882 = vst [vmem:[%s6589_s26 + $0x98] sm:$0xff] %v3850_v25  ;;  %v3848_v63 = vsel %vm3784_vm0, %v3707_v18, %v3816_v22 }
 0x217   : > { %3880 = vst [vmem:[%s6589_s26 + $0x88] sm:$0xff] %v3848_v63 }
 0x218   : > { %v3266_v27 = vpop.permute.xlu1 %3265 }
 0x219   : > { %v3546_v56 = vsel %vm3516_vm6, %v3513_v40, %v3266_v27 }
 0x21a   : > { %4401 = vmatprep.mubr.msk.bf16.mxu1 %vm3569_vm8, %v3546_v56 }
 0x21c   : > { %v3268_v33 = vpop.permute.xlu1 %3267 }
 0x21d   : > { %v3548_v1 = vsel %vm3516_vm6, %v3515_v31, %v3268_v33 }
 0x21e   : > { %4402 = vmatmul.mubr.msk.bf16.gmra.mrb[12].mxu1 %vm3569_vm8, %v3548_v1 }
 0x25f   : > { %v4379_v34 = vpop.f32.mrb[4].mxu0 }
 0x260   : > { %vm3773_vm14 = vcmp.ge.f32.partialorder %v4379_v34, 0.0  ;;  %v3805_v17 = vmul.f32 0.1, %v4379_v34  ;;  %v3656_v5 = vpop.f32.mrb[5].mxu0 }
 0x261   : > { %vm3771_vm15 = vcmp.ge.f32.partialorder %v3656_v5, 0.0  ;;  %v3803_v8 = vmul.f32 0.1, %v3656_v5  ;;  %v4380_v58 = vpop.f32.mrb[6].mxu0 }
 0x262   : > { %v3837_v20 = vsel %vm3773_vm14, %v4379_v34, %v3805_v17  ;;  %vm3774_vm1 = vcmp.ge.f32.partialorder %v4380_v58, 0.0  ;;  %v3806_v2 = vmul.f32 0.1, %v4380_v58  ;;  %v3659_v49 = vpop.f32.mrb[7].mxu0 }
 0x263   : > { %3869 = vst [vmem:[%s6589_s26 + $0x30] sm:$0xff] %v3837_v20  ;;  %v3835_v30 = vsel %vm3771_vm15, %v3656_v5, %v3803_v8  ;;  %vm3772_vm2 = vcmp.ge.f32.partialorder %v3659_v49, 0.0  ;;  %v3804_v29 = vmul.f32 0.1, %v3659_v49 }
 0x264   : > { %3867 = vst [vmem:[%s6589_s26 + $0x20] sm:$0xff] %v3835_v30  ;;  %v3838_v6 = vsel %vm3774_vm1, %v4380_v58, %v3806_v2 }
 0x265   : > { %3870 = vst [vmem:[%s6589_s26 + $0x38] sm:$0xff] %v3838_v6  ;;  %v3836_v43 = vsel %vm3772_vm2, %v3659_v49, %v3804_v29 }
 0x266   : > { %3868 = vst [vmem:[%s6589_s26 + $0x28] sm:$0xff] %v3836_v43 }
 0x268   : > { %v4395_v50 = vpop.f32.mrb[4].mxu1 }
 0x269   : > { %vm3789_vm3 = vcmp.ge.f32.partialorder %v4395_v50, 0.0  ;;  %v3821_v21 = vmul.f32 0.1, %v4395_v50  ;;  %v3720_v4 = vpop.f32.mrb[5].mxu1 }
 0x26a   : > { %vm3787_vm4 = vcmp.ge.f32.partialorder %v3720_v4, 0.0  ;;  %v3819_v42 = vmul.f32 0.1, %v3720_v4  ;;  %v4396_v54 = vpop.f32.mrb[6].mxu1 }
 0x26b   : > { %v3853_v39 = vsel %vm3789_vm3, %v4395_v50, %v3821_v21  ;;  %vm3790_vm5 = vcmp.ge.f32.partialorder %v4396_v54, 0.0  ;;  %v3822_v3 = vmul.f32 0.1, %v4396_v54  ;;  %v3723_v26 = vpop.f32.mrb[7].mxu1 }
 0x26c   : > { %3885 = vst [vmem:[%s6589_s26 + $0xb0] sm:$0xff] %v3853_v39  ;;  %v3851_v13 = vsel %vm3787_vm4, %v3720_v4, %v3819_v42  ;;  %vm3788_vm6 = vcmp.ge.f32.partialorder %v3723_v26, 0.0  ;;  %v3820_v19 = vmul.f32 0.1, %v3723_v26 }
 0x26d   : > { %3883 = vst [vmem:[%s6589_s26 + $0xa0] sm:$0xff] %v3851_v13  ;;  %v3854_v11 = vsel %vm3790_vm5, %v4396_v54, %v3822_v3 }
 0x26e   : > { %3886 = vst [vmem:[%s6589_s26 + $0xb8] sm:$0xff] %v3854_v11  ;;  %v3852_v24 = vsel %vm3788_vm6, %v3723_v26, %v3820_v19 }
 0x26f   : > { %3884 = vst [vmem:[%s6589_s26 + $0xa8] sm:$0xff] %v3852_v24 }
 0x295   : > { %v4383_v14 = vpop.f32.mrb[8].mxu0 }
 0x296   : > { %vm3777_vm8 = vcmp.ge.f32.partialorder %v4383_v14, 0.0  ;;  %v3809_v37 = vmul.f32 0.1, %v4383_v14  ;;  %v3672_v44 = vpop.f32.mrb[9].mxu0 }
 0x297   : > { %vm3775_vm7 = vcmp.ge.f32.partialorder %v3672_v44, 0.0  ;;  %v3807_v36 = vmul.f32 0.1, %v3672_v44  ;;  %v4384_v46 = vpop.f32.mrb[10].mxu0 }
 0x298   : > { %v3841_v10 = vsel %vm3777_vm8, %v4383_v14, %v3809_v37  ;;  %vm3778_vm10 = vcmp.ge.f32.partialorder %v4384_v46, 0.0  ;;  %v3810_v62 = vmul.f32 0.1, %v4384_v46  ;;  %v3675_v23 = vpop.f32.mrb[11].mxu0 }
 0x299   : > { %3873 = vst [vmem:[%s6589_s26 + $0x50] sm:$0xff] %v3841_v10  ;;  %v3839_v38 = vsel %vm3775_vm7, %v3672_v44, %v3807_v36  ;;  %vm3776_vm11 = vcmp.ge.f32.partialorder %v3675_v23, 0.0  ;;  %v3808_v53 = vmul.f32 0.1, %v3675_v23 }
 0x29a   : > { %3871 = vst [vmem:[%s6589_s26 + $0x40] sm:$0xff] %v3839_v38  ;;  %v3842_v0 = vsel %vm3778_vm10, %v4384_v46, %v3810_v62 }
 0x29b   : > { %3874 = vst [vmem:[%s6589_s26 + $0x58] sm:$0xff] %v3842_v0  ;;  %v3840_v51 = vsel %vm3776_vm11, %v3675_v23, %v3808_v53 }
 0x29c   : > { %3872 = vst [vmem:[%s6589_s26 + $0x48] sm:$0xff] %v3840_v51 }
 0x2a9   : > { %v4399_v59 = vpop.f32.mrb[8].mxu1 }
 0x2aa   : > { %vm3793_vm12 = vcmp.ge.f32.partialorder %v4399_v59, 0.0  ;;  %v3825_v32 = vmul.f32 0.1, %v4399_v59  ;;  %v3736_v57 = vpop.f32.mrb[9].mxu1 }
 0x2ab   : > { %vm3791_vm13 = vcmp.ge.f32.partialorder %v3736_v57, 0.0  ;;  %v3823_v47 = vmul.f32 0.1, %v3736_v57  ;;  %v4400_v16 = vpop.f32.mrb[10].mxu1 }
 0x2ac   : > { %v3857_v28 = vsel %vm3793_vm12, %v4399_v59, %v3825_v32  ;;  %vm3794_vm9 = vcmp.ge.f32.partialorder %v4400_v16, 0.0  ;;  %v3826_v18 = vmul.f32 0.1, %v4400_v16  ;;  %v3739_v41 = vpop.f32.mrb[11].mxu1 }
 0x2ad   : > { %3889 = vst [vmem:[%s6589_s26 + $0xd0] sm:$0xff] %v3857_v28  ;;  %v3855_v55 = vsel %vm3791_vm13, %v3736_v57, %v3823_v47  ;;  %vm3792_vm0 = vcmp.ge.f32.partialorder %v3739_v41, 0.0  ;;  %v3824_v60 = vmul.f32 0.1, %v3739_v41 }
 0x2ae   : > { %3887 = vst [vmem:[%s6589_s26 + $0xc0] sm:$0xff] %v3855_v55  ;;  %v3858_v22 = vsel %vm3794_vm9, %v4400_v16, %v3826_v18 }
 0x2af   : > { %3890 = vst [vmem:[%s6589_s26 + $0xd8] sm:$0xff] %v3858_v22  ;;  %v3856_v61 = vsel %vm3792_vm0, %v3739_v41, %v3824_v60 }
 0x2b0   : > { %3888 = vst [vmem:[%s6589_s26 + $0xc8] sm:$0xff] %v3856_v61 }
 0x2e6   : > { %v4387_v25 = vpop.f32.mrb[12].mxu0 }
 0x2e7   : > { %vm3781_vm14 = vcmp.ge.f32.partialorder %v4387_v25, 0.0  ;;  %v3813_v35 = vmul.f32 0.1, %v4387_v25  ;;  %v3688_v45 = vpop.f32.mrb[13].mxu0 }
 0x2e8   : > { %vm3779_vm15 = vcmp.ge.f32.partialorder %v3688_v45, 0.0  ;;  %v3811_v63 = vmul.f32 0.1, %v3688_v45  ;;  %v4388_v48 = vpop.f32.mrb[14].mxu0 }
 0x2e9   : > { %v3845_v52 = vsel %vm3781_vm14, %v4387_v25, %v3813_v35  ;;  %vm3782_vm1 = vcmp.ge.f32.partialorder %v4388_v48, 0.0  ;;  %v3814_v12 = vmul.f32 0.1, %v4388_v48  ;;  %v3691_v40 = vpop.f32.mrb[15].mxu0 }
 0x2ea   : > { %3877 = vst [vmem:[%s6589_s26 + $0x70] sm:$0xff] %v3845_v52  ;;  %v3843_v27 = vsel %vm3779_vm15, %v3688_v45, %v3811_v63  ;;  %vm3780_vm2 = vcmp.ge.f32.partialorder %v3691_v40, 0.0  ;;  %v3812_v9 = vmul.f32 0.1, %v3691_v40 }
 0x2eb   : > { %3875 = vst [vmem:[%s6589_s26 + $0x60] sm:$0xff] %v3843_v27  ;;  %v3846_v56 = vsel %vm3782_vm1, %v4388_v48, %v3814_v12 }
 0x2ec   : > { %3878 = vst [vmem:[%s6589_s26 + $0x78] sm:$0xff] %v3846_v56  ;;  %v3844_v7 = vsel %vm3780_vm2, %v3691_v40, %v3812_v9 }
 0x2ed   : > { %3876 = vst [vmem:[%s6589_s26 + $0x68] sm:$0xff] %v3844_v7 }
 0x2f1   : > { %v4403_v15 = vpop.f32.mrb[12].mxu1 }
 0x2f2   : > { %vm3797_vm3 = vcmp.ge.f32.partialorder %v4403_v15, 0.0  ;;  %v3829_v31 = vmul.f32 0.1, %v4403_v15  ;;  %v3752_v33 = vpop.f32.mrb[13].mxu1 }
 0x2f3   : > { %vm3795_vm4 = vcmp.ge.f32.partialorder %v3752_v33, 0.0  ;;  %v3827_v1 = vmul.f32 0.1, %v3752_v33  ;;  %v4404_v34 = vpop.f32.mrb[14].mxu1 }
 0x2f4   : > { %v3861_v17 = vsel %vm3797_vm3, %v4403_v15, %v3829_v31  ;;  %vm3798_vm5 = vcmp.ge.f32.partialorder %v4404_v34, 0.0  ;;  %v3830_v5 = vmul.f32 0.1, %v4404_v34  ;;  %v3755_v8 = vpop.f32.mrb[15].mxu1 }
 0x2f5   : > { %3893 = vst [vmem:[%s6589_s26 + $0xf0] sm:$0xff] %v3861_v17  ;;  %v3859_v58 = vsel %vm3795_vm4, %v3752_v33, %v3827_v1  ;;  %vm3796_vm6 = vcmp.ge.f32.partialorder %v3755_v8, 0.0  ;;  %v3828_v20 = vmul.f32 0.1, %v3755_v8 }
 0x2f6   : > { %3891 = vst [vmem:[%s6589_s26 + $0xe0] sm:$0xff] %v3859_v58  ;;  %v3862_v2 = vsel %vm3798_vm5, %v4404_v34, %v3830_v5 }
 0x2f7   : > { %3894 = vst [vmem:[%s6589_s26 + $0xf8] sm:$0xff] %v3862_v2  ;;  %v3860_v49 = vsel %vm3796_vm6, %v3755_v8, %v3828_v20 }
 0x2f8   : > { %3892 = vst [vmem:[%s6589_s26 + $0xe8] sm:$0xff] %v3860_v49 }
 0x2f9   : > { %4557 = shalt.err (!%p4554_p5)
}
 0x2fa   : > { %s4558_s15 = scalar_lea.hbm %s6668_s12, 4096  ;;  %s4562_s20 = scalar_lea.hbm %s6726_s2, 8192 }
 0x2fb   : > { %p4559_p6 = scmp.ne.s32.totalorder %s6668_s12, %s4558_s15  ;;  %p4563_p10 = scmp.lt.u32.totalorder %s6668_s12, %s6726_s2 }
 0x2fc   : > { %p4564_p11 = scmp.lt.u32.totalorder %s4562_s20, %s4558_s15  ;;  %p4566_p13 = scmp.lt.u32.totalorder %s4558_s15, %s6668_s12 }
 0x2fd   : > { %p4560_p7 = pnand %p4559_p6, %p4690_p4 }
 0x2fe   : > { %p4565_p12 = por %p4564_p11, %p4563_p10 }
 0x2ff   : > { %p4561_p9 = pneg %p4560_p7 }
 0x300   : > { %p4567_p0 = por %p4566_p13, %p4565_p12 }
 0x302   : > { %p4568_p1 = pnand %p4567_p0, %p4561_p9 }
 0x304   : > { %4571 = shalt.err (!%p4568_p1)
}
 0x305   : > { %s4634_s25 = smov 128  }
 0x306   : > { %4413 = dma.vmem_to_hbm [thread:$0]  (%p4690_p4), %s6671_s29, 4096, %s6668_s12, %s6677_s4, %s4634_s25, %s4634_s25, %s4625_s28  }
 0x307 PF: > { %p4419_p2 = scmp.ge.s32.totalorder %s4622_s14, 2  ;;  %s3926_s26 = sand.u32 1, %s4602_s9  }
 0x308   : > { %s3927_s27 = scalar_lea.sflag [#allocation4], %s3926_s26 }
 0x309   : > { %p4416_p3 = pnand %p4419_p2, %p4697_p8 }
 0x30b   : > { %4597 = dma.done.wait (!%p4416_p3), %s3927_s27, 4096  }
 0x30c   : > { %4599 = vsyncadd (!%p4416_p3), %s3927_s27, 4294963200  ;;  %s15_s14 = sadd.s32 1, %s4622_s14   ;;  %s6744_s9 = smov %s4606_s10 }
 0x30d   : > { %p12_p5 = scmp.ge.s32.totalorder %s15_s14, 4   ;;  %s6745_s10 = smov %s4610_s11 }
 0x30e   : > { %s6746_s11 = smov %s4703_s22  ;;  %s6747_s12 = smov %s4618_s13 }
 0x30f   : > { %s6748_s13 = smov %s6750_s17  ;;  %14 = sbr.rel (!%p12_p5) target bundleno = 4 (0x4), region = 71 }
 0x316   :  { %3932 = vsyncpa [#allocation4], 1 }
 0x317   :  { %3934 = vsyncpa [#allocation4 + $0x1], 1 }

</bundles_post_ra>
